<compile_context>
chip_gen: v7x
topology: tpu7x:2x2x1
jax: 0.10.0
libtpu: 0.0.40
codegen_flags: <defaults>
</compile_context>

<pallas_src>
import functools

import jax
import jax.numpy as jnp
from jax.experimental import pallas as pl
from jax.experimental.pallas import tpu as pltpu


def _rnn_kernel(x_ref,          # (T*Bp, I)   bf16, time-major flat
                wih0_ref,       # (I, 4Hp)    bf16, gate order (i,f,o,g), per-gate padded
                whh0_ref,       # (Hp, 4Hp)   bf16
                b0_ref,         # (1, 4Hp)    f32
                wcat1_ref,      # (2Hp, 4Hp)  bf16, [W_ih1; W_hh1] stacked
                b1_ref,         # (1, 4Hp)    f32
                wfc_ref,        # (Hp, O)     bf16
                bfc_ref,        # (1, O)      f32
                out_ref,        # (Bp, O)     f32
                *, hidden_pad, seq_len, batch_pad):
    Hp = hidden_pad
    T = seq_len
    Bp = batch_pad

    # --- hoisted layer-0 input projection: ONE MXU matmul for all T steps, bias folded ---
    proj0 = jnp.dot(x_ref[...], wih0_ref[...],
                    preferred_element_type=jnp.float32) + b0_ref[...]      # (T*Bp, 4Hp) f32
    proj0 = proj0.reshape(T, Bp, 4 * Hp)                                   # tile-aligned view

    whh0 = whh0_ref[...]
    wcat1 = wcat1_ref[...]
    b1 = b1_ref[...]

    def cell(gates, c):
        # gate column order (i, f, o, g), each Hp lanes wide (tile-aligned slices).
        sig = jax.nn.sigmoid(gates[:, :3 * Hp])      # one EUP launch for i, f, o
        g_g = jnp.tanh(gates[:, 3 * Hp:])            # one EUP launch for g
        i_g = sig[:, 0 * Hp:1 * Hp]
        f_g = sig[:, 1 * Hp:2 * Hp]
        o_g = sig[:, 2 * Hp:3 * Hp]
        c_new = f_g * c + i_g * g_g
        h_new = o_g * jnp.tanh(c_new)
        return h_new, c_new

    zeros = jnp.zeros((Bp, Hp), jnp.float32)
    h0, c0 = zeros, zeros
    h1, c1 = zeros, zeros

    # --- wavefront over time: iteration t does layer-0 step t and layer-1 step t-1 ---
    # Within an iteration both matmuls depend only on last iteration's state, so their
    # MXU/EUP latencies overlap.  T is tiny (8), keep the static unroll.
    for t in range(T):
        gates0 = proj0[t] + jnp.dot(h0.astype(jnp.bfloat16), whh0,
                                    preferred_element_type=jnp.float32)
        if t >= 1:
            xin1 = jnp.concatenate([h0.astype(jnp.bfloat16), h1.astype(jnp.bfloat16)], axis=1)
            gates1 = jnp.dot(xin1, wcat1, preferred_element_type=jnp.float32) + b1
            h1, c1 = cell(gates1, c1)
        h0, c0 = cell(gates0, c0)

    # Final layer-1 step (t = T-1).
    xin1 = jnp.concatenate([h0.astype(jnp.bfloat16), h1.astype(jnp.bfloat16)], axis=1)
    gates1 = jnp.dot(xin1, wcat1, preferred_element_type=jnp.float32) + b1
    h1, c1 = cell(gates1, c1)

    # fc on the last timestep of the top layer.
    out = jnp.dot(h1.astype(jnp.bfloat16), wfc_ref[...],
                  preferred_element_type=jnp.float32) + bfc_ref[...]
    out_ref[...] = out.astype(out_ref.dtype)


def rnn_forward(x, params, *, hidden_size, num_layers):
    """Wrapper: does all layout plumbing (transpose, gate reorder, padding, bf16 cast) host-side."""
    assert num_layers == 2, "kernel is specialized for num_layers=2"
    B, T, I = x.shape
    H = hidden_size
    O = params["w_fc"].shape[0]

    Hp = ((H + 127) // 128) * 128          # pad each gate to a full 128-lane tile
    Bp = ((B + 7) // 8) * 8                # pad batch to a full sublane tile

    def prep_lstm_weight(w, in_pad):
        # w: (4H, in) PyTorch orientation, gate order (i, f, g, o).
        w = jnp.asarray(w, jnp.float32)
        gi, gf, gg, go = jnp.split(w, 4, axis=0)            # each (H, in)

        def block(wg):
            wt = wg.T                                        # (in, H)
            return jnp.pad(wt, ((0, in_pad - wt.shape[0]), (0, Hp - H)))

        # reorder to (i, f, o, g); padded columns/rows are zero.
        return jnp.concatenate([block(gi), block(gf), block(go), block(gg)],
                               axis=1).astype(jnp.bfloat16)  # (in_pad, 4Hp)

    def prep_bias(b):
        # b: (1, 4H) already b_ih + b_hh, gate order (i, f, g, o).
        b = jnp.asarray(b, jnp.float32).reshape(4, H)
        bi, bf, bg, bo = b[0], b[1], b[2], b[3]

        def pad(v):
            return jnp.pad(v, (0, Hp - H))

        return jnp.concatenate([pad(bi), pad(bf), pad(bo), pad(bg)]).reshape(1, 4 * Hp)

    wih0 = prep_lstm_weight(params["w_ih0"], I)              # (I, 4Hp)
    whh0 = prep_lstm_weight(params["w_hh0"], Hp)             # (Hp, 4Hp)
    b0 = prep_bias(params["b0"])                             # (1, 4Hp)
    wih1 = prep_lstm_weight(params["w_ih1"], Hp)             # (Hp, 4Hp)
    whh1 = prep_lstm_weight(params["w_hh1"], Hp)             # (Hp, 4Hp)
    wcat1 = jnp.concatenate([wih1, whh1], axis=0)            # (2Hp, 4Hp) for fused layer-1 matmul
    b1 = prep_bias(params["b1"])                             # (1, 4Hp)

    wfc = jnp.pad(jnp.asarray(params["w_fc"], jnp.float32).T,
                  ((0, Hp - H), (0, 0))).astype(jnp.bfloat16)  # (Hp, O)
    bfc = jnp.asarray(params["b_fc"], jnp.float32)             # (1, O)

    # x: (B, T, I) -> pad batch, time-major, flatten, bf16.
    x_p = jnp.pad(jnp.asarray(x, jnp.float32), ((0, Bp - B), (0, 0), (0, 0)))
    x_tm = jnp.transpose(x_p, (1, 0, 2)).reshape(T * Bp, I).astype(jnp.bfloat16)

    inputs = (x_tm, wih0, whh0, b0, wcat1, b1, wfc, bfc)

    kernel = functools.partial(_rnn_kernel, hidden_pad=Hp, seq_len=T, batch_pad=Bp)

    vmem_spec = pl.BlockSpec(memory_space=pltpu.MemorySpace.VMEM)
    out_pad = pl.pallas_call(
        kernel,
        out_shape=jax.ShapeDtypeStruct((Bp, O), jnp.float32),
        in_specs=[vmem_spec] * len(inputs),
        out_specs=vmem_spec,
    )(*inputs)
    return out_pad[:B]                                       # drop padded batch rows


def init_params(key, *, input_size, hidden_size, num_layers, output_size):
    assert num_layers == 2
    ks = list(jax.random.split(key, 12))
    H = hidden_size

    def u(k, shape, scale):
        return jax.random.uniform(k, shape, jnp.float32, -scale, scale)

    s = 1.0 / jnp.sqrt(H)
    return {
        # LSTM layer 0 (PyTorch orientation: (4H, in) / (4H, H); gate order i,f,g,o)
        "w_ih0": u(ks[0], (4 * H, input_size), s),
        "w_hh0": u(ks[1], (4 * H, H), s),
        "b0":    u(ks[2], (1, 4 * H), s) + u(ks[3], (1, 4 * H), s),   # b_ih + b_hh folded
        # LSTM layer 1
        "w_ih1": u(ks[4], (4 * H, H), s),
        "w_hh1": u(ks[5], (4 * H, H), s),
        "b1":    u(ks[6], (1, 4 * H), s) + u(ks[7], (1, 4 * H), s),
        # fc: hidden_size -> output_size
        "w_fc": u(ks[8], (output_size, H), s),
        "b_fc": u(ks[9], (1, output_size), s),
    }


def rnn_reference(x, params, *, hidden_size, num_layers):
    """Pure-JAX f32 reference with identical torch.nn.LSTM semantics."""
    H = hidden_size
    B, T, _ = x.shape
    layer_in = x
    for l in range(num_layers):
        wih, whh, b = params[f"w_ih{l}"], params[f"w_hh{l}"], params[f"b{l}"]
        h = jnp.zeros((B, H), jnp.float32)
        c = jnp.zeros((B, H), jnp.float32)
        outs = []
        for t in range(T):
            g = layer_in[:, t, :] @ wih.T + h @ whh.T + b
            i_g = jax.nn.sigmoid(g[:, 0 * H:1 * H])
            f_g = jax.nn.sigmoid(g[:, 1 * H:2 * H])
            g_g = jnp.tanh(g[:, 2 * H:3 * H])
            o_g = jax.nn.sigmoid(g[:, 3 * H:4 * H])
            c = f_g * c + i_g * g_g
            h = o_g * jnp.tanh(c)
            outs.append(h)
        layer_in = jnp.stack(outs, axis=1)
    return layer_in[:, -1, :] @ params["w_fc"].T + params["b_fc"]


if __name__ == "__main__":
    # Small shapes consistent with the module: x is (batch, seq, input_size).
    B, T = 2, 8
    input_size, hidden_size, num_layers, output_size = 16, 32, 2, 8

    key = jax.random.PRNGKey(0)
    k_x, k_p = jax.random.split(key)
    x = jax.random.normal(k_x, (B, T, input_size), jnp.float32)
    params = init_params(k_p, input_size=input_size, hidden_size=hidden_size,
                         num_layers=num_layers, output_size=output_size)

    out = rnn_forward(x, params, hidden_size=hidden_size, num_layers=num_layers)
    jax.block_until_ready(out)
    assert out.shape == (B, output_size)

    ref = rnn_reference(x, params, hidden_size=hidden_size, num_layers=num_layers)
    assert jnp.allclose(out, ref, atol=5e-2, rtol=5e-2), "kernel diverges from f32 reference"

    print("KERNEL_OK")
</pallas_src>

<mosaic_0001>
module attributes {stable_mosaic.version = 11 : i64} {
  func.func @_rnn_kernel(%arg0: memref<64x16xbf16, #tpu.memory_space<vmem>>, %arg1: memref<16x512xbf16, #tpu.memory_space<vmem>>, %arg2: memref<128x512xbf16, #tpu.memory_space<vmem>>, %arg3: memref<1x512xf32, #tpu.memory_space<vmem>>, %arg4: memref<256x512xbf16, #tpu.memory_space<vmem>>, %arg5: memref<1x512xf32, #tpu.memory_space<vmem>>, %arg6: memref<128x8xbf16, #tpu.memory_space<vmem>>, %arg7: memref<1x8xf32, #tpu.memory_space<vmem>>, %arg8: memref<8x8xf32, #tpu.memory_space<vmem>>) attributes {dimension_semantics = [], scalar_prefetch = 0 : i64, scratch_operands = 0 : i64, tpu.core_type = #tpu.core_type<tc>} {
    %c0 = arith.constant 0 : index
    %c0_0 = arith.constant 0 : index
    %0 = vector.load %arg0[%c0, %c0_0] : memref<64x16xbf16, #tpu.memory_space<vmem>>, vector<64x16xbf16>
    %c0_1 = arith.constant 0 : index
    %c0_2 = arith.constant 0 : index
    %1 = vector.load %arg1[%c0_1, %c0_2] : memref<16x512xbf16, #tpu.memory_space<vmem>>, vector<16x512xbf16>
    %cst = arith.constant dense<0.000000e+00> : vector<64x512xf32>
    %2 = tpu.matmul %0, %1, %cst {dimension_numbers = #tpu.dot_dimension_numbers<[1], [0], [0], [1], [0, 0, 1, 1], [], []>} : vector<64x16xbf16>, vector<16x512xbf16>, vector<64x512xf32> -> vector<64x512xf32>
    %c0_3 = arith.constant 0 : index
    %c0_4 = arith.constant 0 : index
    %3 = vector.load %arg3[%c0_3, %c0_4] : memref<1x512xf32, #tpu.memory_space<vmem>>, vector<1x512xf32>
    %4 = vector.broadcast %3 : vector<1x512xf32> to vector<64x512xf32>
    %5 = arith.addf %2, %4 : vector<64x512xf32>
    %6 = vector.shape_cast %5 : vector<64x512xf32> to vector<8x8x512xf32>
    %c0_5 = arith.constant 0 : index
    %c0_6 = arith.constant 0 : index
    %7 = vector.load %arg2[%c0_5, %c0_6] : memref<128x512xbf16, #tpu.memory_space<vmem>>, vector<128x512xbf16>
    %c0_7 = arith.constant 0 : index
    %c0_8 = arith.constant 0 : index
    %8 = vector.load %arg4[%c0_7, %c0_8] : memref<256x512xbf16, #tpu.memory_space<vmem>>, vector<256x512xbf16>
    %c0_9 = arith.constant 0 : index
    %c0_10 = arith.constant 0 : index
    %9 = vector.load %arg5[%c0_9, %c0_10] : memref<1x512xf32, #tpu.memory_space<vmem>>, vector<1x512xf32>
    %cst_11 = arith.constant 0.000000e+00 : f32
    %10 = vector.broadcast %cst_11 : f32 to vector<8x128xf32>
    %11 = vector.extract_strided_slice %6 {offsets = [0, 0, 0], sizes = [1, 8, 512], strides = [1, 1, 1]} : vector<8x8x512xf32> to vector<1x8x512xf32>
    %12 = vector.shape_cast %11 : vector<1x8x512xf32> to vector<8x512xf32>
    %13 = arith.truncf %10 : vector<8x128xf32> to vector<8x128xbf16>
    %cst_12 = arith.constant dense<0.000000e+00> : vector<8x512xf32>
    %14 = tpu.matmul %13, %7, %cst_12 {dimension_numbers = #tpu.dot_dimension_numbers<[1], [0], [0], [1], [0, 0, 1, 1], [], []>} : vector<8x128xbf16>, vector<128x512xbf16>, vector<8x512xf32> -> vector<8x512xf32>
    %15 = arith.addf %12, %14 : vector<8x512xf32>
    %16 = vector.extract_strided_slice %15 {offsets = [0, 0], sizes = [8, 384], strides = [1, 1]} : vector<8x512xf32> to vector<8x384xf32>
    %17 = arith.negf %16 : vector<8x384xf32>
    %18 = math.exp %17 : vector<8x384xf32>
    %cst_13 = arith.constant 1.000000e+00 : f32
    %19 = vector.broadcast %cst_13 : f32 to vector<8x384xf32>
    %20 = arith.addf %19, %18 : vector<8x384xf32>
    %21 = arith.divf %19, %20 : vector<8x384xf32>
    %22 = vector.extract_strided_slice %15 {offsets = [0, 384], sizes = [8, 128], strides = [1, 1]} : vector<8x512xf32> to vector<8x128xf32>
    %23 = math.tanh %22 : vector<8x128xf32>
    %24 = vector.extract_strided_slice %21 {offsets = [0, 0], sizes = [8, 128], strides = [1, 1]} : vector<8x384xf32> to vector<8x128xf32>
    %25 = vector.extract_strided_slice %21 {offsets = [0, 128], sizes = [8, 128], strides = [1, 1]} : vector<8x384xf32> to vector<8x128xf32>
    %26 = vector.extract_strided_slice %21 {offsets = [0, 256], sizes = [8, 128], strides = [1, 1]} : vector<8x384xf32> to vector<8x128xf32>
    %27 = arith.mulf %25, %10 : vector<8x128xf32>
    %28 = arith.mulf %24, %23 : vector<8x128xf32>
    %29 = arith.addf %27, %28 : vector<8x128xf32>
    %30 = math.tanh %29 : vector<8x128xf32>
    %31 = arith.mulf %26, %30 : vector<8x128xf32>
    %32 = vector.extract_strided_slice %6 {offsets = [1, 0, 0], sizes = [1, 8, 512], strides = [1, 1, 1]} : vector<8x8x512xf32> to vector<1x8x512xf32>
    %33 = vector.shape_cast %32 : vector<1x8x512xf32> to vector<8x512xf32>
    %34 = arith.truncf %31 : vector<8x128xf32> to vector<8x128xbf16>
    %cst_14 = arith.constant dense<0.000000e+00> : vector<8x512xf32>
    %35 = tpu.matmul %34, %7, %cst_14 {dimension_numbers = #tpu.dot_dimension_numbers<[1], [0], [0], [1], [0, 0, 1, 1], [], []>} : vector<8x128xbf16>, vector<128x512xbf16>, vector<8x512xf32> -> vector<8x512xf32>
    %36 = arith.addf %33, %35 : vector<8x512xf32>
    %37 = arith.truncf %31 : vector<8x128xf32> to vector<8x128xbf16>
    %38 = arith.truncf %10 : vector<8x128xf32> to vector<8x128xbf16>
    %39 = tpu.concatenate %37, %38 in 1 : vector<8x128xbf16>, vector<8x128xbf16> -> vector<8x256xbf16>
    %cst_15 = arith.constant dense<0.000000e+00> : vector<8x512xf32>
    %40 = tpu.matmul %39, %8, %cst_15 {dimension_numbers = #tpu.dot_dimension_numbers<[1], [0], [0], [1], [0, 0, 1, 1], [], []>} : vector<8x256xbf16>, vector<256x512xbf16>, vector<8x512xf32> -> vector<8x512xf32>
    %41 = vector.broadcast %9 : vector<1x512xf32> to vector<8x512xf32>
    %42 = arith.addf %40, %41 : vector<8x512xf32>
    %43 = vector.extract_strided_slice %42 {offsets = [0, 0], sizes = [8, 384], strides = [1, 1]} : vector<8x512xf32> to vector<8x384xf32>
    %44 = arith.negf %43 : vector<8x384xf32>
    %45 = math.exp %44 : vector<8x384xf32>
    %cst_16 = arith.constant 1.000000e+00 : f32
    %46 = vector.broadcast %cst_16 : f32 to vector<8x384xf32>
    %47 = arith.addf %46, %45 : vector<8x384xf32>
    %48 = arith.divf %46, %47 : vector<8x384xf32>
    %49 = vector.extract_strided_slice %42 {offsets = [0, 384], sizes = [8, 128], strides = [1, 1]} : vector<8x512xf32> to vector<8x128xf32>
    %50 = math.tanh %49 : vector<8x128xf32>
    %51 = vector.extract_strided_slice %48 {offsets = [0, 0], sizes = [8, 128], strides = [1, 1]} : vector<8x384xf32> to vector<8x128xf32>
    %52 = vector.extract_strided_slice %48 {offsets = [0, 128], sizes = [8, 128], strides = [1, 1]} : vector<8x384xf32> to vector<8x128xf32>
    %53 = vector.extract_strided_slice %48 {offsets = [0, 256], sizes = [8, 128], strides = [1, 1]} : vector<8x384xf32> to vector<8x128xf32>
    %54 = arith.mulf %52, %10 : vector<8x128xf32>
    %55 = arith.mulf %51, %50 : vector<8x128xf32>
    %56 = arith.addf %54, %55 : vector<8x128xf32>
    %57 = math.tanh %56 : vector<8x128xf32>
    %58 = arith.mulf %53, %57 : vector<8x128xf32>
    %59 = vector.extract_strided_slice %36 {offsets = [0, 0], sizes = [8, 384], strides = [1, 1]} : vector<8x512xf32> to vector<8x384xf32>
    %60 = arith.negf %59 : vector<8x384xf32>
    %61 = math.exp %60 : vector<8x384xf32>
    %cst_17 = arith.constant 1.000000e+00 : f32
    %62 = vector.broadcast %cst_17 : f32 to vector<8x384xf32>
    %63 = arith.addf %62, %61 : vector<8x384xf32>
    %64 = arith.divf %62, %63 : vector<8x384xf32>
    %65 = vector.extract_strided_slice %36 {offsets = [0, 384], sizes = [8, 128], strides = [1, 1]} : vector<8x512xf32> to vector<8x128xf32>
    %66 = math.tanh %65 : vector<8x128xf32>
    %67 = vector.extract_strided_slice %64 {offsets = [0, 0], sizes = [8, 128], strides = [1, 1]} : vector<8x384xf32> to vector<8x128xf32>
    %68 = vector.extract_strided_slice %64 {offsets = [0, 128], sizes = [8, 128], strides = [1, 1]} : vector<8x384xf32> to vector<8x128xf32>
    %69 = vector.extract_strided_slice %64 {offsets = [0, 256], sizes = [8, 128], strides = [1, 1]} : vector<8x384xf32> to vector<8x128xf32>
    %70 = arith.mulf %68, %29 : vector<8x128xf32>
    %71 = arith.mulf %67, %66 : vector<8x128xf32>
    %72 = arith.addf %70, %71 : vector<8x128xf32>
    %73 = math.tanh %72 : vector<8x128xf32>
    %74 = arith.mulf %69, %73 : vector<8x128xf32>
    %75 = vector.extract_strided_slice %6 {offsets = [2, 0, 0], sizes = [1, 8, 512], strides = [1, 1, 1]} : vector<8x8x512xf32> to vector<1x8x512xf32>
    %76 = vector.shape_cast %75 : vector<1x8x512xf32> to vector<8x512xf32>
    %77 = arith.truncf %74 : vector<8x128xf32> to vector<8x128xbf16>
    %cst_18 = arith.constant dense<0.000000e+00> : vector<8x512xf32>
    %78 = tpu.matmul %77, %7, %cst_18 {dimension_numbers = #tpu.dot_dimension_numbers<[1], [0], [0], [1], [0, 0, 1, 1], [], []>} : vector<8x128xbf16>, vector<128x512xbf16>, vector<8x512xf32> -> vector<8x512xf32>
    %79 = arith.addf %76, %78 : vector<8x512xf32>
    %80 = arith.truncf %74 : vector<8x128xf32> to vector<8x128xbf16>
    %81 = arith.truncf %58 : vector<8x128xf32> to vector<8x128xbf16>
    %82 = tpu.concatenate %80, %81 in 1 : vector<8x128xbf16>, vector<8x128xbf16> -> vector<8x256xbf16>
    %cst_19 = arith.constant dense<0.000000e+00> : vector<8x512xf32>
    %83 = tpu.matmul %82, %8, %cst_19 {dimension_numbers = #tpu.dot_dimension_numbers<[1], [0], [0], [1], [0, 0, 1, 1], [], []>} : vector<8x256xbf16>, vector<256x512xbf16>, vector<8x512xf32> -> vector<8x512xf32>
    %84 = vector.broadcast %9 : vector<1x512xf32> to vector<8x512xf32>
    %85 = arith.addf %83, %84 : vector<8x512xf32>
    %86 = vector.extract_strided_slice %85 {offsets = [0, 0], sizes = [8, 384], strides = [1, 1]} : vector<8x512xf32> to vector<8x384xf32>
    %87 = arith.negf %86 : vector<8x384xf32>
    %88 = math.exp %87 : vector<8x384xf32>
    %cst_20 = arith.constant 1.000000e+00 : f32
    %89 = vector.broadcast %cst_20 : f32 to vector<8x384xf32>
    %90 = arith.addf %89, %88 : vector<8x384xf32>
    %91 = arith.divf %89, %90 : vector<8x384xf32>
    %92 = vector.extract_strided_slice %85 {offsets = [0, 384], sizes = [8, 128], strides = [1, 1]} : vector<8x512xf32> to vector<8x128xf32>
    %93 = math.tanh %92 : vector<8x128xf32>
    %94 = vector.extract_strided_slice %91 {offsets = [0, 0], sizes = [8, 128], strides = [1, 1]} : vector<8x384xf32> to vector<8x128xf32>
    %95 = vector.extract_strided_slice %91 {offsets = [0, 128], sizes = [8, 128], strides = [1, 1]} : vector<8x384xf32> to vector<8x128xf32>
    %96 = vector.extract_strided_slice %91 {offsets = [0, 256], sizes = [8, 128], strides = [1, 1]} : vector<8x384xf32> to vector<8x128xf32>
    %97 = arith.mulf %95, %56 : vector<8x128xf32>
    %98 = arith.mulf %94, %93 : vector<8x128xf32>
    %99 = arith.addf %97, %98 : vector<8x128xf32>
    %100 = math.tanh %99 : vector<8x128xf32>
    %101 = arith.mulf %96, %100 : vector<8x128xf32>
    %102 = vector.extract_strided_slice %79 {offsets = [0, 0], sizes = [8, 384], strides = [1, 1]} : vector<8x512xf32> to vector<8x384xf32>
    %103 = arith.negf %102 : vector<8x384xf32>
    %104 = math.exp %103 : vector<8x384xf32>
    %cst_21 = arith.constant 1.000000e+00 : f32
    %105 = vector.broadcast %cst_21 : f32 to vector<8x384xf32>
    %106 = arith.addf %105, %104 : vector<8x384xf32>
    %107 = arith.divf %105, %106 : vector<8x384xf32>
    %108 = vector.extract_strided_slice %79 {offsets = [0, 384], sizes = [8, 128], strides = [1, 1]} : vector<8x512xf32> to vector<8x128xf32>
    %109 = math.tanh %108 : vector<8x128xf32>
    %110 = vector.extract_strided_slice %107 {offsets = [0, 0], sizes = [8, 128], strides = [1, 1]} : vector<8x384xf32> to vector<8x128xf32>
    %111 = vector.extract_strided_slice %107 {offsets = [0, 128], sizes = [8, 128], strides = [1, 1]} : vector<8x384xf32> to vector<8x128xf32>
    %112 = vector.extract_strided_slice %107 {offsets = [0, 256], sizes = [8, 128], strides = [1, 1]} : vector<8x384xf32> to vector<8x128xf32>
    %113 = arith.mulf %111, %72 : vector<8x128xf32>
    %114 = arith.mulf %110, %109 : vector<8x128xf32>
    %115 = arith.addf %113, %114 : vector<8x128xf32>
    %116 = math.tanh %115 : vector<8x128xf32>
    %117 = arith.mulf %112, %116 : vector<8x128xf32>
    %118 = vector.extract_strided_slice %6 {offsets = [3, 0, 0], sizes = [1, 8, 512], strides = [1, 1, 1]} : vector<8x8x512xf32> to vector<1x8x512xf32>
    %119 = vector.shape_cast %118 : vector<1x8x512xf32> to vector<8x512xf32>
    %120 = arith.truncf %117 : vector<8x128xf32> to vector<8x128xbf16>
    %cst_22 = arith.constant dense<0.000000e+00> : vector<8x512xf32>
    %121 = tpu.matmul %120, %7, %cst_22 {dimension_numbers = #tpu.dot_dimension_numbers<[1], [0], [0], [1], [0, 0, 1, 1], [], []>} : vector<8x128xbf16>, vector<128x512xbf16>, vector<8x512xf32> -> vector<8x512xf32>
    %122 = arith.addf %119, %121 : vector<8x512xf32>
    %123 = arith.truncf %117 : vector<8x128xf32> to vector<8x128xbf16>
    %124 = arith.truncf %101 : vector<8x128xf32> to vector<8x128xbf16>
    %125 = tpu.concatenate %123, %124 in 1 : vector<8x128xbf16>, vector<8x128xbf16> -> vector<8x256xbf16>
    %cst_23 = arith.constant dense<0.000000e+00> : vector<8x512xf32>
    %126 = tpu.matmul %125, %8, %cst_23 {dimension_numbers = #tpu.dot_dimension_numbers<[1], [0], [0], [1], [0, 0, 1, 1], [], []>} : vector<8x256xbf16>, vector<256x512xbf16>, vector<8x512xf32> -> vector<8x512xf32>
    %127 = vector.broadcast %9 : vector<1x512xf32> to vector<8x512xf32>
    %128 = arith.addf %126, %127 : vector<8x512xf32>
    %129 = vector.extract_strided_slice %128 {offsets = [0, 0], sizes = [8, 384], strides = [1, 1]} : vector<8x512xf32> to vector<8x384xf32>
    %130 = arith.negf %129 : vector<8x384xf32>
    %131 = math.exp %130 : vector<8x384xf32>
    %cst_24 = arith.constant 1.000000e+00 : f32
    %132 = vector.broadcast %cst_24 : f32 to vector<8x384xf32>
    %133 = arith.addf %132, %131 : vector<8x384xf32>
    %134 = arith.divf %132, %133 : vector<8x384xf32>
    %135 = vector.extract_strided_slice %128 {offsets = [0, 384], sizes = [8, 128], strides = [1, 1]} : vector<8x512xf32> to vector<8x128xf32>
    %136 = math.tanh %135 : vector<8x128xf32>
    %137 = vector.extract_strided_slice %134 {offsets = [0, 0], sizes = [8, 128], strides = [1, 1]} : vector<8x384xf32> to vector<8x128xf32>
    %138 = vector.extract_strided_slice %134 {offsets = [0, 128], sizes = [8, 128], strides = [1, 1]} : vector<8x384xf32> to vector<8x128xf32>
    %139 = vector.extract_strided_slice %134 {offsets = [0, 256], sizes = [8, 128], strides = [1, 1]} : vector<8x384xf32> to vector<8x128xf32>
    %140 = arith.mulf %138, %99 : vector<8x128xf32>
    %141 = arith.mulf %137, %136 : vector<8x128xf32>
    %142 = arith.addf %140, %141 : vector<8x128xf32>
    %143 = math.tanh %142 : vector<8x128xf32>
    %144 = arith.mulf %139, %143 : vector<8x128xf32>
    %145 = vector.extract_strided_slice %122 {offsets = [0, 0], sizes = [8, 384], strides = [1, 1]} : vector<8x512xf32> to vector<8x384xf32>
    %146 = arith.negf %145 : vector<8x384xf32>
    %147 = math.exp %146 : vector<8x384xf32>
    %cst_25 = arith.constant 1.000000e+00 : f32
    %148 = vector.broadcast %cst_25 : f32 to vector<8x384xf32>
    %149 = arith.addf %148, %147 : vector<8x384xf32>
    %150 = arith.divf %148, %149 : vector<8x384xf32>
    %151 = vector.extract_strided_slice %122 {offsets = [0, 384], sizes = [8, 128], strides = [1, 1]} : vector<8x512xf32> to vector<8x128xf32>
    %152 = math.tanh %151 : vector<8x128xf32>
    %153 = vector.extract_strided_slice %150 {offsets = [0, 0], sizes = [8, 128], strides = [1, 1]} : vector<8x384xf32> to vector<8x128xf32>
    %154 = vector.extract_strided_slice %150 {offsets = [0, 128], sizes = [8, 128], strides = [1, 1]} : vector<8x384xf32> to vector<8x128xf32>
    %155 = vector.extract_strided_slice %150 {offsets = [0, 256], sizes = [8, 128], strides = [1, 1]} : vector<8x384xf32> to vector<8x128xf32>
    %156 = arith.mulf %154, %115 : vector<8x128xf32>
    %157 = arith.mulf %153, %152 : vector<8x128xf32>
    %158 = arith.addf %156, %157 : vector<8x128xf32>
    %159 = math.tanh %158 : vector<8x128xf32>
    %160 = arith.mulf %155, %159 : vector<8x128xf32>
    %161 = vector.extract_strided_slice %6 {offsets = [4, 0, 0], sizes = [1, 8, 512], strides = [1, 1, 1]} : vector<8x8x512xf32> to vector<1x8x512xf32>
    %162 = vector.shape_cast %161 : vector<1x8x512xf32> to vector<8x512xf32>
    %163 = arith.truncf %160 : vector<8x128xf32> to vector<8x128xbf16>
    %cst_26 = arith.constant dense<0.000000e+00> : vector<8x512xf32>
    %164 = tpu.matmul %163, %7, %cst_26 {dimension_numbers = #tpu.dot_dimension_numbers<[1], [0], [0], [1], [0, 0, 1, 1], [], []>} : vector<8x128xbf16>, vector<128x512xbf16>, vector<8x512xf32> -> vector<8x512xf32>
    %165 = arith.addf %162, %164 : vector<8x512xf32>
    %166 = arith.truncf %160 : vector<8x128xf32> to vector<8x128xbf16>
    %167 = arith.truncf %144 : vector<8x128xf32> to vector<8x128xbf16>
    %168 = tpu.concatenate %166, %167 in 1 : vector<8x128xbf16>, vector<8x128xbf16> -> vector<8x256xbf16>
    %cst_27 = arith.constant dense<0.000000e+00> : vector<8x512xf32>
    %169 = tpu.matmul %168, %8, %cst_27 {dimension_numbers = #tpu.dot_dimension_numbers<[1], [0], [0], [1], [0, 0, 1, 1], [], []>} : vector<8x256xbf16>, vector<256x512xbf16>, vector<8x512xf32> -> vector<8x512xf32>
    %170 = vector.broadcast %9 : vector<1x512xf32> to vector<8x512xf32>
    %171 = arith.addf %169, %170 : vector<8x512xf32>
    %172 = vector.extract_strided_slice %171 {offsets = [0, 0], sizes = [8, 384], strides = [1, 1]} : vector<8x512xf32> to vector<8x384xf32>
    %173 = arith.negf %172 : vector<8x384xf32>
    %174 = math.exp %173 : vector<8x384xf32>
    %cst_28 = arith.constant 1.000000e+00 : f32
    %175 = vector.broadcast %cst_28 : f32 to vector<8x384xf32>
    %176 = arith.addf %175, %174 : vector<8x384xf32>
    %177 = arith.divf %175, %176 : vector<8x384xf32>
    %178 = vector.extract_strided_slice %171 {offsets = [0, 384], sizes = [8, 128], strides = [1, 1]} : vector<8x512xf32> to vector<8x128xf32>
    %179 = math.tanh %178 : vector<8x128xf32>
    %180 = vector.extract_strided_slice %177 {offsets = [0, 0], sizes = [8, 128], strides = [1, 1]} : vector<8x384xf32> to vector<8x128xf32>
    %181 = vector.extract_strided_slice %177 {offsets = [0, 128], sizes = [8, 128], strides = [1, 1]} : vector<8x384xf32> to vector<8x128xf32>
    %182 = vector.extract_strided_slice %177 {offsets = [0, 256], sizes = [8, 128], strides = [1, 1]} : vector<8x384xf32> to vector<8x128xf32>
    %183 = arith.mulf %181, %142 : vector<8x128xf32>
    %184 = arith.mulf %180, %179 : vector<8x128xf32>
    %185 = arith.addf %183, %184 : vector<8x128xf32>
    %186 = math.tanh %185 : vector<8x128xf32>
    %187 = arith.mulf %182, %186 : vector<8x128xf32>
    %188 = vector.extract_strided_slice %165 {offsets = [0, 0], sizes = [8, 384], strides = [1, 1]} : vector<8x512xf32> to vector<8x384xf32>
    %189 = arith.negf %188 : vector<8x384xf32>
    %190 = math.exp %189 : vector<8x384xf32>
    %cst_29 = arith.constant 1.000000e+00 : f32
    %191 = vector.broadcast %cst_29 : f32 to vector<8x384xf32>
    %192 = arith.addf %191, %190 : vector<8x384xf32>
    %193 = arith.divf %191, %192 : vector<8x384xf32>
    %194 = vector.extract_strided_slice %165 {offsets = [0, 384], sizes = [8, 128], strides = [1, 1]} : vector<8x512xf32> to vector<8x128xf32>
    %195 = math.tanh %194 : vector<8x128xf32>
    %196 = vector.extract_strided_slice %193 {offsets = [0, 0], sizes = [8, 128], strides = [1, 1]} : vector<8x384xf32> to vector<8x128xf32>
    %197 = vector.extract_strided_slice %193 {offsets = [0, 128], sizes = [8, 128], strides = [1, 1]} : vector<8x384xf32> to vector<8x128xf32>
    %198 = vector.extract_strided_slice %193 {offsets = [0, 256], sizes = [8, 128], strides = [1, 1]} : vector<8x384xf32> to vector<8x128xf32>
    %199 = arith.mulf %197, %158 : vector<8x128xf32>
    %200 = arith.mulf %196, %195 : vector<8x128xf32>
    %201 = arith.addf %199, %200 : vector<8x128xf32>
    %202 = math.tanh %201 : vector<8x128xf32>
    %203 = arith.mulf %198, %202 : vector<8x128xf32>
    %204 = vector.extract_strided_slice %6 {offsets = [5, 0, 0], sizes = [1, 8, 512], strides = [1, 1, 1]} : vector<8x8x512xf32> to vector<1x8x512xf32>
    %205 = vector.shape_cast %204 : vector<1x8x512xf32> to vector<8x512xf32>
    %206 = arith.truncf %203 : vector<8x128xf32> to vector<8x128xbf16>
    %cst_30 = arith.constant dense<0.000000e+00> : vector<8x512xf32>
    %207 = tpu.matmul %206, %7, %cst_30 {dimension_numbers = #tpu.dot_dimension_numbers<[1], [0], [0], [1], [0, 0, 1, 1], [], []>} : vector<8x128xbf16>, vector<128x512xbf16>, vector<8x512xf32> -> vector<8x512xf32>
    %208 = arith.addf %205, %207 : vector<8x512xf32>
    %209 = arith.truncf %203 : vector<8x128xf32> to vector<8x128xbf16>
    %210 = arith.truncf %187 : vector<8x128xf32> to vector<8x128xbf16>
    %211 = tpu.concatenate %209, %210 in 1 : vector<8x128xbf16>, vector<8x128xbf16> -> vector<8x256xbf16>
    %cst_31 = arith.constant dense<0.000000e+00> : vector<8x512xf32>
    %212 = tpu.matmul %211, %8, %cst_31 {dimension_numbers = #tpu.dot_dimension_numbers<[1], [0], [0], [1], [0, 0, 1, 1], [], []>} : vector<8x256xbf16>, vector<256x512xbf16>, vector<8x512xf32> -> vector<8x512xf32>
    %213 = vector.broadcast %9 : vector<1x512xf32> to vector<8x512xf32>
    %214 = arith.addf %212, %213 : vector<8x512xf32>
    %215 = vector.extract_strided_slice %214 {offsets = [0, 0], sizes = [8, 384], strides = [1, 1]} : vector<8x512xf32> to vector<8x384xf32>
    %216 = arith.negf %215 : vector<8x384xf32>
    %217 = math.exp %216 : vector<8x384xf32>
    %cst_32 = arith.constant 1.000000e+00 : f32
    %218 = vector.broadcast %cst_32 : f32 to vector<8x384xf32>
    %219 = arith.addf %218, %217 : vector<8x384xf32>
    %220 = arith.divf %218, %219 : vector<8x384xf32>
    %221 = vector.extract_strided_slice %214 {offsets = [0, 384], sizes = [8, 128], strides = [1, 1]} : vector<8x512xf32> to vector<8x128xf32>
    %222 = math.tanh %221 : vector<8x128xf32>
    %223 = vector.extract_strided_slice %220 {offsets = [0, 0], sizes = [8, 128], strides = [1, 1]} : vector<8x384xf32> to vector<8x128xf32>
    %224 = vector.extract_strided_slice %220 {offsets = [0, 128], sizes = [8, 128], strides = [1, 1]} : vector<8x384xf32> to vector<8x128xf32>
    %225 = vector.extract_strided_slice %220 {offsets = [0, 256], sizes = [8, 128], strides = [1, 1]} : vector<8x384xf32> to vector<8x128xf32>
    %226 = arith.mulf %224, %185 : vector<8x128xf32>
    %227 = arith.mulf %223, %222 : vector<8x128xf32>
    %228 = arith.addf %226, %227 : vector<8x128xf32>
    %229 = math.tanh %228 : vector<8x128xf32>
    %230 = arith.mulf %225, %229 : vector<8x128xf32>
    %231 = vector.extract_strided_slice %208 {offsets = [0, 0], sizes = [8, 384], strides = [1, 1]} : vector<8x512xf32> to vector<8x384xf32>
    %232 = arith.negf %231 : vector<8x384xf32>
    %233 = math.exp %232 : vector<8x384xf32>
    %cst_33 = arith.constant 1.000000e+00 : f32
    %234 = vector.broadcast %cst_33 : f32 to vector<8x384xf32>
    %235 = arith.addf %234, %233 : vector<8x384xf32>
    %236 = arith.divf %234, %235 : vector<8x384xf32>
    %237 = vector.extract_strided_slice %208 {offsets = [0, 384], sizes = [8, 128], strides = [1, 1]} : vector<8x512xf32> to vector<8x128xf32>
    %238 = math.tanh %237 : vector<8x128xf32>
    %239 = vector.extract_strided_slice %236 {offsets = [0, 0], sizes = [8, 128], strides = [1, 1]} : vector<8x384xf32> to vector<8x128xf32>
    %240 = vector.extract_strided_slice %236 {offsets = [0, 128], sizes = [8, 128], strides = [1, 1]} : vector<8x384xf32> to vector<8x128xf32>
    %241 = vector.extract_strided_slice %236 {offsets = [0, 256], sizes = [8, 128], strides = [1, 1]} : vector<8x384xf32> to vector<8x128xf32>
    %242 = arith.mulf %240, %201 : vector<8x128xf32>
    %243 = arith.mulf %239, %238 : vector<8x128xf32>
    %244 = arith.addf %242, %243 : vector<8x128xf32>
    %245 = math.tanh %244 : vector<8x128xf32>
    %246 = arith.mulf %241, %245 : vector<8x128xf32>
    %247 = vector.extract_strided_slice %6 {offsets = [6, 0, 0], sizes = [1, 8, 512], strides = [1, 1, 1]} : vector<8x8x512xf32> to vector<1x8x512xf32>
    %248 = vector.shape_cast %247 : vector<1x8x512xf32> to vector<8x512xf32>
    %249 = arith.truncf %246 : vector<8x128xf32> to vector<8x128xbf16>
    %cst_34 = arith.constant dense<0.000000e+00> : vector<8x512xf32>
    %250 = tpu.matmul %249, %7, %cst_34 {dimension_numbers = #tpu.dot_dimension_numbers<[1], [0], [0], [1], [0, 0, 1, 1], [], []>} : vector<8x128xbf16>, vector<128x512xbf16>, vector<8x512xf32> -> vector<8x512xf32>
    %251 = arith.addf %248, %250 : vector<8x512xf32>
    %252 = arith.truncf %246 : vector<8x128xf32> to vector<8x128xbf16>
    %253 = arith.truncf %230 : vector<8x128xf32> to vector<8x128xbf16>
    %254 = tpu.concatenate %252, %253 in 1 : vector<8x128xbf16>, vector<8x128xbf16> -> vector<8x256xbf16>
    %cst_35 = arith.constant dense<0.000000e+00> : vector<8x512xf32>
    %255 = tpu.matmul %254, %8, %cst_35 {dimension_numbers = #tpu.dot_dimension_numbers<[1], [0], [0], [1], [0, 0, 1, 1], [], []>} : vector<8x256xbf16>, vector<256x512xbf16>, vector<8x512xf32> -> vector<8x512xf32>
    %256 = vector.broadcast %9 : vector<1x512xf32> to vector<8x512xf32>
    %257 = arith.addf %255, %256 : vector<8x512xf32>
    %258 = vector.extract_strided_slice %257 {offsets = [0, 0], sizes = [8, 384], strides = [1, 1]} : vector<8x512xf32> to vector<8x384xf32>
    %259 = arith.negf %258 : vector<8x384xf32>
    %260 = math.exp %259 : vector<8x384xf32>
    %cst_36 = arith.constant 1.000000e+00 : f32
    %261 = vector.broadcast %cst_36 : f32 to vector<8x384xf32>
    %262 = arith.addf %261, %260 : vector<8x384xf32>
    %263 = arith.divf %261, %262 : vector<8x384xf32>
    %264 = vector.extract_strided_slice %257 {offsets = [0, 384], sizes = [8, 128], strides = [1, 1]} : vector<8x512xf32> to vector<8x128xf32>
    %265 = math.tanh %264 : vector<8x128xf32>
    %266 = vector.extract_strided_slice %263 {offsets = [0, 0], sizes = [8, 128], strides = [1, 1]} : vector<8x384xf32> to vector<8x128xf32>
    %267 = vector.extract_strided_slice %263 {offsets = [0, 128], sizes = [8, 128], strides = [1, 1]} : vector<8x384xf32> to vector<8x128xf32>
    %268 = vector.extract_strided_slice %263 {offsets = [0, 256], sizes = [8, 128], strides = [1, 1]} : vector<8x384xf32> to vector<8x128xf32>
    %269 = arith.mulf %267, %228 : vector<8x128xf32>
    %270 = arith.mulf %266, %265 : vector<8x128xf32>
    %271 = arith.addf %269, %270 : vector<8x128xf32>
    %272 = math.tanh %271 : vector<8x128xf32>
    %273 = arith.mulf %268, %272 : vector<8x128xf32>
    %274 = vector.extract_strided_slice %251 {offsets = [0, 0], sizes = [8, 384], strides = [1, 1]} : vector<8x512xf32> to vector<8x384xf32>
    %275 = arith.negf %274 : vector<8x384xf32>
    %276 = math.exp %275 : vector<8x384xf32>
    %cst_37 = arith.constant 1.000000e+00 : f32
    %277 = vector.broadcast %cst_37 : f32 to vector<8x384xf32>
    %278 = arith.addf %277, %276 : vector<8x384xf32>
    %279 = arith.divf %277, %278 : vector<8x384xf32>
    %280 = vector.extract_strided_slice %251 {offsets = [0, 384], sizes = [8, 128], strides = [1, 1]} : vector<8x512xf32> to vector<8x128xf32>
    %281 = math.tanh %280 : vector<8x128xf32>
    %282 = vector.extract_strided_slice %279 {offsets = [0, 0], sizes = [8, 128], strides = [1, 1]} : vector<8x384xf32> to vector<8x128xf32>
    %283 = vector.extract_strided_slice %279 {offsets = [0, 128], sizes = [8, 128], strides = [1, 1]} : vector<8x384xf32> to vector<8x128xf32>
    %284 = vector.extract_strided_slice %279 {offsets = [0, 256], sizes = [8, 128], strides = [1, 1]} : vector<8x384xf32> to vector<8x128xf32>
    %285 = arith.mulf %283, %244 : vector<8x128xf32>
    %286 = arith.mulf %282, %281 : vector<8x128xf32>
    %287 = arith.addf %285, %286 : vector<8x128xf32>
    %288 = math.tanh %287 : vector<8x128xf32>
    %289 = arith.mulf %284, %288 : vector<8x128xf32>
    %290 = vector.extract_strided_slice %6 {offsets = [7, 0, 0], sizes = [1, 8, 512], strides = [1, 1, 1]} : vector<8x8x512xf32> to vector<1x8x512xf32>
    %291 = vector.shape_cast %290 : vector<1x8x512xf32> to vector<8x512xf32>
    %292 = arith.truncf %289 : vector<8x128xf32> to vector<8x128xbf16>
    %cst_38 = arith.constant dense<0.000000e+00> : vector<8x512xf32>
    %293 = tpu.matmul %292, %7, %cst_38 {dimension_numbers = #tpu.dot_dimension_numbers<[1], [0], [0], [1], [0, 0, 1, 1], [], []>} : vector<8x128xbf16>, vector<128x512xbf16>, vector<8x512xf32> -> vector<8x512xf32>
    %294 = arith.addf %291, %293 : vector<8x512xf32>
    %295 = arith.truncf %289 : vector<8x128xf32> to vector<8x128xbf16>
    %296 = arith.truncf %273 : vector<8x128xf32> to vector<8x128xbf16>
    %297 = tpu.concatenate %295, %296 in 1 : vector<8x128xbf16>, vector<8x128xbf16> -> vector<8x256xbf16>
    %cst_39 = arith.constant dense<0.000000e+00> : vector<8x512xf32>
    %298 = tpu.matmul %297, %8, %cst_39 {dimension_numbers = #tpu.dot_dimension_numbers<[1], [0], [0], [1], [0, 0, 1, 1], [], []>} : vector<8x256xbf16>, vector<256x512xbf16>, vector<8x512xf32> -> vector<8x512xf32>
    %299 = vector.broadcast %9 : vector<1x512xf32> to vector<8x512xf32>
    %300 = arith.addf %298, %299 : vector<8x512xf32>
    %301 = vector.extract_strided_slice %300 {offsets = [0, 0], sizes = [8, 384], strides = [1, 1]} : vector<8x512xf32> to vector<8x384xf32>
    %302 = arith.negf %301 : vector<8x384xf32>
    %303 = math.exp %302 : vector<8x384xf32>
    %cst_40 = arith.constant 1.000000e+00 : f32
    %304 = vector.broadcast %cst_40 : f32 to vector<8x384xf32>
    %305 = arith.addf %304, %303 : vector<8x384xf32>
    %306 = arith.divf %304, %305 : vector<8x384xf32>
    %307 = vector.extract_strided_slice %300 {offsets = [0, 384], sizes = [8, 128], strides = [1, 1]} : vector<8x512xf32> to vector<8x128xf32>
    %308 = math.tanh %307 : vector<8x128xf32>
    %309 = vector.extract_strided_slice %306 {offsets = [0, 0], sizes = [8, 128], strides = [1, 1]} : vector<8x384xf32> to vector<8x128xf32>
    %310 = vector.extract_strided_slice %306 {offsets = [0, 128], sizes = [8, 128], strides = [1, 1]} : vector<8x384xf32> to vector<8x128xf32>
    %311 = vector.extract_strided_slice %306 {offsets = [0, 256], sizes = [8, 128], strides = [1, 1]} : vector<8x384xf32> to vector<8x128xf32>
    %312 = arith.mulf %310, %271 : vector<8x128xf32>
    %313 = arith.mulf %309, %308 : vector<8x128xf32>
    %314 = arith.addf %312, %313 : vector<8x128xf32>
    %315 = math.tanh %314 : vector<8x128xf32>
    %316 = arith.mulf %311, %315 : vector<8x128xf32>
    %317 = vector.extract_strided_slice %294 {offsets = [0, 0], sizes = [8, 384], strides = [1, 1]} : vector<8x512xf32> to vector<8x384xf32>
    %318 = arith.negf %317 : vector<8x384xf32>
    %319 = math.exp %318 : vector<8x384xf32>
    %cst_41 = arith.constant 1.000000e+00 : f32
    %320 = vector.broadcast %cst_41 : f32 to vector<8x384xf32>
    %321 = arith.addf %320, %319 : vector<8x384xf32>
    %322 = arith.divf %320, %321 : vector<8x384xf32>
    %323 = vector.extract_strided_slice %294 {offsets = [0, 384], sizes = [8, 128], strides = [1, 1]} : vector<8x512xf32> to vector<8x128xf32>
    %324 = math.tanh %323 : vector<8x128xf32>
    %325 = vector.extract_strided_slice %322 {offsets = [0, 0], sizes = [8, 128], strides = [1, 1]} : vector<8x384xf32> to vector<8x128xf32>
    %326 = vector.extract_strided_slice %322 {offsets = [0, 128], sizes = [8, 128], strides = [1, 1]} : vector<8x384xf32> to vector<8x128xf32>
    %327 = vector.extract_strided_slice %322 {offsets = [0, 256], sizes = [8, 128], strides = [1, 1]} : vector<8x384xf32> to vector<8x128xf32>
    %328 = arith.mulf %326, %287 : vector<8x128xf32>
    %329 = arith.mulf %325, %324 : vector<8x128xf32>
    %330 = arith.addf %328, %329 : vector<8x128xf32>
    %331 = math.tanh %330 : vector<8x128xf32>
    %332 = arith.mulf %327, %331 : vector<8x128xf32>
    %333 = arith.truncf %332 : vector<8x128xf32> to vector<8x128xbf16>
    %334 = arith.truncf %316 : vector<8x128xf32> to vector<8x128xbf16>
    %335 = tpu.concatenate %333, %334 in 1 : vector<8x128xbf16>, vector<8x128xbf16> -> vector<8x256xbf16>
    %cst_42 = arith.constant dense<0.000000e+00> : vector<8x512xf32>
    %336 = tpu.matmul %335, %8, %cst_42 {dimension_numbers = #tpu.dot_dimension_numbers<[1], [0], [0], [1], [0, 0, 1, 1], [], []>} : vector<8x256xbf16>, vector<256x512xbf16>, vector<8x512xf32> -> vector<8x512xf32>
    %337 = vector.broadcast %9 : vector<1x512xf32> to vector<8x512xf32>
    %338 = arith.addf %336, %337 : vector<8x512xf32>
    %339 = vector.extract_strided_slice %338 {offsets = [0, 0], sizes = [8, 384], strides = [1, 1]} : vector<8x512xf32> to vector<8x384xf32>
    %340 = arith.negf %339 : vector<8x384xf32>
    %341 = math.exp %340 : vector<8x384xf32>
    %cst_43 = arith.constant 1.000000e+00 : f32
    %342 = vector.broadcast %cst_43 : f32 to vector<8x384xf32>
    %343 = arith.addf %342, %341 : vector<8x384xf32>
    %344 = arith.divf %342, %343 : vector<8x384xf32>
    %345 = vector.extract_strided_slice %338 {offsets = [0, 384], sizes = [8, 128], strides = [1, 1]} : vector<8x512xf32> to vector<8x128xf32>
    %346 = math.tanh %345 : vector<8x128xf32>
    %347 = vector.extract_strided_slice %344 {offsets = [0, 0], sizes = [8, 128], strides = [1, 1]} : vector<8x384xf32> to vector<8x128xf32>
    %348 = vector.extract_strided_slice %344 {offsets = [0, 128], sizes = [8, 128], strides = [1, 1]} : vector<8x384xf32> to vector<8x128xf32>
    %349 = vector.extract_strided_slice %344 {offsets = [0, 256], sizes = [8, 128], strides = [1, 1]} : vector<8x384xf32> to vector<8x128xf32>
    %350 = arith.mulf %348, %314 : vector<8x128xf32>
    %351 = arith.mulf %347, %346 : vector<8x128xf32>
    %352 = arith.addf %350, %351 : vector<8x128xf32>
    %353 = math.tanh %352 : vector<8x128xf32>
    %354 = arith.mulf %349, %353 : vector<8x128xf32>
    %355 = arith.truncf %354 : vector<8x128xf32> to vector<8x128xbf16>
    %c0_44 = arith.constant 0 : index
    %c0_45 = arith.constant 0 : index
    %356 = vector.load %arg6[%c0_44, %c0_45] : memref<128x8xbf16, #tpu.memory_space<vmem>>, vector<128x8xbf16>
    %cst_46 = arith.constant dense<0.000000e+00> : vector<8x8xf32>
    %357 = tpu.matmul %355, %356, %cst_46 {dimension_numbers = #tpu.dot_dimension_numbers<[1], [0], [0], [1], [0, 0, 1, 1], [], []>} : vector<8x128xbf16>, vector<128x8xbf16>, vector<8x8xf32> -> vector<8x8xf32>
    %c0_47 = arith.constant 0 : index
    %c0_48 = arith.constant 0 : index
    %358 = vector.load %arg7[%c0_47, %c0_48] : memref<1x8xf32, #tpu.memory_space<vmem>>, vector<1x8xf32>
    %359 = vector.broadcast %358 : vector<1x8xf32> to vector<8x8xf32>
    %360 = arith.addf %357, %359 : vector<8x8xf32>
    %c0_49 = arith.constant 0 : index
    %c0_50 = arith.constant 0 : index
    %361 = vector.load %arg8[%c0_49, %c0_50] : memref<8x8xf32, #tpu.memory_space<vmem>>, vector<8x8xf32>
    tpu.vector_store %arg8[%c0_49, %c0_50], %360 {strides = array<i32>} : memref<8x8xf32, #tpu.memory_space<vmem>>, vector<8x8xf32>,
    return
  }
}

</mosaic_0001>

<bundles_post_ra>
// kernel: tpu_custom_call.1
= control target key start
LH: loop header
LB: loop body
LE: loop exit
PB: predicated region body
PF: predicated region fallthrough
CT: control target
= control target key end

     0   :  { %13 = vsyncpa [#allocation3], 0  ;;  %s5447_s0 = inlined_call_operand.vmem [shape: bf16[64,16], index: 0, kind: input, shape index: {}]   ;;  %s5448_s1 = inlined_call_operand.vmem [shape: bf16[16,512], index: 1, kind: input, shape index: {}]   ;;  %s5449_s2 = inlined_call_operand.hbm [shape: bf16[128,512], index: 2, kind: input, shape index: {}]   ;;  %s5450_s3 = inlined_call_operand.vmem [shape: f32[1,512], index: 3, kind: input, shape index: {}]   ;;  %s5451_s4 = inlined_call_operand.hbm [shape: bf16[256,512], index: 4, kind: input, shape index: {}]   ;;  %s5452_s5 = inlined_call_operand.vmem [shape: f32[1,512], index: 5, kind: input, shape index: {}]   ;;  %s5453_s6 = inlined_call_operand.vmem [shape: bf16[128,8], index: 6, kind: input, shape index: {}]   ;;  %s5454_s7 = inlined_call_operand.vmem [shape: f32[1,8], index: 7, kind: input, shape index: {}]   ;;  %s5455_s8 = inlined_call_operand.hbm [shape: f32[8,8], index: 8, kind: output, shape index: {}]  }
   0x1   :  { %14 = vsyncpa [#allocation6], 0 }
   0x2   :  { %15 = vsyncpa [#allocation4], 0  ;;  %s3651_s27 = smov [#allocation2]   ;;  %s3579_s9 = scalar_lea.hbm %s5449_s2, 4096 }
   0x3   :  { %s25_s28 = sshll.u32 %s3651_s27, 4  ;;  %p3580_p0 = scmp.ne.s32.totalorder %s5449_s2, %s3579_s9  ;;  %s26_s28 = int_to_ptr.vmem [resolvable:$true] %s25_s28 }
   0x4   :  { %p3583_p1 = scmp.lt.u32.totalorder %s3579_s9, %s5449_s2 }
   0x6   :  { %p3585_p2 = pnand %p3583_p1, %p3580_p0 }
   0x8   :  { %3588 = shalt.err (!%p3585_p2)
}
   0x9   :  { %s3589_s14 = scalar_lea.vmem %s26_s28, 4096  ;;  %p3594_p4 = scmp.lt.s32.totalorder %s26_s28, %s26_s28 }
   0xa   :  { %p3590_p3 = scmp.ne.s32.totalorder %s26_s28, %s3589_s14  ;;  %p3595_p5 = scmp.lt.s32.totalorder %s3589_s14, %s3589_s14 }
   0xc   :  { %p3596_p6 = por %p3595_p5, %p3594_p4 }
   0xe   :  { %p3597_p7 = pnand %p3596_p6, %p3590_p3 }
  0x10   :  { %3600 = shalt.err (!%p3597_p7)
}
  0x11   :  { %s3652_s15 = smov 256   ;;  %s3653_s16 = smov 16  }
  0x12   :  { %31 = dma.hbm_to_vmem [thread:$0]  %s5449_s2, 4096, %s26_s28, [#allocation3], %s3652_s15, %s3652_s15, %s3653_s16  }
  0x13   :  { %s3654_s19 = smov [#allocation5]   ;;  %s3601_s23 = scalar_lea.hbm %s5451_s4, 8192 }
  0x14   :  { %s39_s20 = sshll.u32 %s3654_s19, 4  ;;  %p3602_p8 = scmp.ne.s32.totalorder %s5451_s4, %s3601_s23  ;;  %s40_s20 = int_to_ptr.vmem [resolvable:$true] %s39_s20 }
  0x15   :  { %p3605_p9 = scmp.lt.u32.totalorder %s3601_s23, %s5451_s4 }
  0x17   :  { %p3607_p10 = pnand %p3605_p9, %p3602_p8 }
  0x19   :  { %3610 = shalt.err (!%p3607_p10)
}
  0x1a   :  { %s3611_s29 = scalar_lea.vmem %s40_s20, 8192  ;;  %p3616_p12 = scmp.lt.s32.totalorder %s40_s20, %s40_s20 }
  0x1b   :  { %p3612_p11 = scmp.ne.s32.totalorder %s40_s20, %s3611_s29  ;;  %p3617_p13 = scmp.lt.s32.totalorder %s3611_s29, %s3611_s29 }
  0x1d   :  { %p3618_p0 = por %p3617_p13, %p3616_p12 }
  0x1f   :  { %p3619_p1 = pnand %p3618_p0, %p3612_p11 }
  0x21   :  { %3622 = shalt.err (!%p3619_p1)
}
  0x22   :  { %45 = dma.hbm_to_vmem [thread:$0]  %s5451_s4, 8192, %s40_s20, [#allocation6], %s3652_s15, %s3652_s15, %s3653_s16  }
  0x23   :  { %3645 = dma.done.wait [#allocation3], 4096  }
  0x24   :  { %3646 = vsyncadd [#allocation3], 4294963200 }
  0x25   :  { %3647 = dma.done.wait [#allocation6], 8192  }
  0x26   :  { %3648 = vsyncadd [#allocation6], 4294959104  ;;  %v5460_v0 = vmov 0   ;;  %v2969_v1 = vld [vmem:[%s5448_s1 + $0x4] ss:$16 sps:$4 sm:$0xff]   ;;  %vm133_vm0 = vcmask 130048   ;;  %v73_v43 = vlaneseq }
  0x27   :  { %178 = vmatprep.mubr.bf16.mxu0 %v5460_v0  ;;  %251 = vmatprep.mubr.bf16.mxu1 %v5460_v0  ;;  %v2971_v2 = vld [vmem:[%s5448_s1 + $0xc] ss:$16 sps:$4 sm:$0xff]   ;;  %v2973_v3 = vld [vmem:[%s5448_s1] ss:$16 sps:$4 sm:$0xff]   ;;  %v2974_v4 = vld [vmem:[%s5448_s1 + $0x8] ss:$16 sps:$4 sm:$0xff]  }
  0x28   :  { %146 = vmatprep.subr.bf16.mxu0 %v2969_v1  ;;  %219 = vmatprep.subr.bf16.mxu1 %v2971_v2  ;;  %v2975_v5 = vld [vmem:[%s5447_s0] sm:$0xff]   ;;  %v3747_v7 = vld [vmem:[#allocation2 + $0xc] ss:$16 sps:$4 sm:$0xff]   ;;  %v3752_v9 = vld [vmem:[#allocation2 + $0x8] ss:$16 sps:$4 sm:$0xff]   ;;  %v3908_v44 = vshrl.u32 %v73_v43, 7 }
  0x29   :  { %147 = vmatpush1.bf16.msra.mxu0 %v2973_v3  ;;  %220 = vmatpush1.bf16.msra.mxu1 %v2974_v4  ;;  %v3745_v6 = vld [vmem:[#allocation2 + $0x4] ss:$16 sps:$4 sm:$0xff]   ;;  %v3749_v8 = vld [vmem:[#allocation2] ss:$16 sps:$4 sm:$0xff]   ;;  %v3760_v11 = vld [vmem:[#allocation2 + $0x2c] ss:$16 sps:$4 sm:$0xff]  }
  0x2a   :  { %549 = vmatprep.subr.bf16.mxu0 %v3745_v6  ;;  %v3756_v10 = vld [vmem:[#allocation2 + $0x24] ss:$16 sps:$4 sm:$0xff]   ;;  %590 = vmatprep.subr.bf16.mxu1 %v3747_v7  ;;  %v3762_v12 = vld [vmem:[#allocation2 + $0x20] ss:$16 sps:$4 sm:$0xff]   ;;  %v3764_v13 = vld [vmem:[#allocation2 + $0x28] ss:$16 sps:$4 sm:$0xff]  }
  0x2b   :  { %v2988_v14 = vld [vmem:[%s5447_s0 + $0x8] sm:$0xff]   ;;  %v3773_v15 = vld [vmem:[#allocation2 + $0x44] ss:$16 sps:$4 sm:$0xff]   ;;  %v3779_v17 = vld [vmem:[#allocation2 + $0x40] ss:$16 sps:$4 sm:$0xff]   ;;  %v5457_v45 = vsub.s32 2, %v3908_v44 }
  0x2c   :  { %2771 = vmatmul.mubr.msk.bf16.vlgmr.msra.gmra.mrb[0].mxu0 %vm133_vm0, %v2975_v5  ;;  %2775 = vmatmul.mubr.msk.bf16.vlgmr.msra.gmra.mrb[0].mxu1 %vm133_vm0, %v2975_v5  ;;  %v3776_v16 = vld [vmem:[#allocation2 + $0x4c] ss:$16 sps:$4 sm:$0xff]   ;;  %v3781_v18 = vld [vmem:[#allocation2 + $0x48] ss:$16 sps:$4 sm:$0xff]   ;;  %v3785_v19 = vld [vmem:[#allocation2 + $0x64] ss:$16 sps:$4 sm:$0xff]  }
  0x2d   :  { %550 = vmatpush1.bf16.msra.mxu0 %v3749_v8  ;;  %591 = vmatpush1.bf16.msra.mxu1 %v3752_v9  ;;  %v3788_v20 = vld [vmem:[#allocation2 + $0x6c] ss:$16 sps:$4 sm:$0xff]   ;;  %v3792_v21 = vld [vmem:[#allocation2 + $0x60] ss:$16 sps:$4 sm:$0xff]   ;;  %v3795_v22 = vld [vmem:[#allocation2 + $0x68] ss:$16 sps:$4 sm:$0xff]  }
  0x2e   :  { %551 = vmatprep.subr.bf16.mxu0 %v3756_v10  ;;  %592 = vmatprep.subr.bf16.mxu1 %v3760_v11  ;;  %v3800_v23 = vld [vmem:[#allocation2 + $0x84] ss:$16 sps:$4 sm:$0xff]   ;;  %v3804_v24 = vld [vmem:[#allocation2 + $0x8c] ss:$16 sps:$4 sm:$0xff]   ;;  %v3810_v26 = vld [vmem:[#allocation2 + $0x80] ss:$16 sps:$4 sm:$0xff]  }
  0x2f   :  { %188 = vmatprep.mubr.bf16.mxu0 %v5460_v0  ;;  %261 = vmatprep.mubr.bf16.mxu1 %v5460_v0  ;;  %v3001_v25 = vld [vmem:[%s5447_s0 + $0x10] sm:$0xff]   ;;  %v3814_v27 = vld [vmem:[#allocation2 + $0x88] ss:$16 sps:$4 sm:$0xff]   ;;  %v3819_v29 = vld [vmem:[#allocation2 + $0xac] ss:$16 sps:$4 sm:$0xff]   ;;  %v5456_v46 = vsub.s32 3, %v3908_v44 }
  0x30   :  { %v3816_v28 = vld [vmem:[#allocation2 + $0xa4] ss:$16 sps:$4 sm:$0xff]   ;;  %v3824_v30 = vld [vmem:[#allocation2 + $0xa0] ss:$16 sps:$4 sm:$0xff]   ;;  %v3826_v31 = vld [vmem:[#allocation2 + $0xa8] ss:$16 sps:$4 sm:$0xff]  }
  0x31   :  { %552 = vmatpush1.bf16.msra.mxu0 %v3762_v12  ;;  %593 = vmatpush1.bf16.msra.mxu1 %v3764_v13  ;;  %v3014_v32 = vld [vmem:[%s5447_s0 + $0x18] sm:$0xff]   ;;  %v3834_v33 = vld [vmem:[#allocation2 + $0xc4] ss:$16 sps:$4 sm:$0xff]   ;;  %v3840_v35 = vld [vmem:[#allocation2 + $0xc0] ss:$16 sps:$4 sm:$0xff]   ;;  %v5459_v47 = vsub.s32 0, %v3908_v44 }
  0x32   :  { %553 = vmatprep.subr.bf16.mxu0 %v3773_v15  ;;  %594 = vmatprep.subr.bf16.mxu1 %v3776_v16  ;;  %v3838_v34 = vld [vmem:[#allocation2 + $0xcc] ss:$16 sps:$4 sm:$0xff]   ;;  %v3842_v36 = vld [vmem:[#allocation2 + $0xc8] ss:$16 sps:$4 sm:$0xff]   ;;  %v3844_v37 = vld [vmem:[#allocation2 + $0xe4] ss:$16 sps:$4 sm:$0xff]  }
  0x33   :  { %v3847_v38 = vld [vmem:[#allocation2 + $0xec] ss:$16 sps:$4 sm:$0xff]   ;;  %v3852_v39 = vld [vmem:[#allocation2 + $0xe0] ss:$16 sps:$4 sm:$0xff]   ;;  %v3856_v40 = vld [vmem:[#allocation2 + $0xe8] ss:$16 sps:$4 sm:$0xff]  }
  0x34   :  { %2772 = vmatmul.mubr.msk.bf16.gmra.mrb[4].mxu0 %vm133_vm0, %v2988_v14  ;;  %2776 = vmatmul.mubr.msk.bf16.gmra.mrb[4].mxu1 %vm133_vm0, %v2988_v14  ;;  %v3902_v41 = vld [vmem:[#allocation5 + $0x4] ss:$16 sps:$4 sm:$0xff]   ;;  %v3904_v42 = vld [vmem:[#allocation5 + $0xc] ss:$16 sps:$4 sm:$0xff]   ;;  %v71_v48 = vld [vmem:[%s5450_s3] sm:$0xf] }
  0x35   :  { %554 = vmatpush1.bf16.msra.mxu0 %v3779_v17  ;;  %198 = vmatprep.mubr.bf16.mxu0 %v5460_v0  ;;  %v5458_v49 = vsub.s32 1, %v3908_v44  ;;  %v3919_v50 = vrot.slane %v71_v48, %v5457_v45  ;;  %v3927_v53 = vrot.slane %v71_v48, %v5456_v46  ;;  %v76_v54 = vrot.slane %v71_v48, %v5459_v47  ;;  %s3658_s16 = smov [#allocation7]  }
  0x36   :  { %595 = vmatpush1.bf16.msra.mxu1 %v3781_v18  ;;  %555 = vmatprep.subr.bf16.mxu0 %v3785_v19  ;;  %vm3657_vm1 = vmmov 0   ;;  %s2753_s1 = sshll.u32 %s3658_s16, 4  ;;  %vm2745_vm2 = vcmask 64512   ;;  %s2754_s1 = int_to_ptr.vmem [resolvable:$true] %s2753_s1 }
  0x37   :  { %596 = vmatprep.subr.bf16.mxu1 %v3788_v20  ;;  %271 = vmatprep.mubr.bf16.mxu1 %v5460_v0  ;;  %v80_v57 = vrot.slane %v71_v48, %v5458_v49  ;;  %s3623_s17 = scalar_lea.vmem %s2754_s1, 128  ;;  %p3628_p3 = scmp.lt.s32.totalorder %s2754_s1, %s2754_s1 }
  0x38   :  { %p3624_p2 = scmp.ne.s32.totalorder %s2754_s1, %s3623_s17  ;;  %p3629_p4 = scmp.lt.s32.totalorder %s3623_s17, %s3623_s17 }
  0x39   :  { %556 = vmatpush1.bf16.msra.mxu0 %v3792_v21 }
  0x3a   :  { %597 = vmatpush1.bf16.msra.mxu1 %v3795_v22  ;;  %557 = vmatprep.subr.bf16.mxu0 %v3800_v23  ;;  %p3630_p5 = por %p3629_p4, %p3628_p3 }
  0x3b   :  { %598 = vmatprep.subr.bf16.mxu1 %v3804_v24 }
  0x3c   :  { %2773 = vmatmul.mubr.msk.bf16.gmra.mrb[8].mxu0 %vm133_vm0, %v3001_v25  ;;  %2777 = vmatmul.mubr.msk.bf16.gmra.mrb[8].mxu1 %vm133_vm0, %v3001_v25  ;;  %p3631_p6 = pnand %p3630_p5, %p3624_p2 }
  0x3d   :  { %558 = vmatpush1.bf16.msra.mxu0 %v3810_v26  ;;  %208 = vmatprep.mubr.bf16.mxu0 %v5460_v0 }
  0x3e   :  { %599 = vmatpush1.bf16.msra.mxu1 %v3814_v27  ;;  %559 = vmatprep.subr.bf16.mxu0 %v3816_v28 }
  0x3f   :  { %600 = vmatprep.subr.bf16.mxu1 %v3819_v29  ;;  %281 = vmatprep.mubr.bf16.mxu1 %v5460_v0 }
  0x41   :  { %560 = vmatpush1.bf16.msra.mxu0 %v3824_v30 }
  0x42   :  { %601 = vmatpush1.bf16.msra.mxu1 %v3826_v31  ;;  %561 = vmatprep.subr.bf16.mxu0 %v3834_v33 }
  0x43   :  { %602 = vmatprep.subr.bf16.mxu1 %v3838_v34 }
  0x44   :  { %2774 = vmatmul.mubr.msk.bf16.gmra.mrb[12].mxu0 %vm133_vm0, %v3014_v32  ;;  %2778 = vmatmul.mubr.msk.bf16.gmra.mrb[12].mxu1 %vm133_vm0, %v3014_v32 }
  0x45   :  { %562 = vmatpush1.bf16.msra.mxu0 %v3840_v35  ;;  %581 = vmatprep.mubr.bf16.mxu0 %v5460_v0 }
  0x46   :  { %603 = vmatpush1.bf16.msra.mxu1 %v3842_v36  ;;  %563 = vmatprep.subr.bf16.mxu0 %v3844_v37 }
  0x47   :  { %604 = vmatprep.subr.bf16.mxu1 %v3847_v38  ;;  %622 = vmatprep.mubr.bf16.mxu1 %v5460_v0 }
  0x49   :  { %564 = vmatpush1.bf16.msra.mxu0 %v3852_v39 }
  0x4a   :  { %605 = vmatpush1.bf16.msra.mxu1 %v3856_v40  ;;  %660 = vmatprep.subr.bf16.mxu0 %v3745_v6 }
  0x4b   :  { %701 = vmatprep.subr.bf16.mxu1 %v3747_v7 }
  0x4c   :  { %582 = vmatmul.mubr.bf16.vlgmr.msra.gmra.mrb[16].mxu0 %v5460_v0 }
  0x4d   :  { %623 = vmatmul.mubr.bf16.vlgmr.msra.gmra.mrb[16].mxu1 %v5460_v0  ;;  %661 = vmatpush1.bf16.msra.mxu0 %v3749_v8 }
  0x4e   :  { %702 = vmatpush1.bf16.msra.mxu1 %v3752_v9  ;;  %662 = vmatprep.subr.bf16.mxu0 %v3756_v10 }
  0x4f   :  { %703 = vmatprep.subr.bf16.mxu1 %v3760_v11  ;;  %692 = vmatprep.mubr.bf16.mxu0 %v5460_v0 }
  0x50   :  { %733 = vmatprep.mubr.bf16.mxu1 %v5460_v0 }
  0x51   :  { %663 = vmatpush1.bf16.msra.mxu0 %v3762_v12 }
  0x52   :  { %704 = vmatpush1.bf16.msra.mxu1 %v3764_v13  ;;  %664 = vmatprep.subr.bf16.mxu0 %v3773_v15 }
  0x53   :  { %705 = vmatprep.subr.bf16.mxu1 %v3776_v16 }
  0x55   :  { %665 = vmatpush1.bf16.msra.mxu0 %v3779_v17 }
  0x56   :  { %706 = vmatpush1.bf16.msra.mxu1 %v3781_v18  ;;  %666 = vmatprep.subr.bf16.mxu0 %v3785_v19 }
  0x57   :  { %707 = vmatprep.subr.bf16.mxu1 %v3788_v20 }
  0x59   :  { %667 = vmatpush1.bf16.msra.mxu0 %v3792_v21 }
  0x5a   :  { %708 = vmatpush1.bf16.msra.mxu1 %v3795_v22  ;;  %668 = vmatprep.subr.bf16.mxu0 %v3800_v23 }
  0x5b   :  { %709 = vmatprep.subr.bf16.mxu1 %v3804_v24 }
  0x5d   :  { %669 = vmatpush1.bf16.msra.mxu0 %v3810_v26 }
  0x5e   :  { %710 = vmatpush1.bf16.msra.mxu1 %v3814_v27  ;;  %670 = vmatprep.subr.bf16.mxu0 %v3816_v28 }
  0x5f   :  { %711 = vmatprep.subr.bf16.mxu1 %v3819_v29 }
  0x61   :  { %671 = vmatpush1.bf16.msra.mxu0 %v3824_v30 }
  0x62   :  { %712 = vmatpush1.bf16.msra.mxu1 %v3826_v31  ;;  %672 = vmatprep.subr.bf16.mxu0 %v3834_v33 }
  0x63   :  { %713 = vmatprep.subr.bf16.mxu1 %v3838_v34 }
  0x65   :  { %673 = vmatpush1.bf16.msra.mxu0 %v3840_v35 }
  0x66   :  { %714 = vmatpush1.bf16.msra.mxu1 %v3842_v36  ;;  %674 = vmatprep.subr.bf16.mxu0 %v3844_v37 }
  0x67   :  { %715 = vmatprep.subr.bf16.mxu1 %v3847_v38 }
  0x69   :  { %675 = vmatpush1.bf16.msra.mxu0 %v3852_v39 }
  0x6a   :  { %716 = vmatpush1.bf16.msra.mxu1 %v3856_v40  ;;  %1087 = vmatprep.subr.bf16.mxu0 %v3902_v41 }
  0x6b   :  { %1128 = vmatprep.subr.bf16.mxu1 %v3904_v42 }
  0xff   :  { %v3921_v51 = vpop.f32.mrb[0].mxu0  ;;  %v3923_v52 = vpop.f32.mrb[0].mxu1 }
 0x100   :  { %v182_v55 = vpop.f32.mrb[1].mxu0  ;;  %v255_v56 = vpop.f32.mrb[1].mxu1 }
 0x101   :  { %v184_v58 = vpop.f32.mrb[2].mxu0  ;;  %v257_v59 = vpop.f32.mrb[2].mxu1 }
 0x102   :  { %v3933_v60 = vadd.f32 %v184_v58, %v76_v54  ;;  %v186_v61 = vpop.f32.mrb[3].mxu0  ;;  %v3936_v62 = vadd.f32 %v257_v59, %v3919_v50  ;;  %v259_v63 = vpop.f32.mrb[3].mxu1 }
 0x103   :  { %v3938_v1 = vadd.f32 %v186_v61, %v80_v57  ;;  %v3941_v2 = vadd.f32 %v259_v63, %v3927_v53 }
 0x107   :  { %v190_v3 = vpop.f32.mrb[4].mxu0  ;;  %v263_v4 = vpop.f32.mrb[4].mxu1 }
 0x108   :  { %v3943_v5 = vadd.f32 %v190_v3, %v76_v54  ;;  %v192_v14 = vpop.f32.mrb[5].mxu0  ;;  %v3946_v25 = vadd.f32 %v263_v4, %v3919_v50  ;;  %v265_v32 = vpop.f32.mrb[5].mxu1 }
 0x109   :  { %v3948_v43 = vadd.f32 %v192_v14, %v80_v57  ;;  %v194_v48 = vpop.f32.mrb[6].mxu0  ;;  %v3951_v58 = vadd.f32 %v265_v32, %v3927_v53  ;;  %v267_v59 = vpop.f32.mrb[6].mxu1 }
 0x10a   :  { %5755 = vst [vmem:[#allocation11_spill] sm:$0xff] %v3943_v5  ;;  %5756 = vst [vmem:[#allocation12_spill] sm:$0xff] %v3946_v25  ;;  %v3953_v61 = vadd.f32 %v194_v48, %v76_v54  ;;  %v196_v63 = vpop.f32.mrb[7].mxu0  ;;  %v3956_v46 = vadd.f32 %v267_v59, %v3919_v50  ;;  %v269_v3 = vpop.f32.mrb[7].mxu1 }
 0x10b   :  { %5757 = vst [vmem:[#allocation13_spill] sm:$0xff] %v3948_v43  ;;  %5758 = vst [vmem:[#allocation14_spill] sm:$0xff] %v3951_v58  ;;  %v3958_v45 = vadd.f32 %v196_v63, %v80_v57  ;;  %v3961_v4 = vadd.f32 %v269_v3, %v3927_v53 }
 0x10c   :  { %5759 = vst [vmem:[#allocation15_spill] sm:$0xff] %v3953_v61  ;;  %5760 = vst [vmem:[#allocation16_spill] sm:$0xff] %v3956_v46 }
 0x10d   :  { %5761 = vst [vmem:[#allocation17_spill] sm:$0xff] %v3958_v45  ;;  %5762 = vst [vmem:[#allocation18_spill] sm:$0xff] %v3961_v4 }
 0x10f   :  { %v200_v49 = vpop.f32.mrb[8].mxu0  ;;  %v273_v14 = vpop.f32.mrb[8].mxu1 }
 0x110   :  { %v3963_v47 = vadd.f32 %v200_v49, %v76_v54  ;;  %v202_v0 = vpop.f32.mrb[9].mxu0  ;;  %v3966_v32 = vadd.f32 %v273_v14, %v3919_v50  ;;  %v275_v48 = vpop.f32.mrb[9].mxu1 }
 0x111   :  { %v3968_v61 = vadd.f32 %v202_v0, %v80_v57  ;;  %v204_v58 = vpop.f32.mrb[10].mxu0  ;;  %v3971_v59 = vadd.f32 %v275_v48, %v3927_v53  ;;  %v277_v63 = vpop.f32.mrb[10].mxu1 }
 0x112   :  { %5763 = vst [vmem:[#allocation19_spill] sm:$0xff] %v3963_v47  ;;  %5764 = vst [vmem:[#allocation20_spill] sm:$0xff] %v3966_v32  ;;  %v3973_v45 = vadd.f32 %v204_v58, %v76_v54  ;;  %v206_v3 = vpop.f32.mrb[11].mxu0  ;;  %v3976_v4 = vadd.f32 %v277_v63, %v3919_v50  ;;  %v279_v49 = vpop.f32.mrb[11].mxu1 }
 0x113   :  { %5765 = vst [vmem:[#allocation21_spill] sm:$0xff] %v3968_v61  ;;  %5766 = vst [vmem:[#allocation22_spill] sm:$0xff] %v3971_v59  ;;  %v3978_v47 = vadd.f32 %v206_v3, %v80_v57  ;;  %v3981_v14 = vadd.f32 %v279_v49, %v3927_v53 }
 0x114   :  { %5767 = vst [vmem:[#allocation23_spill] sm:$0xff] %v3973_v45  ;;  %5768 = vst [vmem:[#allocation24_spill] sm:$0xff] %v3976_v4 }
 0x115   :  { %5769 = vst [vmem:[#allocation25_spill] sm:$0xff] %v3978_v47  ;;  %5770 = vst [vmem:[#allocation26_spill] sm:$0xff] %v3981_v14 }
 0x117   :  { %v210_v32 = vpop.f32.mrb[12].mxu0  ;;  %v283_v0 = vpop.f32.mrb[12].mxu1 }
 0x118   :  { %v3983_v61 = vadd.f32 %v210_v32, %v76_v54  ;;  %v212_v46 = vpop.f32.mrb[13].mxu0  ;;  %v3986_v48 = vadd.f32 %v283_v0, %v3919_v50  ;;  %v285_v58 = vpop.f32.mrb[13].mxu1 }
 0x119   :  { %v3988_v45 = vadd.f32 %v212_v46, %v80_v57  ;;  %v214_v59 = vpop.f32.mrb[14].mxu0  ;;  %v3991_v63 = vadd.f32 %v285_v58, %v3927_v53  ;;  %v287_v3 = vpop.f32.mrb[14].mxu1  ;;  %v181_v46 = vadd.f32 %v3921_v51, %v76_v54  ;;  %v254_v58 = vadd.f32 %v3923_v52, %v3919_v50 }
 0x11a   :  { %5771 = vst [vmem:[#allocation27_spill] sm:$0xff] %v3983_v61  ;;  %5772 = vst [vmem:[#allocation28_spill] sm:$0xff] %v3986_v48  ;;  %v3993_v47 = vadd.f32 %v214_v59, %v76_v54  ;;  %v216_v49 = vpop.f32.mrb[15].mxu0  ;;  %v3996_v14 = vadd.f32 %v287_v3, %v3919_v50  ;;  %v289_v32 = vpop.f32.mrb[15].mxu1  ;;  %v256_v59 = vadd.f32 %v255_v56, %v3927_v53 }
 0x11b   :  { %5773 = vst [vmem:[#allocation29_spill] sm:$0xff] %v3988_v45  ;;  %5774 = vst [vmem:[#allocation30_spill] sm:$0xff] %v3991_v63  ;;  %v3998_v61 = vadd.f32 %v216_v49, %v80_v57  ;;  %v4001_v0 = vadd.f32 %v289_v32, %v3927_v53  ;;  %v183_v45 = vadd.f32 %v182_v55, %v80_v57 }
 0x11c   :  { %5775 = vst [vmem:[#allocation31_spill] sm:$0xff] %v3993_v47  ;;  %5776 = vst [vmem:[#allocation32_spill] sm:$0xff] %v3996_v14 }
 0x11d   :  { %5777 = vst [vmem:[#allocation33_spill] sm:$0xff] %v3998_v61  ;;  %5778 = vst [vmem:[#allocation34_spill] sm:$0xff] %v4001_v0 }
 0x11f   :  { %v583_v63 = vpop.f32.mrb[16].mxu0 }
 0x120   :  { %v631_v47 = vadd.f32 %v583_v63, %v181_v46  ;;  %v624_v48 = vpop.f32.mrb[16].mxu1  ;;  %v585_v4 = vpop.f32.mrb[17].mxu0 }
 0x121   :  { %v633_v3 = vadd.f32 %v624_v48, %v254_v58  ;;  %v632_v14 = vadd.f32 %v585_v4, %v183_v45  ;;  %v626_v43 = vpop.f32.mrb[17].mxu1  ;;  %v587_v49 = vpop.f32.mrb[18].mxu0  ;;  %v4016_v58 = vld [vmem:[#allocation5 + $0x24] ss:$16 sps:$4 sm:$0xff]  }
 0x122   :  { %v2811_v61 = vmul.f32 -1.442695, %v631_v47  ;;  %v634_v25 = vadd.f32 %v626_v43, %v256_v59  ;;  %v588_v32 = vpop.f32.mrb[19].mxu0  ;;  %v628_v0 = vpop.f32.mrb[18].mxu1  ;;  %v4018_v59 = vld [vmem:[#allocation5 + $0x2c] ss:$16 sps:$4 sm:$0xff]  }
 0x123   :  { %v2812_v5 = vmul.f32 -1.442695, %v632_v14  ;;  %v629_v51 = vpop.f32.mrb[19].mxu1  ;;  %v2813_v54 = vmul.f32 -1.442695, %v633_v3 }
 0x124   :  { %3131 = vpow2.f32 %v2811_v61  ;;  %v4010_v0 = vld [vmem:[#allocation5] ss:$16 sps:$4 sm:$0xff]   ;;  %v4026_v49 = vld [vmem:[#allocation5 + $0x28] ss:$16 sps:$4 sm:$0xff]   ;;  %v4030_v32 = vld [vmem:[#allocation5 + $0x44] ss:$16 sps:$4 sm:$0xff]  }
 0x125   :  { %3133 = vpow2.f32 %v2812_v5  ;;  %v4024_v3 = vld [vmem:[#allocation5 + $0x20] ss:$16 sps:$4 sm:$0xff]   ;;  %v4032_v51 = vld [vmem:[#allocation5 + $0x4c] ss:$16 sps:$4 sm:$0xff]  }
 0x126   :  { %3135 = vpow2.f32 %v2813_v54  ;;  %v5779_v54 = vmov 0  }
 0x127   :  { %3137 = vtanh.f32 %v634_v25  ;;  %v4012_v25 = vld [vmem:[#allocation5 + $0x8] ss:$16 sps:$4 sm:$0xff]  }
 0x12e   :  { %v3132_v50 = vpop.eup %3131 }
 0x12f   :  { %v644_v52 = vadd.f32 1.0, %v3132_v50  ;;  %v3134_v53 = vpop.eup %3133  ;;  %v4038_v50 = vld [vmem:[#allocation5 + $0x40] ss:$16 sps:$4 sm:$0xff]  }
 0x130   :  { %v645_v55 = vadd.f32 1.0, %v3134_v53  ;;  %v3136_v45 = vpop.eup %3135  ;;  %v4044_v53 = vld [vmem:[#allocation5 + $0x64] ss:$16 sps:$4 sm:$0xff]  }
 0x131   :  { %3139 = vrcp.f32 %v644_v52  ;;  %v3138_v56 = vpop.eup %3137  ;;  %v646_v4 = vadd.f32 1.0, %v3136_v45  ;;  %v4040_v52 = vld [vmem:[#allocation5 + $0x48] ss:$16 sps:$4 sm:$0xff]   ;;  %v4050_v45 = vld [vmem:[#allocation5 + $0x60] ss:$16 sps:$4 sm:$0xff]  }
 0x132   :  { %3141 = vrcp.f32 %v645_v55  ;;  %v4046_v55 = vld [vmem:[#allocation5 + $0x6c] ss:$16 sps:$4 sm:$0xff]  }
 0x133   :  { %3143 = vrcp.f32 %v646_v4  ;;  %v4064_v4 = vld [vmem:[#allocation5 + $0x88] ss:$16 sps:$4 sm:$0xff]  }
 0x134   :  { %5784 = vst [vmem:[#allocation39_spill] sm:$0xff] %v4064_v4 }
 0x13b   :  { %v3140_v57 = vpop.eup %3139 }
 0x13c   :  { %v655_v47 = vmul.f32 %v3140_v57, %v3138_v56  ;;  %v3142_v43 = vpop.eup %3141  ;;  %v4052_v56 = vld [vmem:[#allocation5 + $0x68] ss:$16 sps:$4 sm:$0xff]   ;;  %v4056_v57 = vld [vmem:[#allocation5 + $0x84] ss:$16 sps:$4 sm:$0xff]  }
 0x13d   :  { %v654_v48 = vmul.f32 0.0, %v3142_v43  ;;  %v3144_v5 = vpop.eup %3143  ;;  %5780 = vst [vmem:[#allocation35_spill] sm:$0xff] %v4052_v56  ;;  %5781 = vst [vmem:[#allocation36_spill] sm:$0xff] %v4056_v57  ;;  %v4062_v43 = vld [vmem:[#allocation5 + $0x80] ss:$16 sps:$4 sm:$0xff]  }
 0x13e   :  { %5783 = vst [vmem:[#allocation38_spill] sm:$0xff] %v4062_v43 }
 0x13f   :  { %v4007_v14 = vadd.f32 %v655_v47, %v654_v48  ;;  %v4058_v47 = vld [vmem:[#allocation5 + $0x8c] ss:$16 sps:$4 sm:$0xff]   ;;  %v4068_v48 = vld [vmem:[#allocation5 + $0xa4] ss:$16 sps:$4 sm:$0xff]  }
 0x140   :  { %5782 = vst [vmem:[#allocation37_spill] sm:$0xff] %v4058_v47  ;;  %5785 = vst [vmem:[#allocation40_spill] sm:$0xff] %v4068_v48 }
 0x141   :  { %3145 = vtanh.f32 %v4007_v14 }
 0x14b   :  { %v3146_v61 = vpop.eup %3145 }
 0x14c   :  { %v658_v63 = vmul.f32 %v3146_v61, %v3144_v5  ;;  %v4070_v5 = vld [vmem:[#allocation5 + $0xac] ss:$16 sps:$4 sm:$0xff]   ;;  %v4074_v61 = vld [vmem:[#allocation5 + $0xa0] ss:$16 sps:$4 sm:$0xff]  }
 0x14d   :  { %5786 = vst [vmem:[#allocation41_spill] sm:$0xff] %v4070_v5  ;;  %5787 = vst [vmem:[#allocation42_spill] sm:$0xff] %v4074_v61 }
 0x14e   :  { %v4014_v46 = vpack.c.bf16 %v658_v63, %v658_v63  ;;  %v4076_v63 = vld [vmem:[#allocation5 + $0xa8] ss:$16 sps:$4 sm:$0xff]  }
 0x14f   :  { %5788 = vst [vmem:[#allocation43_spill] sm:$0xff] %v4076_v63 }
 0x150   :  { %693 = vmatmul.mubr.bf16.vlgmr.msra.gmra.mrb[20].mxu0 %v4014_v46  ;;  %734 = vmatmul.mubr.bf16.vlgmr.msra.gmra.mrb[20].mxu1 %v4014_v46 }
 0x151   :  { %1088 = vmatpush1.bf16.msra.mxu0 %v4010_v0  ;;  %1129 = vmatpush1.bf16.msra.mxu1 %v4012_v25 }
 0x152   :  { %1089 = vmatprep.subr.bf16.mxu0 %v4016_v58  ;;  %1130 = vmatprep.subr.bf16.mxu1 %v4018_v59 }
 0x153   :  { %1119 = vmatprep.mubr.bf16.mxu0 %v5779_v54  ;;  %1160 = vmatprep.mubr.bf16.mxu1 %v5779_v54 }
 0x155   :  { %1090 = vmatpush1.bf16.msra.mxu0 %v4024_v3  ;;  %1131 = vmatpush1.bf16.msra.mxu1 %v4026_v49 }
 0x156   :  { %1091 = vmatprep.subr.bf16.mxu0 %v4030_v32  ;;  %1132 = vmatprep.subr.bf16.mxu1 %v4032_v51 }
 0x159   :  { %1092 = vmatpush1.bf16.msra.mxu0 %v4038_v50  ;;  %1133 = vmatpush1.bf16.msra.mxu1 %v4040_v52 }
 0x15a   :  { %1093 = vmatprep.subr.bf16.mxu0 %v4044_v53  ;;  %1134 = vmatprep.subr.bf16.mxu1 %v4046_v55 }
 0x15d   :  { %1094 = vmatpush1.bf16.msra.mxu0 %v4050_v45  ;;  %1135 = vmatpush1.bf16.msra.mxu1 %v4052_v56  ;;  %v4080_v56 = vld [vmem:[#allocation5 + $0xc4] ss:$16 sps:$4 sm:$0xff]  }
 0x15e   :  { %1095 = vmatprep.subr.bf16.mxu0 %v4056_v57  ;;  %1136 = vmatprep.subr.bf16.mxu1 %v4058_v47  ;;  %5789 = vst [vmem:[#allocation44_spill] sm:$0xff] %v4080_v56  ;;  %v4082_v57 = vld [vmem:[#allocation5 + $0xcc] ss:$16 sps:$4 sm:$0xff]   ;;  %v4086_v47 = vld [vmem:[#allocation5 + $0xc0] ss:$16 sps:$4 sm:$0xff]  }
 0x15f   :  { %5790 = vst [vmem:[#allocation45_spill] sm:$0xff] %v4082_v57  ;;  %5791 = vst [vmem:[#allocation46_spill] sm:$0xff] %v4086_v47 }
 0x161   :  { %1096 = vmatpush1.bf16.msra.mxu0 %v4062_v43  ;;  %1137 = vmatpush1.bf16.msra.mxu1 %v4064_v4  ;;  %v4088_v43 = vld [vmem:[#allocation5 + $0xc8] ss:$16 sps:$4 sm:$0xff]   ;;  %v4092_v4 = vld [vmem:[#allocation5 + $0xe4] ss:$16 sps:$4 sm:$0xff]  }
 0x162   :  { %1097 = vmatprep.subr.bf16.mxu0 %v4068_v48  ;;  %1138 = vmatprep.subr.bf16.mxu1 %v4070_v5  ;;  %5792 = vst [vmem:[#allocation47_spill] sm:$0xff] %v4088_v43  ;;  %5793 = vst [vmem:[#allocation48_spill] sm:$0xff] %v4092_v4  ;;  %v4094_v48 = vld [vmem:[#allocation5 + $0xec] ss:$16 sps:$4 sm:$0xff]   ;;  %v4098_v5 = vld [vmem:[#allocation5 + $0xe0] ss:$16 sps:$4 sm:$0xff]  }
 0x163   :  { %5794 = vst [vmem:[#allocation49_spill] sm:$0xff] %v4094_v48  ;;  %5795 = vst [vmem:[#allocation50_spill] sm:$0xff] %v4098_v5 }
 0x165   :  { %1098 = vmatpush1.bf16.msra.mxu0 %v4074_v61  ;;  %1139 = vmatpush1.bf16.msra.mxu1 %v4076_v63  ;;  %v4100_v61 = vld [vmem:[#allocation5 + $0xe8] ss:$16 sps:$4 sm:$0xff]   ;;  %v4104_v63 = vld [vmem:[#allocation5 + $0x104] ss:$16 sps:$4 sm:$0xff]  }
 0x166   :  { %1099 = vmatprep.subr.bf16.mxu0 %v4080_v56  ;;  %1140 = vmatprep.subr.bf16.mxu1 %v4082_v57  ;;  %5796 = vst [vmem:[#allocation51_spill] sm:$0xff] %v4100_v61  ;;  %5797 = vst [vmem:[#allocation52_spill] sm:$0xff] %v4104_v63  ;;  %v4106_v56 = vld [vmem:[#allocation5 + $0x10c] ss:$16 sps:$4 sm:$0xff]   ;;  %v4110_v57 = vld [vmem:[#allocation5 + $0x100] ss:$16 sps:$4 sm:$0xff]  }
 0x167   :  { %5798 = vst [vmem:[#allocation53_spill] sm:$0xff] %v4106_v56  ;;  %5799 = vst [vmem:[#allocation54_spill] sm:$0xff] %v4110_v57 }
 0x169   :  { %1100 = vmatpush1.bf16.msra.mxu0 %v4086_v47  ;;  %1141 = vmatpush1.bf16.msra.mxu1 %v4088_v43  ;;  %v4112_v47 = vld [vmem:[#allocation5 + $0x108] ss:$16 sps:$4 sm:$0xff]   ;;  %v4116_v43 = vld [vmem:[#allocation5 + $0x124] ss:$16 sps:$4 sm:$0xff]  }
 0x16a   :  { %1101 = vmatprep.subr.bf16.mxu0 %v4092_v4  ;;  %1142 = vmatprep.subr.bf16.mxu1 %v4094_v48  ;;  %5800 = vst [vmem:[#allocation55_spill] sm:$0xff] %v4112_v47  ;;  %5801 = vst [vmem:[#allocation56_spill] sm:$0xff] %v4116_v43  ;;  %v4118_v4 = vld [vmem:[#allocation5 + $0x12c] ss:$16 sps:$4 sm:$0xff]   ;;  %v4122_v48 = vld [vmem:[#allocation5 + $0x120] ss:$16 sps:$4 sm:$0xff]  }
 0x16b   :  { %5802 = vst [vmem:[#allocation57_spill] sm:$0xff] %v4118_v4  ;;  %5803 = vst [vmem:[#allocation58_spill] sm:$0xff] %v4122_v48 }
 0x16d   :  { %1102 = vmatpush1.bf16.msra.mxu0 %v4098_v5  ;;  %1143 = vmatpush1.bf16.msra.mxu1 %v4100_v61  ;;  %v4124_v5 = vld [vmem:[#allocation5 + $0x128] ss:$16 sps:$4 sm:$0xff]   ;;  %v4128_v61 = vld [vmem:[#allocation5 + $0x144] ss:$16 sps:$4 sm:$0xff]  }
 0x16e   :  { %1103 = vmatprep.subr.bf16.mxu0 %v4104_v63  ;;  %1144 = vmatprep.subr.bf16.mxu1 %v4106_v56  ;;  %5804 = vst [vmem:[#allocation59_spill] sm:$0xff] %v4124_v5  ;;  %5805 = vst [vmem:[#allocation60_spill] sm:$0xff] %v4128_v61  ;;  %v4130_v63 = vld [vmem:[#allocation5 + $0x14c] ss:$16 sps:$4 sm:$0xff]   ;;  %v4134_v56 = vld [vmem:[#allocation5 + $0x140] ss:$16 sps:$4 sm:$0xff]  }
 0x16f   :  { %5806 = vst [vmem:[#allocation61_spill] sm:$0xff] %v4130_v63  ;;  %5807 = vst [vmem:[#allocation62_spill] sm:$0xff] %v4134_v56 }
 0x171   :  { %1104 = vmatpush1.bf16.msra.mxu0 %v4110_v57  ;;  %1145 = vmatpush1.bf16.msra.mxu1 %v4112_v47  ;;  %v4136_v57 = vld [vmem:[#allocation5 + $0x148] ss:$16 sps:$4 sm:$0xff]   ;;  %v4140_v47 = vld [vmem:[#allocation5 + $0x164] ss:$16 sps:$4 sm:$0xff]  }
 0x172   :  { %1105 = vmatprep.subr.bf16.mxu0 %v4116_v43  ;;  %1146 = vmatprep.subr.bf16.mxu1 %v4118_v4  ;;  %5808 = vst [vmem:[#allocation63_spill] sm:$0xff] %v4136_v57  ;;  %5809 = vst [vmem:[#allocation64_spill] sm:$0xff] %v4140_v47  ;;  %v4142_v43 = vld [vmem:[#allocation5 + $0x16c] ss:$16 sps:$4 sm:$0xff]   ;;  %v4146_v4 = vld [vmem:[#allocation5 + $0x160] ss:$16 sps:$4 sm:$0xff]  }
 0x173   :  { %5810 = vst [vmem:[#allocation65_spill] sm:$0xff] %v4142_v43  ;;  %5811 = vst [vmem:[#allocation66_spill] sm:$0xff] %v4146_v4 }
 0x175   :  { %1106 = vmatpush1.bf16.msra.mxu0 %v4122_v48  ;;  %1147 = vmatpush1.bf16.msra.mxu1 %v4124_v5  ;;  %v4148_v48 = vld [vmem:[#allocation5 + $0x168] ss:$16 sps:$4 sm:$0xff]   ;;  %v4152_v5 = vld [vmem:[#allocation5 + $0x184] ss:$16 sps:$4 sm:$0xff]  }
 0x176   :  { %1107 = vmatprep.subr.bf16.mxu0 %v4128_v61  ;;  %1148 = vmatprep.subr.bf16.mxu1 %v4130_v63  ;;  %5812 = vst [vmem:[#allocation67_spill] sm:$0xff] %v4148_v48  ;;  %5813 = vst [vmem:[#allocation68_spill] sm:$0xff] %v4152_v5  ;;  %v4154_v61 = vld [vmem:[#allocation5 + $0x18c] ss:$16 sps:$4 sm:$0xff]   ;;  %v4158_v63 = vld [vmem:[#allocation5 + $0x180] ss:$16 sps:$4 sm:$0xff]  }
 0x177   :  { %5814 = vst [vmem:[#allocation69_spill] sm:$0xff] %v4154_v61  ;;  %5815 = vst [vmem:[#allocation70_spill] sm:$0xff] %v4158_v63 }
 0x179   :  { %1108 = vmatpush1.bf16.msra.mxu0 %v4134_v56  ;;  %1149 = vmatpush1.bf16.msra.mxu1 %v4136_v57  ;;  %v4160_v56 = vld [vmem:[#allocation5 + $0x188] ss:$16 sps:$4 sm:$0xff]   ;;  %v4164_v57 = vld [vmem:[#allocation5 + $0x1a4] ss:$16 sps:$4 sm:$0xff]  }
 0x17a   :  { %1109 = vmatprep.subr.bf16.mxu0 %v4140_v47  ;;  %1150 = vmatprep.subr.bf16.mxu1 %v4142_v43  ;;  %5816 = vst [vmem:[#allocation71_spill] sm:$0xff] %v4160_v56  ;;  %5817 = vst [vmem:[#allocation72_spill] sm:$0xff] %v4164_v57  ;;  %v4166_v47 = vld [vmem:[#allocation5 + $0x1ac] ss:$16 sps:$4 sm:$0xff]   ;;  %v4170_v43 = vld [vmem:[#allocation5 + $0x1a0] ss:$16 sps:$4 sm:$0xff]  }
 0x17b   :  { %5818 = vst [vmem:[#allocation73_spill] sm:$0xff] %v4166_v47  ;;  %5819 = vst [vmem:[#allocation74_spill] sm:$0xff] %v4170_v43 }
 0x17d   :  { %1110 = vmatpush1.bf16.msra.mxu0 %v4146_v4  ;;  %1151 = vmatpush1.bf16.msra.mxu1 %v4148_v48  ;;  %v4172_v4 = vld [vmem:[#allocation5 + $0x1a8] ss:$16 sps:$4 sm:$0xff]   ;;  %v4176_v48 = vld [vmem:[#allocation5 + $0x1c4] ss:$16 sps:$4 sm:$0xff]  }
 0x17e   :  { %1111 = vmatprep.subr.bf16.mxu0 %v4152_v5  ;;  %1152 = vmatprep.subr.bf16.mxu1 %v4154_v61  ;;  %5820 = vst [vmem:[#allocation75_spill] sm:$0xff] %v4172_v4  ;;  %5821 = vst [vmem:[#allocation76_spill] sm:$0xff] %v4176_v48  ;;  %v4178_v5 = vld [vmem:[#allocation5 + $0x1cc] ss:$16 sps:$4 sm:$0xff]   ;;  %v4182_v61 = vld [vmem:[#allocation5 + $0x1c0] ss:$16 sps:$4 sm:$0xff]  }
 0x17f   :  { %5822 = vst [vmem:[#allocation77_spill] sm:$0xff] %v4178_v5  ;;  %5823 = vst [vmem:[#allocation78_spill] sm:$0xff] %v4182_v61 }
 0x181   :  { %1112 = vmatpush1.bf16.msra.mxu0 %v4158_v63  ;;  %1153 = vmatpush1.bf16.msra.mxu1 %v4160_v56  ;;  %v4184_v63 = vld [vmem:[#allocation5 + $0x1c8] ss:$16 sps:$4 sm:$0xff]   ;;  %v4188_v56 = vld [vmem:[#allocation5 + $0x1e4] ss:$16 sps:$4 sm:$0xff]  }
 0x182   :  { %1113 = vmatprep.subr.bf16.mxu0 %v4164_v57  ;;  %1154 = vmatprep.subr.bf16.mxu1 %v4166_v47  ;;  %5824 = vst [vmem:[#allocation79_spill] sm:$0xff] %v4184_v63  ;;  %5825 = vst [vmem:[#allocation80_spill] sm:$0xff] %v4188_v56  ;;  %v4190_v57 = vld [vmem:[#allocation5 + $0x1ec] ss:$16 sps:$4 sm:$0xff]   ;;  %v4194_v47 = vld [vmem:[#allocation5 + $0x1e0] ss:$16 sps:$4 sm:$0xff]  }
 0x183   :  { %5826 = vst [vmem:[#allocation81_spill] sm:$0xff] %v4190_v57  ;;  %5827 = vst [vmem:[#allocation82_spill] sm:$0xff] %v4194_v47 }
 0x185   :  { %1114 = vmatpush1.bf16.msra.mxu0 %v4170_v43  ;;  %1155 = vmatpush1.bf16.msra.mxu1 %v4172_v4  ;;  %v4196_v43 = vld [vmem:[#allocation5 + $0x1e8] ss:$16 sps:$4 sm:$0xff]  }
 0x186   :  { %1115 = vmatprep.subr.bf16.mxu0 %v4176_v48  ;;  %1156 = vmatprep.subr.bf16.mxu1 %v4178_v5  ;;  %5828 = vst [vmem:[#allocation83_spill] sm:$0xff] %v4196_v43 }
 0x189   :  { %1116 = vmatpush1.bf16.msra.mxu0 %v4182_v61  ;;  %1157 = vmatpush1.bf16.msra.mxu1 %v4184_v63 }
 0x18a   :  { %1117 = vmatprep.subr.bf16.mxu0 %v4188_v56  ;;  %1158 = vmatprep.subr.bf16.mxu1 %v4190_v57 }
 0x18d   :  { %1118 = vmatpush1.bf16.msra.mxu0 %v4194_v47  ;;  %1159 = vmatpush1.bf16.msra.mxu1 %v4196_v43 }
 0x18e   :  { %1218 = vmatprep.subr.bf16.mxu0 %v3745_v6  ;;  %1259 = vmatprep.subr.bf16.mxu1 %v3747_v7 }
 0x190   :  { %1120 = vmatmul.mubr.bf16.vlgmr.msra.gmra.mrb[24].mxu0 %v4014_v46  ;;  %1161 = vmatmul.mubr.bf16.vlgmr.msra.gmra.mrb[24].mxu1 %v4014_v46 }
 0x191   :  { %1219 = vmatpush1.bf16.msra.mxu0 %v3749_v8  ;;  %1260 = vmatpush1.bf16.msra.mxu1 %v3752_v9 }
 0x192   :  { %1220 = vmatprep.subr.bf16.mxu0 %v3756_v10  ;;  %1261 = vmatprep.subr.bf16.mxu1 %v3760_v11 }
 0x193   :  { %1250 = vmatprep.mubr.bf16.mxu0 %v5779_v54  ;;  %1291 = vmatprep.mubr.bf16.mxu1 %v5779_v54 }
 0x195   :  { %1221 = vmatpush1.bf16.msra.mxu0 %v3762_v12  ;;  %1262 = vmatpush1.bf16.msra.mxu1 %v3764_v13 }
 0x196   :  { %1222 = vmatprep.subr.bf16.mxu0 %v3773_v15  ;;  %1263 = vmatprep.subr.bf16.mxu1 %v3776_v16 }
 0x199   :  { %1223 = vmatpush1.bf16.msra.mxu0 %v3779_v17  ;;  %1264 = vmatpush1.bf16.msra.mxu1 %v3781_v18 }
 0x19a   :  { %1224 = vmatprep.subr.bf16.mxu0 %v3785_v19  ;;  %1265 = vmatprep.subr.bf16.mxu1 %v3788_v20 }
 0x19d   :  { %1225 = vmatpush1.bf16.msra.mxu0 %v3792_v21  ;;  %1266 = vmatpush1.bf16.msra.mxu1 %v3795_v22 }
 0x19e   :  { %1226 = vmatprep.subr.bf16.mxu0 %v3800_v23  ;;  %1267 = vmatprep.subr.bf16.mxu1 %v3804_v24 }
 0x1a1   :  { %1227 = vmatpush1.bf16.msra.mxu0 %v3810_v26  ;;  %1268 = vmatpush1.bf16.msra.mxu1 %v3814_v27 }
 0x1a2   :  { %1228 = vmatprep.subr.bf16.mxu0 %v3816_v28  ;;  %1269 = vmatprep.subr.bf16.mxu1 %v3819_v29 }
 0x1a5   :  { %1229 = vmatpush1.bf16.msra.mxu0 %v3824_v30  ;;  %1270 = vmatpush1.bf16.msra.mxu1 %v3826_v31 }
 0x1a6   :  { %1230 = vmatprep.subr.bf16.mxu0 %v3834_v33  ;;  %1271 = vmatprep.subr.bf16.mxu1 %v3838_v34 }
 0x1a9   :  { %1231 = vmatpush1.bf16.msra.mxu0 %v3840_v35  ;;  %1272 = vmatpush1.bf16.msra.mxu1 %v3842_v36 }
 0x1aa   :  { %1232 = vmatprep.subr.bf16.mxu0 %v3844_v37  ;;  %1273 = vmatprep.subr.bf16.mxu1 %v3847_v38 }
 0x1ad   :  { %1233 = vmatpush1.bf16.msra.mxu0 %v3852_v39  ;;  %1274 = vmatpush1.bf16.msra.mxu1 %v3856_v40  ;;  %v388_v40 = vld [vmem:[%s5452_s5] sm:$0xf] }
 0x1ae   :  { %1305 = vmatprep.subr.bf16.mxu0 %v3902_v41  ;;  %1346 = vmatprep.subr.bf16.mxu1 %v3904_v42 }
 0x223   :  { %v694_v6 = vpop.f32.mrb[20].mxu0  ;;  %v735_v7 = vpop.f32.mrb[20].mxu1 }
 0x224   :  { %v742_v8 = vadd.f32 %v694_v6, %v3933_v60  ;;  %v744_v9 = vadd.f32 %v735_v7, %v3936_v62  ;;  %v696_v10 = vpop.f32.mrb[21].mxu0  ;;  %v737_v11 = vpop.f32.mrb[21].mxu1  ;;  %v5829_v60 = vsub.s32 0, %v3908_v44  ;;  %v5834_v7 = vld [vmem:[#allocation36_spill] sm:$0xff] }
 0x225   :  { %v743_v12 = vadd.f32 %v696_v10, %v3938_v1  ;;  %v745_v13 = vadd.f32 %v737_v11, %v3941_v2  ;;  %v698_v15 = vpop.f32.mrb[22].mxu0  ;;  %v739_v16 = vpop.f32.mrb[22].mxu1  ;;  %v5831_v1 = vsub.s32 1, %v3908_v44 }
 0x226   :  { %v2881_v17 = vmul.f32 -1.442695, %v742_v8  ;;  %v699_v18 = vpop.f32.mrb[23].mxu0  ;;  %v740_v19 = vpop.f32.mrb[23].mxu1  ;;  %v2883_v21 = vmul.f32 -1.442695, %v744_v9  ;;  %v4269_v62 = vrot.slane %v388_v40, %v5829_v60 }
 0x227   :  { %v2882_v20 = vmul.f32 -1.442695, %v743_v12  ;;  %v4273_v2 = vrot.slane %v388_v40, %v5831_v1  ;;  %v5835_v8 = vld [vmem:[#allocation37_spill] sm:$0xff]  ;;  %v5836_v19 = vld [vmem:[#allocation38_spill] sm:$0xff]  ;;  %v5850_v60 = vld [vmem:[#allocation48_spill] sm:$0xff] }
 0x228   :  { %3147 = vpow2.f32 %v2881_v17  ;;  %5830 = vst [vmem:[#allocation84_spill] sm:$0xff] %v4269_v62  ;;  %v5851_v1 = vld [vmem:[#allocation49_spill] sm:$0xff] }
 0x229   :  { %3149 = vpow2.f32 %v2882_v20  ;;  %5832 = vst [vmem:[#allocation85_spill] sm:$0xff] %v4273_v2  ;;  %v5837_v20 = vld [vmem:[#allocation39_spill] sm:$0xff] }
 0x22a   :  { %3151 = vtanh.f32 %v745_v13 }
 0x22b   :  { %3153 = vpow2.f32 %v2883_v21 }
 0x232   :  { %v3148_v22 = vpop.eup %3147 }
 0x233   :  { %v1202_v23 = vadd.f32 1.0, %v3148_v22  ;;  %v3150_v24 = vpop.eup %3149  ;;  %v5838_v22 = vld [vmem:[#allocation40_spill] sm:$0xff] }
 0x234   :  { %v1203_v26 = vadd.f32 1.0, %v3150_v24  ;;  %v3152_v27 = vpop.eup %3151  ;;  %v5840_v24 = vsub.s32 2, %v3908_v44 }
 0x235   :  { %3155 = vrcp.f32 %v1202_v23  ;;  %v3154_v28 = vpop.eup %3153  ;;  %v5839_v23 = vld [vmem:[#allocation41_spill] sm:$0xff] }
 0x236   :  { %3157 = vrcp.f32 %v1203_v26  ;;  %v1204_v33 = vadd.f32 1.0, %v3154_v28  ;;  %v4287_v26 = vrot.slane %v388_v40, %v5840_v24  ;;  %v5843_v28 = vld [vmem:[#allocation43_spill] sm:$0xff] }
 0x237   :  { %v5861_v24 = vld [vmem:[#allocation59_spill] sm:$0xff] }
 0x238   :  { %3159 = vrcp.f32 %v1204_v33  ;;  %v5847_v33 = vld [vmem:[#allocation45_spill] sm:$0xff] }
 0x23f   :  { %v3156_v29 = vpop.eup %3155 }
 0x240   :  { %v1213_v30 = vmul.f32 %v3156_v29, %v3152_v27  ;;  %v3158_v31 = vpop.eup %3157  ;;  %v5842_v27 = vld [vmem:[#allocation42_spill] sm:$0xff]  ;;  %v5844_v29 = vsub.s32 3, %v3908_v44 }
 0x241   :  { %v1212_v34 = vmul.f32 %v3158_v31, %v4007_v14  ;;  %v5833_v14 = vld [vmem:[#allocation35_spill] sm:$0xff]  ;;  %v5846_v31 = vld [vmem:[#allocation44_spill] sm:$0xff] }
 0x242   :  { %v3160_v36 = vpop.eup %3159  ;;  %5841 = vst [vmem:[#allocation35_spill] sm:$0xff] %v4287_v26 }
 0x243   :  { %v4245_v35 = vadd.f32 %v1213_v30, %v1212_v34  ;;  %v4293_v30 = vrot.slane %v388_v40, %v5844_v29  ;;  %v5852_v40 = vld [vmem:[#allocation50_spill] sm:$0xff]  ;;  %v5862_v29 = vld [vmem:[#allocation60_spill] sm:$0xff] }
 0x245   :  { %3161 = vtanh.f32 %v4245_v35  ;;  %5845 = vst [vmem:[#allocation36_spill] sm:$0xff] %v4293_v30 }
 0x24f   :  { %v3162_v37 = vpop.eup %3161 }
 0x250   :  { %v1216_v38 = vmul.f32 %v3162_v37, %v3160_v36  ;;  %v5848_v36 = vld [vmem:[#allocation46_spill] sm:$0xff]  ;;  %v5849_v37 = vld [vmem:[#allocation47_spill] sm:$0xff] }
 0x252   :  { %v4248_v39 = vpack.c.bf16 %v1216_v38, %v1216_v38 }
 0x254   :  { %1251 = vmatmul.mubr.bf16.vlgmr.msra.gmra.mrb[28].mxu0 %v4248_v39  ;;  %1292 = vmatmul.mubr.bf16.vlgmr.msra.gmra.mrb[28].mxu1 %v4248_v39 }
 0x255   :  { %1306 = vmatpush1.bf16.msra.mxu0 %v4010_v0  ;;  %1347 = vmatpush1.bf16.msra.mxu1 %v4012_v25 }
 0x256   :  { %1307 = vmatprep.subr.bf16.mxu0 %v4016_v58  ;;  %1348 = vmatprep.subr.bf16.mxu1 %v4018_v59 }
 0x259   :  { %1308 = vmatpush1.bf16.msra.mxu0 %v4024_v3  ;;  %1349 = vmatpush1.bf16.msra.mxu1 %v4026_v49 }
 0x25a   :  { %1309 = vmatprep.subr.bf16.mxu0 %v4030_v32  ;;  %1350 = vmatprep.subr.bf16.mxu1 %v4032_v51 }
 0x25d   :  { %1310 = vmatpush1.bf16.msra.mxu0 %v4038_v50  ;;  %1351 = vmatpush1.bf16.msra.mxu1 %v4040_v52 }
 0x25e   :  { %1311 = vmatprep.subr.bf16.mxu0 %v4044_v53  ;;  %1352 = vmatprep.subr.bf16.mxu1 %v4046_v55 }
 0x261   :  { %1312 = vmatpush1.bf16.msra.mxu0 %v4050_v45  ;;  %1353 = vmatpush1.bf16.msra.mxu1 %v5833_v14 }
 0x262   :  { %1313 = vmatprep.subr.bf16.mxu0 %v5834_v7  ;;  %1354 = vmatprep.subr.bf16.mxu1 %v5835_v8 }
 0x263   :  { %v1121_v46 = vpop.f32.mrb[24].mxu0  ;;  %v1162_v6 = vpop.f32.mrb[24].mxu1 }
 0x264   :  { %v1122_v9 = vadd.f32 %v1121_v46, %v4269_v62  ;;  %v1123_v10 = vpop.f32.mrb[25].mxu0  ;;  %v1164_v11 = vpop.f32.mrb[25].mxu1  ;;  %v1163_v34 = vadd.f32 %v1162_v6, %v4287_v26  ;;  %v5855_v6 = vld [vmem:[#allocation53_spill] sm:$0xff] }
 0x265   :  { %v1124_v12 = vadd.f32 %v1123_v10, %v4273_v2  ;;  %v1125_v13 = vpop.f32.mrb[26].mxu0  ;;  %v1166_v15 = vpop.f32.mrb[26].mxu1  ;;  %1314 = vmatpush1.bf16.msra.mxu0 %v5836_v19  ;;  %1355 = vmatpush1.bf16.msra.mxu1 %v5837_v20  ;;  %v1165_v38 = vadd.f32 %v1164_v11, %v4293_v30 }
 0x266   :  { %v2878_v16 = vmul.f32 -1.442695, %v1122_v9  ;;  %v1126_v17 = vpop.f32.mrb[27].mxu0  ;;  %v1167_v18 = vpop.f32.mrb[27].mxu1  ;;  %1315 = vmatprep.subr.bf16.mxu0 %v5838_v22  ;;  %1356 = vmatprep.subr.bf16.mxu1 %v5839_v23  ;;  %v2880_v46 = vmul.f32 -1.442695, %v1163_v34 }
 0x267   :  { %v2879_v21 = vmul.f32 -1.442695, %v1124_v12  ;;  %v5853_v9 = vld [vmem:[#allocation51_spill] sm:$0xff]  ;;  %v5854_v12 = vld [vmem:[#allocation52_spill] sm:$0xff]  ;;  %v5856_v15 = vld [vmem:[#allocation54_spill] sm:$0xff] }
 0x268   :  { %3163 = vpow2.f32 %v2878_v16  ;;  %v5857_v16 = vld [vmem:[#allocation55_spill] sm:$0xff]  ;;  %v5858_v17 = vld [vmem:[#allocation56_spill] sm:$0xff]  ;;  %v5859_v18 = vld [vmem:[#allocation57_spill] sm:$0xff] }
 0x269   :  { %3165 = vpow2.f32 %v2879_v21  ;;  %1316 = vmatpush1.bf16.msra.mxu0 %v5842_v27  ;;  %1357 = vmatpush1.bf16.msra.mxu1 %v5843_v28  ;;  %v5860_v21 = vld [vmem:[#allocation58_spill] sm:$0xff]  ;;  %v5863_v34 = vld [vmem:[#allocation61_spill] sm:$0xff] }
 0x26a   :  { %1317 = vmatprep.subr.bf16.mxu0 %v5846_v31  ;;  %1358 = vmatprep.subr.bf16.mxu1 %v5847_v33  ;;  %3167 = vtanh.f32 %v1165_v38 }
 0x26b   :  { %3169 = vpow2.f32 %v2880_v46 }
 0x26d   :  { %1318 = vmatpush1.bf16.msra.mxu0 %v5848_v36  ;;  %1359 = vmatpush1.bf16.msra.mxu1 %v5849_v37 }
 0x26e   :  { %1319 = vmatprep.subr.bf16.mxu0 %v5850_v60  ;;  %1360 = vmatprep.subr.bf16.mxu1 %v5851_v1 }
 0x271   :  { %1320 = vmatpush1.bf16.msra.mxu0 %v5852_v40  ;;  %1361 = vmatpush1.bf16.msra.mxu1 %v5853_v9 }
 0x272   :  { %v3164_v44 = vpop.eup %3163  ;;  %1321 = vmatprep.subr.bf16.mxu0 %v5854_v12  ;;  %1362 = vmatprep.subr.bf16.mxu1 %v5855_v6  ;;  %v5871_v6 = vld [vmem:[#allocation69_spill] sm:$0xff] }
 0x273   :  { %v1178_v10 = vadd.f32 1.0, %v3164_v44  ;;  %v3166_v13 = vpop.eup %3165  ;;  %v5864_v44 = vld [vmem:[#allocation62_spill] sm:$0xff] }
 0x274   :  { %v1179_v11 = vadd.f32 1.0, %v3166_v13  ;;  %v3168_v38 = vpop.eup %3167 }
 0x275   :  { %3171 = vrcp.f32 %v1178_v10  ;;  %1322 = vmatpush1.bf16.msra.mxu0 %v5856_v15  ;;  %1363 = vmatpush1.bf16.msra.mxu1 %v5857_v16  ;;  %v3170_v46 = vpop.eup %3169  ;;  %v5865_v10 = vld [vmem:[#allocation63_spill] sm:$0xff] }
 0x276   :  { %3173 = vrcp.f32 %v1179_v11  ;;  %1323 = vmatprep.subr.bf16.mxu0 %v5858_v17  ;;  %1364 = vmatprep.subr.bf16.mxu1 %v5859_v18  ;;  %v5866_v11 = vld [vmem:[#allocation64_spill] sm:$0xff]  ;;  %v5867_v17 = vld [vmem:[#allocation65_spill] sm:$0xff] }
 0x279   :  { %1324 = vmatpush1.bf16.msra.mxu0 %v5860_v21  ;;  %1365 = vmatpush1.bf16.msra.mxu1 %v5861_v24  ;;  %v1180_v21 = vadd.f32 1.0, %v3170_v46  ;;  %v5868_v24 = vld [vmem:[#allocation66_spill] sm:$0xff] }
 0x27a   :  { %1325 = vmatprep.subr.bf16.mxu0 %v5862_v29  ;;  %1366 = vmatprep.subr.bf16.mxu1 %v5863_v34  ;;  %v5869_v29 = vld [vmem:[#allocation67_spill] sm:$0xff]  ;;  %v5870_v34 = vld [vmem:[#allocation68_spill] sm:$0xff]  ;;  %v5876_v46 = vld [vmem:[#allocation74_spill] sm:$0xff] }
 0x27b   :  { %3175 = vrcp.f32 %v1180_v21 }
 0x27d   :  { %1326 = vmatpush1.bf16.msra.mxu0 %v5864_v44  ;;  %1367 = vmatpush1.bf16.msra.mxu1 %v5865_v10  ;;  %v5872_v10 = vld [vmem:[#allocation70_spill] sm:$0xff] }
 0x27e   :  { %1327 = vmatprep.subr.bf16.mxu0 %v5866_v11  ;;  %1368 = vmatprep.subr.bf16.mxu1 %v5867_v17  ;;  %v5873_v11 = vld [vmem:[#allocation71_spill] sm:$0xff] }
 0x27f   :  { %v3172_v13 = vpop.eup %3171 }
 0x280   :  { %v1189_v18 = vmul.f32 %v3172_v13, %v3168_v38  ;;  %v3174_v16 = vpop.eup %3173  ;;  %v5874_v38 = vld [vmem:[#allocation72_spill] sm:$0xff] }
 0x281   :  { %v1188_v15 = vmul.f32 0.0, %v3174_v16  ;;  %1328 = vmatpush1.bf16.msra.mxu0 %v5868_v24  ;;  %1369 = vmatpush1.bf16.msra.mxu1 %v5869_v29  ;;  %v5875_v16 = vld [vmem:[#allocation73_spill] sm:$0xff] }
 0x282   :  { %1329 = vmatprep.subr.bf16.mxu0 %v5870_v34  ;;  %1370 = vmatprep.subr.bf16.mxu1 %v5871_v6 }
 0x283   :  { %v4323_v44 = vadd.f32 %v1189_v18, %v1188_v15 }
 0x285   :  { %1330 = vmatpush1.bf16.msra.mxu0 %v5872_v10  ;;  %1371 = vmatpush1.bf16.msra.mxu1 %v5873_v11  ;;  %3177 = vtanh.f32 %v4323_v44  ;;  %v3176_v15 = vpop.eup %3175 }
 0x286   :  { %1331 = vmatprep.subr.bf16.mxu0 %v5874_v38  ;;  %1372 = vmatprep.subr.bf16.mxu1 %v5875_v16 }
 0x289   :  { %1332 = vmatpush1.bf16.msra.mxu0 %v5876_v46  ;;  %1373 = vmatpush1.bf16.msra.mxu1 %v4172_v4  ;;  %v4340_v4 = vld [vmem:[#allocation2 + $0x4] ss:$16 sps:$4 sm:$0xff]  }
 0x28a   :  { %1333 = vmatprep.subr.bf16.mxu0 %v4176_v48  ;;  %1374 = vmatprep.subr.bf16.mxu1 %v4178_v5  ;;  %5877 = vst [vmem:[#allocation37_spill] sm:$0xff] %v4340_v4  ;;  %v4343_v5 = vld [vmem:[#allocation2 + $0xc] ss:$16 sps:$4 sm:$0xff]  }
 0x28b   :  { %5878 = vst [vmem:[#allocation38_spill] sm:$0xff] %v4343_v5 }
 0x28d   :  { %1334 = vmatpush1.bf16.msra.mxu0 %v4182_v61  ;;  %1375 = vmatpush1.bf16.msra.mxu1 %v4184_v63  ;;  %v5912_v63 = vld [vmem:[#allocation14_spill] sm:$0xff] }
 0x28e   :  { %1335 = vmatprep.subr.bf16.mxu0 %v4188_v56  ;;  %1376 = vmatprep.subr.bf16.mxu1 %v4190_v57  ;;  %v5911_v57 = vld [vmem:[#allocation13_spill] sm:$0xff] }
 0x28f   :  { %v3178_v18 = vpop.eup %3177 }
 0x290   :  { %v1192_v21 = vmul.f32 %v3178_v18, %v3176_v15  ;;  %v4348_v15 = vld [vmem:[#allocation2] ss:$16 sps:$4 sm:$0xff]   ;;  %v4351_v18 = vld [vmem:[#allocation2 + $0x8] ss:$16 sps:$4 sm:$0xff]  }
 0x291   :  { %1336 = vmatpush1.bf16.msra.mxu0 %v4194_v47  ;;  %1377 = vmatpush1.bf16.msra.mxu1 %v4196_v43  ;;  %5879 = vst [vmem:[#allocation39_spill] sm:$0xff] %v4348_v15  ;;  %5880 = vst [vmem:[#allocation40_spill] sm:$0xff] %v4351_v18 }
 0x292   :  { %v1304_v13 = vpack.c.bf16 %v1192_v21, %v1192_v21  ;;  %1436 = vmatprep.subr.bf16.mxu0 %v4340_v4  ;;  %1477 = vmatprep.subr.bf16.mxu1 %v4343_v5  ;;  %v4354_v21 = vld [vmem:[#allocation2 + $0x24] ss:$16 sps:$4 sm:$0xff]   ;;  %v4357_v4 = vld [vmem:[#allocation2 + $0x2c] ss:$16 sps:$4 sm:$0xff]  }
 0x293   :  { %5881 = vst [vmem:[#allocation41_spill] sm:$0xff] %v4354_v21  ;;  %5882 = vst [vmem:[#allocation42_spill] sm:$0xff] %v4357_v4  ;;  %v5910_v5 = vld [vmem:[#allocation12_spill] sm:$0xff] }
 0x294   :  { %1337 = vmatprep.mubr.bf16.mxu0 %v1304_v13  ;;  %1378 = vmatprep.mubr.bf16.mxu1 %v1304_v13  ;;  %v4365_v13 = vld [vmem:[#allocation2 + $0x28] ss:$16 sps:$4 sm:$0xff]  }
 0x295   :  { %1338 = vmatmul.mubr.bf16.vlgmr.msra.gmra.mrb[32].mxu0 %v4248_v39  ;;  %1379 = vmatmul.mubr.bf16.vlgmr.msra.gmra.mrb[32].mxu1 %v4248_v39  ;;  %v4362_v39 = vld [vmem:[#allocation2 + $0x20] ss:$16 sps:$4 sm:$0xff]   ;;  %5884 = vst [vmem:[#allocation44_spill] sm:$0xff] %v4365_v13 }
 0x296   :  { %1437 = vmatpush1.bf16.msra.mxu0 %v4348_v15  ;;  %1478 = vmatpush1.bf16.msra.mxu1 %v4351_v18  ;;  %5883 = vst [vmem:[#allocation43_spill] sm:$0xff] %v4362_v39  ;;  %v4368_v18 = vld [vmem:[#allocation2 + $0x44] ss:$16 sps:$4 sm:$0xff]   ;;  %v5909_v15 = vld [vmem:[#allocation11_spill] sm:$0xff] }
 0x297   :  { %1438 = vmatprep.subr.bf16.mxu0 %v4354_v21  ;;  %1479 = vmatprep.subr.bf16.mxu1 %v4357_v4  ;;  %5885 = vst [vmem:[#allocation45_spill] sm:$0xff] %v4368_v18  ;;  %v4371_v21 = vld [vmem:[#allocation2 + $0x4c] ss:$16 sps:$4 sm:$0xff]   ;;  %v4374_v4 = vld [vmem:[#allocation2 + $0x40] ss:$16 sps:$4 sm:$0xff]  }
 0x298   :  { %1468 = vmatprep.mubr.bf16.mxu0 %v5779_v54  ;;  %1509 = vmatprep.mubr.bf16.mxu1 %v5779_v54  ;;  %5886 = vst [vmem:[#allocation46_spill] sm:$0xff] %v4371_v21  ;;  %5887 = vst [vmem:[#allocation47_spill] sm:$0xff] %v4374_v4  ;;  %v4377_v54 = vld [vmem:[#allocation2 + $0x48] ss:$16 sps:$4 sm:$0xff]  }
 0x299   :  { %5888 = vst [vmem:[#allocation48_spill] sm:$0xff] %v4377_v54 }
 0x29a   :  { %1439 = vmatpush1.bf16.msra.mxu0 %v4362_v39  ;;  %1480 = vmatpush1.bf16.msra.mxu1 %v4365_v13  ;;  %v4380_v39 = vld [vmem:[#allocation2 + $0x64] ss:$16 sps:$4 sm:$0xff]   ;;  %v4383_v13 = vld [vmem:[#allocation2 + $0x6c] ss:$16 sps:$4 sm:$0xff]  }
 0x29b   :  { %1440 = vmatprep.subr.bf16.mxu0 %v4368_v18  ;;  %1481 = vmatprep.subr.bf16.mxu1 %v4371_v21  ;;  %5889 = vst [vmem:[#allocation49_spill] sm:$0xff] %v4380_v39  ;;  %5890 = vst [vmem:[#allocation50_spill] sm:$0xff] %v4383_v13  ;;  %v4386_v18 = vld [vmem:[#allocation2 + $0x60] ss:$16 sps:$4 sm:$0xff]   ;;  %v4389_v21 = vld [vmem:[#allocation2 + $0x68] ss:$16 sps:$4 sm:$0xff]  }
 0x29c   :  { %5891 = vst [vmem:[#allocation51_spill] sm:$0xff] %v4386_v18  ;;  %5892 = vst [vmem:[#allocation52_spill] sm:$0xff] %v4389_v21 }
 0x29e   :  { %1441 = vmatpush1.bf16.msra.mxu0 %v4374_v4  ;;  %1482 = vmatpush1.bf16.msra.mxu1 %v4377_v54  ;;  %v4392_v4 = vld [vmem:[#allocation2 + $0x84] ss:$16 sps:$4 sm:$0xff]   ;;  %v4395_v54 = vld [vmem:[#allocation2 + $0x8c] ss:$16 sps:$4 sm:$0xff]  }
 0x29f   :  { %1442 = vmatprep.subr.bf16.mxu0 %v4380_v39  ;;  %1483 = vmatprep.subr.bf16.mxu1 %v4383_v13  ;;  %5893 = vst [vmem:[#allocation65_spill] sm:$0xff] %v4392_v4  ;;  %5894 = vst [vmem:[#allocation66_spill] sm:$0xff] %v4395_v54  ;;  %v4398_v39 = vld [vmem:[#allocation2 + $0x80] ss:$16 sps:$4 sm:$0xff]   ;;  %v4401_v13 = vld [vmem:[#allocation2 + $0x88] ss:$16 sps:$4 sm:$0xff]  }
 0x2a0   :  { %5895 = vst [vmem:[#allocation67_spill] sm:$0xff] %v4398_v39  ;;  %5896 = vst [vmem:[#allocation68_spill] sm:$0xff] %v4401_v13 }
 0x2a2   :  { %1443 = vmatpush1.bf16.msra.mxu0 %v4386_v18  ;;  %1484 = vmatpush1.bf16.msra.mxu1 %v4389_v21  ;;  %v4404_v18 = vld [vmem:[#allocation2 + $0xa4] ss:$16 sps:$4 sm:$0xff]   ;;  %v4407_v21 = vld [vmem:[#allocation2 + $0xac] ss:$16 sps:$4 sm:$0xff]  }
 0x2a3   :  { %1444 = vmatprep.subr.bf16.mxu0 %v4392_v4  ;;  %1485 = vmatprep.subr.bf16.mxu1 %v4395_v54  ;;  %5897 = vst [vmem:[#allocation69_spill] sm:$0xff] %v4404_v18  ;;  %5898 = vst [vmem:[#allocation70_spill] sm:$0xff] %v4407_v21  ;;  %v4410_v4 = vld [vmem:[#allocation2 + $0xa0] ss:$16 sps:$4 sm:$0xff]   ;;  %v4413_v54 = vld [vmem:[#allocation2 + $0xa8] ss:$16 sps:$4 sm:$0xff]  }
 0x2a4   :  { %5899 = vst [vmem:[#allocation86_spill] sm:$0xff] %v4410_v4  ;;  %5900 = vst [vmem:[#allocation87_spill] sm:$0xff] %v4413_v54 }
 0x2a6   :  { %1445 = vmatpush1.bf16.msra.mxu0 %v4398_v39  ;;  %1486 = vmatpush1.bf16.msra.mxu1 %v4401_v13  ;;  %v4416_v39 = vld [vmem:[#allocation2 + $0xc4] ss:$16 sps:$4 sm:$0xff]   ;;  %v4419_v13 = vld [vmem:[#allocation2 + $0xcc] ss:$16 sps:$4 sm:$0xff]  }
 0x2a7   :  { %1446 = vmatprep.subr.bf16.mxu0 %v4404_v18  ;;  %1487 = vmatprep.subr.bf16.mxu1 %v4407_v21  ;;  %5901 = vst [vmem:[#allocation88_spill] sm:$0xff] %v4416_v39  ;;  %5902 = vst [vmem:[#allocation89_spill] sm:$0xff] %v4419_v13  ;;  %v4422_v18 = vld [vmem:[#allocation2 + $0xc0] ss:$16 sps:$4 sm:$0xff]   ;;  %v4425_v21 = vld [vmem:[#allocation2 + $0xc8] ss:$16 sps:$4 sm:$0xff]  }
 0x2a8   :  { %5903 = vst [vmem:[#allocation90_spill] sm:$0xff] %v4422_v18  ;;  %5904 = vst [vmem:[#allocation91_spill] sm:$0xff] %v4425_v21 }
 0x2aa   :  { %1447 = vmatpush1.bf16.msra.mxu0 %v4410_v4  ;;  %1488 = vmatpush1.bf16.msra.mxu1 %v4413_v54  ;;  %v4428_v4 = vld [vmem:[#allocation2 + $0xe4] ss:$16 sps:$4 sm:$0xff]   ;;  %v4431_v54 = vld [vmem:[#allocation2 + $0xec] ss:$16 sps:$4 sm:$0xff]  }
 0x2ab   :  { %1448 = vmatprep.subr.bf16.mxu0 %v4416_v39  ;;  %1489 = vmatprep.subr.bf16.mxu1 %v4419_v13  ;;  %5905 = vst [vmem:[#allocation92_spill] sm:$0xff] %v4428_v4  ;;  %5906 = vst [vmem:[#allocation93_spill] sm:$0xff] %v4431_v54  ;;  %v4434_v39 = vld [vmem:[#allocation2 + $0xe0] ss:$16 sps:$4 sm:$0xff]   ;;  %v4437_v13 = vld [vmem:[#allocation2 + $0xe8] ss:$16 sps:$4 sm:$0xff]  }
 0x2ac   :  { %5907 = vst [vmem:[#allocation94_spill] sm:$0xff] %v4434_v39  ;;  %5908 = vst [vmem:[#allocation95_spill] sm:$0xff] %v4437_v13 }
 0x2ae   :  { %1449 = vmatpush1.bf16.msra.mxu0 %v4422_v18  ;;  %1490 = vmatpush1.bf16.msra.mxu1 %v4425_v21 }
 0x2af   :  { %1450 = vmatprep.subr.bf16.mxu0 %v4428_v4  ;;  %1491 = vmatprep.subr.bf16.mxu1 %v4431_v54 }
 0x2b2   :  { %1451 = vmatpush1.bf16.msra.mxu0 %v4434_v39  ;;  %1492 = vmatpush1.bf16.msra.mxu1 %v4437_v13 }
 0x2b3   :  { %1523 = vmatprep.subr.bf16.mxu0 %v3902_v41  ;;  %1564 = vmatprep.subr.bf16.mxu1 %v3904_v42 }
 0x327   :  { %v1252_v21 = vpop.f32.mrb[28].mxu0  ;;  %v1293_v18 = vpop.f32.mrb[28].mxu1 }
 0x328   :  { %v1300_v4 = vadd.f32 %v1252_v21, %v5909_v15  ;;  %v1302_v43 = vadd.f32 %v1293_v18, %v5910_v5  ;;  %v1254_v47 = vpop.f32.mrb[29].mxu0  ;;  %v1295_v54 = vpop.f32.mrb[29].mxu1 }
 0x329   :  { %v1301_v56 = vadd.f32 %v1254_v47, %v5911_v57  ;;  %v1303_v39 = vadd.f32 %v1295_v54, %v5912_v63  ;;  %v1256_v61 = vpop.f32.mrb[30].mxu0  ;;  %v1297_v48 = vpop.f32.mrb[30].mxu1 }
 0x32a   :  { %v2887_v46 = vmul.f32 -1.442695, %v1300_v4  ;;  %v1257_v13 = vpop.f32.mrb[31].mxu0  ;;  %v1298_v16 = vpop.f32.mrb[31].mxu1  ;;  %v2889_v42 = vmul.f32 -1.442695, %v1302_v43 }
 0x32b   :  { %v2888_v41 = vmul.f32 -1.442695, %v1301_v56 }
 0x32c   :  { %3179 = vpow2.f32 %v2887_v46 }
 0x32d   :  { %3181 = vpow2.f32 %v2888_v41 }
 0x32e   :  { %3183 = vtanh.f32 %v1303_v39 }
 0x32f   :  { %3185 = vpow2.f32 %v2889_v42 }
 0x336   :  { %v3180_v38 = vpop.eup %3179 }
 0x337   :  { %v1420_v11 = vadd.f32 1.0, %v3180_v38  ;;  %v3182_v15 = vpop.eup %3181 }
 0x338   :  { %v1421_v5 = vadd.f32 1.0, %v3182_v15  ;;  %v3184_v57 = vpop.eup %3183  ;;  %v5926_v15 = vld [vmem:[#allocation72_spill] sm:$0xff] }
 0x339   :  { %3187 = vrcp.f32 %v1420_v11  ;;  %v3186_v47 = vpop.eup %3185  ;;  %v5924_v11 = vld [vmem:[#allocation64_spill] sm:$0xff] }
 0x33a   :  { %3189 = vrcp.f32 %v1421_v5  ;;  %v1422_v4 = vadd.f32 1.0, %v3186_v47  ;;  %v5927_v5 = vld [vmem:[#allocation73_spill] sm:$0xff] }
 0x33b   :  { %v5935_v47 = vld [vmem:[#allocation81_spill] sm:$0xff] }
 0x33c   :  { %3191 = vrcp.f32 %v1422_v4  ;;  %v5937_v4 = vld [vmem:[#allocation83_spill] sm:$0xff] }
 0x343   :  { %v3188_v54 = vpop.eup %3187 }
 0x344   :  { %v1431_v61 = vmul.f32 %v3188_v54, %v3184_v57  ;;  %v3190_v48 = vpop.eup %3189  ;;  %v5933_v57 = vld [vmem:[#allocation79_spill] sm:$0xff] }
 0x345   :  { %v1430_v63 = vmul.f32 %v3190_v48, %v4245_v35  ;;  %v5936_v48 = vld [vmem:[#allocation82_spill] sm:$0xff] }
 0x346   :  { %v3192_v43 = vpop.eup %3191 }
 0x347   :  { %v4447_v56 = vadd.f32 %v1431_v61, %v1430_v63 }
 0x349   :  { %3193 = vtanh.f32 %v4447_v56 }
 0x353   :  { %v3194_v38 = vpop.eup %3193 }
 0x354   :  { %v1434_v16 = vmul.f32 %v3194_v38, %v3192_v43  ;;  %v5938_v43 = vld [vmem:[#allocation37_spill] sm:$0xff]  ;;  %v5939_v38 = vld [vmem:[#allocation38_spill] sm:$0xff] }
 0x356   :  { %v4450_v46 = vpack.c.bf16 %v1434_v16, %v1434_v16 }
 0x358   :  { %1469 = vmatmul.mubr.bf16.vlgmr.msra.gmra.mrb[36].mxu0 %v4450_v46  ;;  %1510 = vmatmul.mubr.bf16.vlgmr.msra.gmra.mrb[36].mxu1 %v4450_v46 }
 0x359   :  { %1524 = vmatpush1.bf16.msra.mxu0 %v4010_v0  ;;  %1565 = vmatpush1.bf16.msra.mxu1 %v4012_v25 }
 0x35a   :  { %1525 = vmatprep.subr.bf16.mxu0 %v4016_v58  ;;  %1566 = vmatprep.subr.bf16.mxu1 %v4018_v59 }
 0x35d   :  { %1526 = vmatpush1.bf16.msra.mxu0 %v4024_v3  ;;  %1567 = vmatpush1.bf16.msra.mxu1 %v4026_v49 }
 0x35e   :  { %1527 = vmatprep.subr.bf16.mxu0 %v4030_v32  ;;  %1568 = vmatprep.subr.bf16.mxu1 %v4032_v51 }
 0x361   :  { %1528 = vmatpush1.bf16.msra.mxu0 %v4038_v50  ;;  %1569 = vmatpush1.bf16.msra.mxu1 %v4040_v52 }
 0x362   :  { %1529 = vmatprep.subr.bf16.mxu0 %v4044_v53  ;;  %1570 = vmatprep.subr.bf16.mxu1 %v4046_v55 }
 0x365   :  { %1530 = vmatpush1.bf16.msra.mxu0 %v4050_v45  ;;  %1571 = vmatpush1.bf16.msra.mxu1 %v5833_v14 }
 0x366   :  { %1531 = vmatprep.subr.bf16.mxu0 %v5834_v7  ;;  %1572 = vmatprep.subr.bf16.mxu1 %v5835_v8  ;;  %v5913_v8 = vld [vmem:[#allocation53_spill] sm:$0xff] }
 0x368   :  { %v1339_v0 = vpop.f32.mrb[32].mxu0  ;;  %v1380_v25 = vpop.f32.mrb[32].mxu1 }
 0x369   :  { %v1340_v58 = vadd.f32 %v1339_v0, %v4269_v62  ;;  %v1341_v59 = vpop.f32.mrb[33].mxu0  ;;  %v1382_v3 = vpop.f32.mrb[33].mxu1  ;;  %1532 = vmatpush1.bf16.msra.mxu0 %v5836_v19  ;;  %1573 = vmatpush1.bf16.msra.mxu1 %v5837_v20  ;;  %v1381_v45 = vadd.f32 %v1380_v25, %v4287_v26  ;;  %v5940_v0 = vld [vmem:[#allocation39_spill] sm:$0xff]  ;;  %v5941_v25 = vld [vmem:[#allocation40_spill] sm:$0xff] }
 0x36a   :  { %v1342_v49 = vadd.f32 %v1341_v59, %v4273_v2  ;;  %v1343_v32 = vpop.f32.mrb[34].mxu0  ;;  %v1384_v51 = vpop.f32.mrb[34].mxu1  ;;  %1533 = vmatprep.subr.bf16.mxu0 %v5838_v22  ;;  %1574 = vmatprep.subr.bf16.mxu1 %v5839_v23  ;;  %v1383_v35 = vadd.f32 %v1382_v3, %v4293_v30  ;;  %v5914_v23 = vld [vmem:[#allocation54_spill] sm:$0xff]  ;;  %v5944_v3 = vmov 0  }
 0x36b   :  { %v2884_v50 = vmul.f32 -1.442695, %v1340_v58  ;;  %v1344_v52 = vpop.f32.mrb[35].mxu0  ;;  %v1385_v53 = vpop.f32.mrb[35].mxu1  ;;  %v2886_v14 = vmul.f32 -1.442695, %v1381_v45 }
 0x36c   :  { %v2885_v55 = vmul.f32 -1.442695, %v1342_v49  ;;  %v5942_v58 = vld [vmem:[#allocation41_spill] sm:$0xff]  ;;  %v5943_v59 = vld [vmem:[#allocation42_spill] sm:$0xff]  ;;  %v5945_v49 = vld [vmem:[#allocation43_spill] sm:$0xff] }
 0x36d   :  { %3195 = vpow2.f32 %v2884_v50  ;;  %1534 = vmatpush1.bf16.msra.mxu0 %v5842_v27  ;;  %1575 = vmatpush1.bf16.msra.mxu1 %v5843_v28  ;;  %v5915_v27 = vld [vmem:[#allocation55_spill] sm:$0xff]  ;;  %v5916_v28 = vld [vmem:[#allocation56_spill] sm:$0xff]  ;;  %v5947_v51 = vld [vmem:[#allocation45_spill] sm:$0xff] }
 0x36e   :  { %3197 = vpow2.f32 %v2885_v55  ;;  %1535 = vmatprep.subr.bf16.mxu0 %v5846_v31  ;;  %1576 = vmatprep.subr.bf16.mxu1 %v5847_v33  ;;  %v5917_v31 = vld [vmem:[#allocation57_spill] sm:$0xff]  ;;  %v5918_v33 = vld [vmem:[#allocation58_spill] sm:$0xff]  ;;  %v5946_v32 = vld [vmem:[#allocation44_spill] sm:$0xff] }
 0x36f   :  { %3199 = vtanh.f32 %v1383_v35  ;;  %v5948_v50 = vld [vmem:[#allocation46_spill] sm:$0xff]  ;;  %v5950_v52 = vld [vmem:[#allocation48_spill] sm:$0xff]  ;;  %v5951_v53 = vld [vmem:[#allocation49_spill] sm:$0xff] }
 0x370   :  { %3201 = vpow2.f32 %v2886_v14  ;;  %v5952_v55 = vld [vmem:[#allocation50_spill] sm:$0xff]  ;;  %v5953_v45 = vld [vmem:[#allocation51_spill] sm:$0xff]  ;;  %v5954_v35 = vld [vmem:[#allocation52_spill] sm:$0xff] }
 0x371   :  { %1536 = vmatpush1.bf16.msra.mxu0 %v5848_v36  ;;  %1577 = vmatpush1.bf16.msra.mxu1 %v5849_v37  ;;  %v5919_v36 = vld [vmem:[#allocation59_spill] sm:$0xff]  ;;  %v5920_v37 = vld [vmem:[#allocation60_spill] sm:$0xff]  ;;  %v5955_v14 = vld [vmem:[#allocation65_spill] sm:$0xff] }
 0x372   :  { %1537 = vmatprep.subr.bf16.mxu0 %v5850_v60  ;;  %1578 = vmatprep.subr.bf16.mxu1 %v5851_v1  ;;  %v5921_v60 = vld [vmem:[#allocation61_spill] sm:$0xff] }
 0x375   :  { %1538 = vmatpush1.bf16.msra.mxu0 %v5852_v40  ;;  %1579 = vmatpush1.bf16.msra.mxu1 %v5853_v9  ;;  %v5922_v40 = vld [vmem:[#allocation62_spill] sm:$0xff]  ;;  %v5923_v9 = vld [vmem:[#allocation63_spill] sm:$0xff] }
 0x376   :  { %1539 = vmatprep.subr.bf16.mxu0 %v5854_v12  ;;  %1580 = vmatprep.subr.bf16.mxu1 %v5913_v8  ;;  %v5957_v8 = vld [vmem:[#allocation67_spill] sm:$0xff] }
 0x377   :  { %v3196_v7 = vpop.eup %3195 }
 0x378   :  { %v1396_v19 = vadd.f32 1.0, %v3196_v7  ;;  %v3198_v20 = vpop.eup %3197  ;;  %v5956_v7 = vld [vmem:[#allocation66_spill] sm:$0xff] }
 0x379   :  { %v1397_v22 = vadd.f32 1.0, %v3198_v20  ;;  %1540 = vmatpush1.bf16.msra.mxu0 %v5914_v23  ;;  %1581 = vmatpush1.bf16.msra.mxu1 %v5915_v27  ;;  %v3200_v1 = vpop.eup %3199  ;;  %v5959_v20 = vld [vmem:[#allocation69_spill] sm:$0xff]  ;;  %v5961_v23 = vld [vmem:[#allocation86_spill] sm:$0xff]  ;;  %v5962_v27 = vld [vmem:[#allocation87_spill] sm:$0xff] }
 0x37a   :  { %3203 = vrcp.f32 %v1396_v19  ;;  %1541 = vmatprep.subr.bf16.mxu0 %v5916_v28  ;;  %1582 = vmatprep.subr.bf16.mxu1 %v5917_v31  ;;  %v3202_v12 = vpop.eup %3201  ;;  %v5958_v19 = vld [vmem:[#allocation68_spill] sm:$0xff]  ;;  %v5964_v31 = vld [vmem:[#allocation89_spill] sm:$0xff] }
 0x37b   :  { %3205 = vrcp.f32 %v1397_v22  ;;  %v1398_v13 = vadd.f32 1.0, %v3202_v12  ;;  %v5960_v22 = vld [vmem:[#allocation70_spill] sm:$0xff]  ;;  %v5963_v28 = vld [vmem:[#allocation88_spill] sm:$0xff]  ;;  %v4563_v12 = vld [vmem:[#allocation5 + $0xc] ss:$16 sps:$4 sm:$0xff]  }
 0x37d   :  { %1542 = vmatpush1.bf16.msra.mxu0 %v5918_v33  ;;  %1583 = vmatpush1.bf16.msra.mxu1 %v5919_v36  ;;  %3207 = vrcp.f32 %v1398_v13  ;;  %v5965_v33 = vld [vmem:[#allocation90_spill] sm:$0xff]  ;;  %v5966_v36 = vld [vmem:[#allocation91_spill] sm:$0xff]  ;;  %v5972_v13 = vld [vmem:[#allocation16_spill] sm:$0xff] }
 0x37e   :  { %1543 = vmatprep.subr.bf16.mxu0 %v5920_v37  ;;  %1584 = vmatprep.subr.bf16.mxu1 %v5921_v60  ;;  %v5967_v37 = vld [vmem:[#allocation92_spill] sm:$0xff]  ;;  %v5968_v60 = vld [vmem:[#allocation93_spill] sm:$0xff] }
 0x381   :  { %1544 = vmatpush1.bf16.msra.mxu0 %v5922_v40  ;;  %1585 = vmatpush1.bf16.msra.mxu1 %v5923_v9  ;;  %v5970_v40 = vld [vmem:[#allocation95_spill] sm:$0xff]  ;;  %v4560_v9 = vld [vmem:[#allocation5 + $0x4] ss:$16 sps:$4 sm:$0xff]  }
 0x382   :  { %1545 = vmatprep.subr.bf16.mxu0 %v5924_v11  ;;  %1586 = vmatprep.subr.bf16.mxu1 %v5867_v17  ;;  %v5925_v17 = vld [vmem:[#allocation71_spill] sm:$0xff] }
 0x384   :  { %v3204_v18 = vpop.eup %3203 }
 0x385   :  { %v1407_v21 = vmul.f32 %v3204_v18, %v3200_v1  ;;  %v3206_v39 = vpop.eup %3205  ;;  %1546 = vmatpush1.bf16.msra.mxu0 %v5868_v24  ;;  %1587 = vmatpush1.bf16.msra.mxu1 %v5869_v29  ;;  %v5928_v24 = vld [vmem:[#allocation74_spill] sm:$0xff]  ;;  %v5929_v29 = vld [vmem:[#allocation75_spill] sm:$0xff] }
 0x386   :  { %v1406_v41 = vmul.f32 %v3206_v39, %v4323_v44  ;;  %1547 = vmatprep.subr.bf16.mxu0 %v5870_v34  ;;  %1588 = vmatprep.subr.bf16.mxu1 %v5871_v6  ;;  %v5930_v34 = vld [vmem:[#allocation76_spill] sm:$0xff]  ;;  %v5931_v6 = vld [vmem:[#allocation77_spill] sm:$0xff]  ;;  %v5932_v44 = vld [vmem:[#allocation78_spill] sm:$0xff] }
 0x387   :  { %v3208_v54 = vpop.eup %3207  ;;  %v5969_v1 = vld [vmem:[#allocation94_spill] sm:$0xff] }
 0x388   :  { %v4507_v42 = vadd.f32 %v1407_v21, %v1406_v41  ;;  %v5971_v21 = vld [vmem:[#allocation15_spill] sm:$0xff] }
 0x389   :  { %1548 = vmatpush1.bf16.msra.mxu0 %v5872_v10  ;;  %1589 = vmatpush1.bf16.msra.mxu1 %v5925_v17  ;;  %v5934_v10 = vld [vmem:[#allocation80_spill] sm:$0xff] }
 0x38a   :  { %1549 = vmatprep.subr.bf16.mxu0 %v5926_v15  ;;  %1590 = vmatprep.subr.bf16.mxu1 %v5927_v5  ;;  %3209 = vtanh.f32 %v4507_v42  ;;  %v5973_v5 = vld [vmem:[#allocation17_spill] sm:$0xff] }
 0x38d   :  { %1550 = vmatpush1.bf16.msra.mxu0 %v5928_v24  ;;  %1591 = vmatpush1.bf16.msra.mxu1 %v5929_v29  ;;  %v5974_v29 = vld [vmem:[#allocation18_spill] sm:$0xff] }
 0x38e   :  { %1551 = vmatprep.subr.bf16.mxu0 %v5930_v34  ;;  %1592 = vmatprep.subr.bf16.mxu1 %v5931_v6 }
 0x391   :  { %1552 = vmatpush1.bf16.msra.mxu0 %v5932_v44  ;;  %1593 = vmatpush1.bf16.msra.mxu1 %v5933_v57 }
 0x392   :  { %1553 = vmatprep.subr.bf16.mxu0 %v5934_v10  ;;  %1594 = vmatprep.subr.bf16.mxu1 %v5935_v47 }
 0x394   :  { %v3210_v61 = vpop.eup %3209 }
 0x395   :  { %1554 = vmatpush1.bf16.msra.mxu0 %v5936_v48  ;;  %1595 = vmatpush1.bf16.msra.mxu1 %v5937_v4  ;;  %v1410_v63 = vmul.f32 %v3210_v61, %v3208_v54 }
 0x396   :  { %1654 = vmatprep.subr.bf16.mxu0 %v5938_v43  ;;  %1695 = vmatprep.subr.bf16.mxu1 %v5939_v38 }
 0x397   :  { %v1522_v16 = vpack.c.bf16 %v1410_v63, %v1410_v63 }
 0x399   :  { %1555 = vmatprep.mubr.bf16.mxu0 %v1522_v16  ;;  %1596 = vmatprep.mubr.bf16.mxu1 %v1522_v16 }
 0x39a   :  { %1556 = vmatmul.mubr.bf16.vlgmr.msra.gmra.mrb[40].mxu0 %v4450_v46  ;;  %1597 = vmatmul.mubr.bf16.vlgmr.msra.gmra.mrb[40].mxu1 %v4450_v46  ;;  %v5949_v46 = vld [vmem:[#allocation47_spill] sm:$0xff] }
 0x39b   :  { %1655 = vmatpush1.bf16.msra.mxu0 %v5940_v0  ;;  %1696 = vmatpush1.bf16.msra.mxu1 %v5941_v25 }
 0x39c   :  { %1656 = vmatprep.subr.bf16.mxu0 %v5942_v58  ;;  %1697 = vmatprep.subr.bf16.mxu1 %v5943_v59 }
 0x39d   :  { %1686 = vmatprep.mubr.bf16.mxu0 %v5944_v3  ;;  %1727 = vmatprep.mubr.bf16.mxu1 %v5944_v3 }
 0x39f   :  { %1657 = vmatpush1.bf16.msra.mxu0 %v5945_v49  ;;  %1698 = vmatpush1.bf16.msra.mxu1 %v5946_v32 }
 0x3a0   :  { %1658 = vmatprep.subr.bf16.mxu0 %v5947_v51  ;;  %1699 = vmatprep.subr.bf16.mxu1 %v5948_v50 }
 0x3a3   :  { %1659 = vmatpush1.bf16.msra.mxu0 %v5949_v46  ;;  %1700 = vmatpush1.bf16.msra.mxu1 %v5950_v52 }
 0x3a4   :  { %1660 = vmatprep.subr.bf16.mxu0 %v5951_v53  ;;  %1701 = vmatprep.subr.bf16.mxu1 %v5952_v55 }
 0x3a7   :  { %1661 = vmatpush1.bf16.msra.mxu0 %v5953_v45  ;;  %1702 = vmatpush1.bf16.msra.mxu1 %v5954_v35 }
 0x3a8   :  { %1662 = vmatprep.subr.bf16.mxu0 %v5955_v14  ;;  %1703 = vmatprep.subr.bf16.mxu1 %v5956_v7 }
 0x3ab   :  { %1663 = vmatpush1.bf16.msra.mxu0 %v5957_v8  ;;  %1704 = vmatpush1.bf16.msra.mxu1 %v5958_v19 }
 0x3ac   :  { %1664 = vmatprep.subr.bf16.mxu0 %v5959_v20  ;;  %1705 = vmatprep.subr.bf16.mxu1 %v5960_v22 }
 0x3af   :  { %1665 = vmatpush1.bf16.msra.mxu0 %v5961_v23  ;;  %1706 = vmatpush1.bf16.msra.mxu1 %v5962_v27 }
 0x3b0   :  { %1666 = vmatprep.subr.bf16.mxu0 %v5963_v28  ;;  %1707 = vmatprep.subr.bf16.mxu1 %v5964_v31 }
 0x3b3   :  { %1667 = vmatpush1.bf16.msra.mxu0 %v5965_v33  ;;  %1708 = vmatpush1.bf16.msra.mxu1 %v5966_v36 }
 0x3b4   :  { %1668 = vmatprep.subr.bf16.mxu0 %v5967_v37  ;;  %1709 = vmatprep.subr.bf16.mxu1 %v5968_v60 }
 0x3b7   :  { %1669 = vmatpush1.bf16.msra.mxu0 %v5969_v1  ;;  %1710 = vmatpush1.bf16.msra.mxu1 %v5970_v40 }
 0x3b8   :  { %1741 = vmatprep.subr.bf16.mxu0 %v4560_v9  ;;  %1782 = vmatprep.subr.bf16.mxu1 %v4563_v12 }
 0x42b   :  { %v1470_v11 = vpop.f32.mrb[36].mxu0  ;;  %v1511_v18 = vpop.f32.mrb[36].mxu1 }
 0x42c   :  { %v1518_v39 = vadd.f32 %v1470_v11, %v5971_v21  ;;  %v1520_v41 = vadd.f32 %v1511_v18, %v5972_v13  ;;  %v1472_v17 = vpop.f32.mrb[37].mxu0  ;;  %v1513_v15 = vpop.f32.mrb[37].mxu1 }
 0x42d   :  { %v1519_v24 = vadd.f32 %v1472_v17, %v5973_v5  ;;  %v1521_v34 = vadd.f32 %v1513_v15, %v5974_v29  ;;  %v1474_v6 = vpop.f32.mrb[38].mxu0  ;;  %v1515_v44 = vpop.f32.mrb[38].mxu1 }
 0x42e   :  { %v2893_v57 = vmul.f32 -1.442695, %v1518_v39  ;;  %v1475_v10 = vpop.f32.mrb[39].mxu0  ;;  %v1516_v47 = vpop.f32.mrb[39].mxu1  ;;  %v2895_v61 = vmul.f32 -1.442695, %v1520_v41 }
 0x42f   :  { %v2894_v54 = vmul.f32 -1.442695, %v1519_v24  ;;  %v4578_v6 = vld [vmem:[#allocation5] ss:$16 sps:$4 sm:$0xff]   ;;  %v4581_v44 = vld [vmem:[#allocation5 + $0x8] ss:$16 sps:$4 sm:$0xff]  }
 0x430   :  { %3211 = vpow2.f32 %v2893_v57  ;;  %v4587_v57 = vld [vmem:[#allocation5 + $0x2c] ss:$16 sps:$4 sm:$0xff]   ;;  %v4590_v10 = vld [vmem:[#allocation5 + $0x20] ss:$16 sps:$4 sm:$0xff]   ;;  %v4593_v47 = vld [vmem:[#allocation5 + $0x28] ss:$16 sps:$4 sm:$0xff]  }
 0x431   :  { %3213 = vpow2.f32 %v2894_v54  ;;  %v4596_v54 = vld [vmem:[#allocation5 + $0x44] ss:$16 sps:$4 sm:$0xff]  }
 0x432   :  { %3215 = vtanh.f32 %v1521_v34 }
 0x433   :  { %3217 = vpow2.f32 %v2895_v61  ;;  %v4599_v61 = vld [vmem:[#allocation5 + $0x4c] ss:$16 sps:$4 sm:$0xff]  }
 0x43a   :  { %v3212_v48 = vpop.eup %3211 }
 0x43b   :  { %v1638_v4 = vadd.f32 1.0, %v3212_v48  ;;  %v3214_v63 = vpop.eup %3213  ;;  %v4602_v48 = vld [vmem:[#allocation5 + $0x40] ss:$16 sps:$4 sm:$0xff]  }
 0x43c   :  { %v1639_v16 = vadd.f32 1.0, %v3214_v63  ;;  %v3216_v11 = vpop.eup %3215  ;;  %5975 = vst [vmem:[#allocation11_spill] sm:$0xff] %v4602_v48  ;;  %v4608_v63 = vld [vmem:[#allocation5 + $0x64] ss:$16 sps:$4 sm:$0xff]  }
 0x43d   :  { %3219 = vrcp.f32 %v1638_v4  ;;  %v3218_v18 = vpop.eup %3217  ;;  %v4605_v4 = vld [vmem:[#allocation5 + $0x48] ss:$16 sps:$4 sm:$0xff]   ;;  %5977 = vst [vmem:[#allocation13_spill] sm:$0xff] %v4608_v63 }
 0x43e   :  { %3221 = vrcp.f32 %v1639_v16  ;;  %v1640_v39 = vadd.f32 1.0, %v3218_v18  ;;  %5976 = vst [vmem:[#allocation12_spill] sm:$0xff] %v4605_v4  ;;  %v4611_v16 = vld [vmem:[#allocation5 + $0x6c] ss:$16 sps:$4 sm:$0xff]   ;;  %v4617_v18 = vld [vmem:[#allocation5 + $0x68] ss:$16 sps:$4 sm:$0xff]  }
 0x43f   :  { %5978 = vst [vmem:[#allocation14_spill] sm:$0xff] %v4611_v16  ;;  %5980 = vst [vmem:[#allocation54_spill] sm:$0xff] %v4617_v18 }
 0x440   :  { %3223 = vrcp.f32 %v1640_v39 }
 0x447   :  { %v3220_v21 = vpop.eup %3219 }
 0x448   :  { %v1649_v13 = vmul.f32 %v3220_v21, %v3216_v11  ;;  %v3222_v17 = vpop.eup %3221  ;;  %v4614_v11 = vld [vmem:[#allocation5 + $0x60] ss:$16 sps:$4 sm:$0xff]   ;;  %v4620_v21 = vld [vmem:[#allocation5 + $0x84] ss:$16 sps:$4 sm:$0xff]  }
 0x449   :  { %v1648_v15 = vmul.f32 %v3222_v17, %v4447_v56  ;;  %v4584_v56 = vld [vmem:[#allocation5 + $0x24] ss:$16 sps:$4 sm:$0xff]   ;;  %5979 = vst [vmem:[#allocation53_spill] sm:$0xff] %v4614_v11  ;;  %5981 = vst [vmem:[#allocation55_spill] sm:$0xff] %v4620_v21 }
 0x44a   :  { %v3224_v41 = vpop.eup %3223 }
 0x44b   :  { %v4571_v5 = vadd.f32 %v1649_v13, %v1648_v15  ;;  %v4623_v13 = vld [vmem:[#allocation5 + $0x8c] ss:$16 sps:$4 sm:$0xff]  }
 0x44c   :  { %5982 = vst [vmem:[#allocation56_spill] sm:$0xff] %v4623_v13 }
 0x44d   :  { %3225 = vtanh.f32 %v4571_v5 }
 0x457   :  { %v3226_v24 = vpop.eup %3225 }
 0x458   :  { %v1652_v29 = vmul.f32 %v3226_v24, %v3224_v41 }
 0x45a   :  { %v4574_v34 = vpack.c.bf16 %v1652_v29, %v1652_v29  ;;  %v4627_v29 = vld [vmem:[#allocation5 + $0x80] ss:$16 sps:$4 sm:$0xff]  }
 0x45b   :  { %5983 = vst [vmem:[#allocation57_spill] sm:$0xff] %v4627_v29 }
 0x45c   :  { %1687 = vmatmul.mubr.bf16.vlgmr.msra.gmra.mrb[44].mxu0 %v4574_v34  ;;  %1728 = vmatmul.mubr.bf16.vlgmr.msra.gmra.mrb[44].mxu1 %v4574_v34 }
 0x45d   :  { %1742 = vmatpush1.bf16.msra.mxu0 %v4578_v6  ;;  %1783 = vmatpush1.bf16.msra.mxu1 %v4581_v44 }
 0x45e   :  { %1743 = vmatprep.subr.bf16.mxu0 %v4584_v56  ;;  %1784 = vmatprep.subr.bf16.mxu1 %v4587_v57 }
 0x461   :  { %1744 = vmatpush1.bf16.msra.mxu0 %v4590_v10  ;;  %1785 = vmatpush1.bf16.msra.mxu1 %v4593_v47 }
 0x462   :  { %1745 = vmatprep.subr.bf16.mxu0 %v4596_v54  ;;  %1786 = vmatprep.subr.bf16.mxu1 %v4599_v61 }
 0x465   :  { %1746 = vmatpush1.bf16.msra.mxu0 %v4602_v48  ;;  %1787 = vmatpush1.bf16.msra.mxu1 %v4605_v4  ;;  %v4640_v48 = vld [vmem:[#allocation5 + $0xa0] ss:$16 sps:$4 sm:$0xff]  }
 0x466   :  { %1747 = vmatprep.subr.bf16.mxu0 %v4608_v63  ;;  %1788 = vmatprep.subr.bf16.mxu1 %v4611_v16  ;;  %v4634_v63 = vld [vmem:[#allocation5 + $0xa4] ss:$16 sps:$4 sm:$0xff]  }
 0x469   :  { %1748 = vmatpush1.bf16.msra.mxu0 %v4614_v11  ;;  %1789 = vmatpush1.bf16.msra.mxu1 %v4617_v18  ;;  %v4630_v11 = vld [vmem:[#allocation5 + $0x88] ss:$16 sps:$4 sm:$0xff]  }
 0x46a   :  { %1749 = vmatprep.subr.bf16.mxu0 %v4620_v21  ;;  %1790 = vmatprep.subr.bf16.mxu1 %v4623_v13  ;;  %v4637_v13 = vld [vmem:[#allocation5 + $0xac] ss:$16 sps:$4 sm:$0xff]  }
 0x46d   :  { %v1557_v17 = vpop.f32.mrb[40].mxu0  ;;  %v1598_v39 = vpop.f32.mrb[40].mxu1  ;;  %1750 = vmatpush1.bf16.msra.mxu0 %v4627_v29  ;;  %1791 = vmatpush1.bf16.msra.mxu1 %v4630_v11 }
 0x46e   :  { %v1558_v15 = vadd.f32 %v1557_v17, %v4269_v62  ;;  %v1559_v41 = vpop.f32.mrb[41].mxu0  ;;  %v1600_v24 = vpop.f32.mrb[41].mxu1  ;;  %1751 = vmatprep.subr.bf16.mxu0 %v4634_v63  ;;  %1792 = vmatprep.subr.bf16.mxu1 %v4637_v13 }
 0x46f   :  { %v1560_v21 = vadd.f32 %v1559_v41, %v4273_v2  ;;  %v1561_v18 = vpop.f32.mrb[42].mxu0  ;;  %v1602_v16 = vpop.f32.mrb[42].mxu1  ;;  %v4643_v41 = vld [vmem:[#allocation5 + $0xa8] ss:$16 sps:$4 sm:$0xff]  }
 0x470   :  { %v2890_v17 = vmul.f32 -1.442695, %v1558_v15  ;;  %v1562_v62 = vpop.f32.mrb[43].mxu0  ;;  %v1603_v4 = vpop.f32.mrb[43].mxu1  ;;  %v4646_v16 = vld [vmem:[#allocation5 + $0xc4] ss:$16 sps:$4 sm:$0xff]  }
 0x471   :  { %v2891_v29 = vmul.f32 -1.442695, %v1560_v21  ;;  %1752 = vmatpush1.bf16.msra.mxu0 %v4640_v48  ;;  %1793 = vmatpush1.bf16.msra.mxu1 %v4643_v41  ;;  %v4649_v18 = vld [vmem:[#allocation5 + $0xcc] ss:$16 sps:$4 sm:$0xff]   ;;  %v1599_v62 = vadd.f32 %v1598_v39, %v4287_v26  ;;  %v4653_v4 = vld [vmem:[#allocation5 + $0xc0] ss:$16 sps:$4 sm:$0xff]  }
 0x472   :  { %3227 = vpow2.f32 %v2890_v17  ;;  %1753 = vmatprep.subr.bf16.mxu0 %v4646_v16  ;;  %5984 = vst [vmem:[#allocation58_spill] sm:$0xff] %v4649_v18  ;;  %1794 = vmatprep.subr.bf16.mxu1 %v4649_v18  ;;  %5985 = vst [vmem:[#allocation59_spill] sm:$0xff] %v4653_v4  ;;  %v4656_v21 = vld [vmem:[#allocation5 + $0xc8] ss:$16 sps:$4 sm:$0xff]   ;;  %v4659_v15 = vld [vmem:[#allocation5 + $0xe4] ss:$16 sps:$4 sm:$0xff]  }
 0x473   :  { %3229 = vpow2.f32 %v2891_v29  ;;  %5986 = vst [vmem:[#allocation60_spill] sm:$0xff] %v4656_v21  ;;  %5987 = vst [vmem:[#allocation61_spill] sm:$0xff] %v4659_v15  ;;  %v4662_v17 = vld [vmem:[#allocation5 + $0xec] ss:$16 sps:$4 sm:$0xff]   ;;  %v1601_v29 = vadd.f32 %v1600_v24, %v4293_v30  ;;  %v2892_v18 = vmul.f32 -1.442695, %v1599_v62 }
 0x474   :  { %5988 = vst [vmem:[#allocation62_spill] sm:$0xff] %v4662_v17  ;;  %v4666_v39 = vld [vmem:[#allocation5 + $0xe0] ss:$16 sps:$4 sm:$0xff]   ;;  %v4669_v26 = vld [vmem:[#allocation5 + $0xe8] ss:$16 sps:$4 sm:$0xff]  }
 0x475   :  { %1754 = vmatpush1.bf16.msra.mxu0 %v4653_v4  ;;  %1795 = vmatpush1.bf16.msra.mxu1 %v4656_v21  ;;  %5989 = vst [vmem:[#allocation63_spill] sm:$0xff] %v4666_v39  ;;  %5990 = vst [vmem:[#allocation64_spill] sm:$0xff] %v4669_v26  ;;  %v4672_v21 = vld [vmem:[#allocation5 + $0x104] ss:$16 sps:$4 sm:$0xff]   ;;  %3231 = vtanh.f32 %v1601_v29  ;;  %v4678_v62 = vld [vmem:[#allocation5 + $0x100] ss:$16 sps:$4 sm:$0xff]  }
 0x476   :  { %1755 = vmatprep.subr.bf16.mxu0 %v4659_v15  ;;  %1796 = vmatprep.subr.bf16.mxu1 %v4662_v17  ;;  %5991 = vst [vmem:[#allocation71_spill] sm:$0xff] %v4672_v21  ;;  %v4675_v15 = vld [vmem:[#allocation5 + $0x10c] ss:$16 sps:$4 sm:$0xff]   ;;  %3233 = vpow2.f32 %v2892_v18  ;;  %5993 = vst [vmem:[#allocation73_spill] sm:$0xff] %v4678_v62  ;;  %v4690_v18 = vld [vmem:[#allocation5 + $0x120] ss:$16 sps:$4 sm:$0xff]  }
 0x477   :  { %5992 = vst [vmem:[#allocation72_spill] sm:$0xff] %v4675_v15  ;;  %5997 = vst [vmem:[#allocation77_spill] sm:$0xff] %v4690_v18  ;;  %v4696_v29 = vld [vmem:[#allocation5 + $0x144] ss:$16 sps:$4 sm:$0xff]  }
 0x478   :  { %5999 = vst [vmem:[#allocation79_spill] sm:$0xff] %v4696_v29  ;;  %v4720_v30 = vld [vmem:[#allocation5 + $0x184] ss:$16 sps:$4 sm:$0xff]  }
 0x479   :  { %1756 = vmatpush1.bf16.msra.mxu0 %v4666_v39  ;;  %1797 = vmatpush1.bf16.msra.mxu1 %v4669_v26  ;;  %v4681_v39 = vld [vmem:[#allocation5 + $0x108] ss:$16 sps:$4 sm:$0xff]   ;;  %6006 = vst [vmem:[#allocation39_spill] sm:$0xff] %v4720_v30 }
 0x47a   :  { %1757 = vmatprep.subr.bf16.mxu0 %v4672_v21  ;;  %1798 = vmatprep.subr.bf16.mxu1 %v4675_v15  ;;  %5994 = vst [vmem:[#allocation74_spill] sm:$0xff] %v4681_v39  ;;  %v4684_v21 = vld [vmem:[#allocation5 + $0x124] ss:$16 sps:$4 sm:$0xff]   ;;  %v4687_v15 = vld [vmem:[#allocation5 + $0x12c] ss:$16 sps:$4 sm:$0xff]  }
 0x47b   :  { %5995 = vst [vmem:[#allocation75_spill] sm:$0xff] %v4684_v21  ;;  %5996 = vst [vmem:[#allocation76_spill] sm:$0xff] %v4687_v15 }
 0x47c   :  { %v3228_v17 = vpop.eup %3227 }
 0x47d   :  { %v1614_v4 = vadd.f32 1.0, %v3228_v17  ;;  %v3230_v24 = vpop.eup %3229  ;;  %1758 = vmatpush1.bf16.msra.mxu0 %v4678_v62  ;;  %1799 = vmatpush1.bf16.msra.mxu1 %v4681_v39  ;;  %v4693_v17 = vld [vmem:[#allocation5 + $0x128] ss:$16 sps:$4 sm:$0xff]   ;;  %v4714_v39 = vld [vmem:[#allocation5 + $0x160] ss:$16 sps:$4 sm:$0xff]  }
 0x47e   :  { %v1615_v26 = vadd.f32 1.0, %v3230_v24  ;;  %1759 = vmatprep.subr.bf16.mxu0 %v4684_v21  ;;  %1800 = vmatprep.subr.bf16.mxu1 %v4687_v15  ;;  %5998 = vst [vmem:[#allocation78_spill] sm:$0xff] %v4693_v17  ;;  %v4702_v24 = vld [vmem:[#allocation5 + $0x140] ss:$16 sps:$4 sm:$0xff]   ;;  %v4708_v15 = vld [vmem:[#allocation5 + $0x164] ss:$16 sps:$4 sm:$0xff]  }
 0x47f   :  { %3235 = vrcp.f32 %v1614_v4  ;;  %v4699_v4 = vld [vmem:[#allocation5 + $0x14c] ss:$16 sps:$4 sm:$0xff]   ;;  %6001 = vst [vmem:[#allocation81_spill] sm:$0xff] %v4702_v24  ;;  %6003 = vst [vmem:[#allocation83_spill] sm:$0xff] %v4708_v15 }
 0x480   :  { %3237 = vrcp.f32 %v1615_v26  ;;  %6000 = vst [vmem:[#allocation80_spill] sm:$0xff] %v4699_v4  ;;  %v4705_v26 = vld [vmem:[#allocation5 + $0x148] ss:$16 sps:$4 sm:$0xff]   ;;  %6005 = vst [vmem:[#allocation38_spill] sm:$0xff] %v4714_v39 }
 0x481   :  { %1760 = vmatpush1.bf16.msra.mxu0 %v4690_v18  ;;  %1801 = vmatpush1.bf16.msra.mxu1 %v4693_v17  ;;  %6002 = vst [vmem:[#allocation82_spill] sm:$0xff] %v4705_v26  ;;  %v3232_v18 = vpop.eup %3231  ;;  %v4711_v17 = vld [vmem:[#allocation5 + $0x16c] ss:$16 sps:$4 sm:$0xff]  }
 0x482   :  { %1761 = vmatprep.subr.bf16.mxu0 %v4696_v29  ;;  %1802 = vmatprep.subr.bf16.mxu1 %v4699_v4  ;;  %6004 = vst [vmem:[#allocation37_spill] sm:$0xff] %v4711_v17  ;;  %v3234_v29 = vpop.eup %3233 }
 0x483   :  { %v1616_v62 = vadd.f32 1.0, %v3234_v29  ;;  %v4735_v29 = vld [vmem:[#allocation5 + $0x1a4] ss:$16 sps:$4 sm:$0xff]  }
 0x484   :  { %6009 = vst [vmem:[#allocation42_spill] sm:$0xff] %v4735_v29 }
 0x485   :  { %1762 = vmatpush1.bf16.msra.mxu0 %v4702_v24  ;;  %1803 = vmatpush1.bf16.msra.mxu1 %v4705_v26  ;;  %v4717_v24 = vld [vmem:[#allocation5 + $0x168] ss:$16 sps:$4 sm:$0xff]   ;;  %3239 = vrcp.f32 %v1616_v62  ;;  %v4751_v62 = vld [vmem:[#allocation5 + $0x1cc] ss:$16 sps:$4 sm:$0xff]  }
 0x486   :  { %1763 = vmatprep.subr.bf16.mxu0 %v4708_v15  ;;  %1804 = vmatprep.subr.bf16.mxu1 %v4711_v17  ;;  %v4723_v15 = vld [vmem:[#allocation5 + $0x18c] ss:$16 sps:$4 sm:$0xff]   ;;  %v4729_v17 = vld [vmem:[#allocation5 + $0x180] ss:$16 sps:$4 sm:$0xff]   ;;  %6014 = vst [vmem:[#allocation47_spill] sm:$0xff] %v4751_v62 }
 0x487   :  { %6007 = vst [vmem:[#allocation40_spill] sm:$0xff] %v4729_v17 }
 0x489   :  { %v3236_v21 = vpop.eup %3235  ;;  %1764 = vmatpush1.bf16.msra.mxu0 %v4714_v39  ;;  %1805 = vmatpush1.bf16.msra.mxu1 %v4717_v24  ;;  %v4732_v39 = vld [vmem:[#allocation5 + $0x188] ss:$16 sps:$4 sm:$0xff]  }
 0x48a   :  { %v1625_v4 = vmul.f32 %v3236_v21, %v3232_v18  ;;  %v3238_v26 = vpop.eup %3237  ;;  %1765 = vmatprep.subr.bf16.mxu0 %v4720_v30  ;;  %1806 = vmatprep.subr.bf16.mxu1 %v4723_v15  ;;  %6008 = vst [vmem:[#allocation41_spill] sm:$0xff] %v4732_v39  ;;  %v4738_v30 = vld [vmem:[#allocation5 + $0x1ac] ss:$16 sps:$4 sm:$0xff]  }
 0x48b   :  { %v1624_v21 = vmul.f32 %v3238_v26, %v4507_v42  ;;  %6010 = vst [vmem:[#allocation43_spill] sm:$0xff] %v4738_v30  ;;  %v4742_v42 = vld [vmem:[#allocation5 + $0x1a0] ss:$16 sps:$4 sm:$0xff]   ;;  %v4748_v26 = vld [vmem:[#allocation5 + $0x1c4] ss:$16 sps:$4 sm:$0xff]  }
 0x48c   :  { %6011 = vst [vmem:[#allocation44_spill] sm:$0xff] %v4742_v42  ;;  %6013 = vst [vmem:[#allocation46_spill] sm:$0xff] %v4748_v26 }
 0x48d   :  { %v4727_v18 = vadd.f32 %v1625_v4, %v1624_v21  ;;  %1766 = vmatpush1.bf16.msra.mxu0 %v4729_v17  ;;  %1807 = vmatpush1.bf16.msra.mxu1 %v4732_v39  ;;  %v4745_v4 = vld [vmem:[#allocation5 + $0x1a8] ss:$16 sps:$4 sm:$0xff]   ;;  %v4754_v21 = vld [vmem:[#allocation5 + $0x1c0] ss:$16 sps:$4 sm:$0xff]  }
 0x48e   :  { %1767 = vmatprep.subr.bf16.mxu0 %v4735_v29  ;;  %1808 = vmatprep.subr.bf16.mxu1 %v4738_v30  ;;  %6012 = vst [vmem:[#allocation45_spill] sm:$0xff] %v4745_v4  ;;  %6015 = vst [vmem:[#allocation48_spill] sm:$0xff] %v4754_v21  ;;  %v4757_v30 = vld [vmem:[#allocation5 + $0x1c8] ss:$16 sps:$4 sm:$0xff]   ;;  %v4766_v39 = vld [vmem:[#allocation5 + $0x1e0] ss:$16 sps:$4 sm:$0xff]  }
 0x48f   :  { %3241 = vtanh.f32 %v4727_v18  ;;  %6016 = vst [vmem:[#allocation49_spill] sm:$0xff] %v4757_v30  ;;  %6019 = vst [vmem:[#allocation52_spill] sm:$0xff] %v4766_v39 }
 0x491   :  { %1768 = vmatpush1.bf16.msra.mxu0 %v4742_v42  ;;  %1809 = vmatpush1.bf16.msra.mxu1 %v4745_v4  ;;  %v4760_v42 = vld [vmem:[#allocation5 + $0x1e4] ss:$16 sps:$4 sm:$0xff]   ;;  %v4763_v4 = vld [vmem:[#allocation5 + $0x1ec] ss:$16 sps:$4 sm:$0xff]  }
 0x492   :  { %1769 = vmatprep.subr.bf16.mxu0 %v4748_v26  ;;  %1810 = vmatprep.subr.bf16.mxu1 %v4751_v62  ;;  %6017 = vst [vmem:[#allocation50_spill] sm:$0xff] %v4760_v42  ;;  %6018 = vst [vmem:[#allocation51_spill] sm:$0xff] %v4763_v4  ;;  %v3240_v26 = vpop.eup %3239  ;;  %v4769_v62 = vld [vmem:[#allocation5 + $0x1e8] ss:$16 sps:$4 sm:$0xff]  }
 0x493   :  { %6020 = vst [vmem:[#allocation65_spill] sm:$0xff] %v4769_v62 }
 0x495   :  { %1770 = vmatpush1.bf16.msra.mxu0 %v4754_v21  ;;  %1811 = vmatpush1.bf16.msra.mxu1 %v4757_v30 }
 0x496   :  { %1771 = vmatprep.subr.bf16.mxu0 %v4760_v42  ;;  %1812 = vmatprep.subr.bf16.mxu1 %v4763_v4 }
 0x499   :  { %v3242_v29 = vpop.eup %3241  ;;  %1772 = vmatpush1.bf16.msra.mxu0 %v4766_v39  ;;  %1813 = vmatpush1.bf16.msra.mxu1 %v4769_v62 }
 0x49a   :  { %v1628_v21 = vmul.f32 %v3242_v29, %v3240_v26  ;;  %1872 = vmatprep.subr.bf16.mxu0 %v5938_v43  ;;  %1913 = vmatprep.subr.bf16.mxu1 %v5939_v38  ;;  %v6026_v26 = vld [vmem:[#allocation12_spill] sm:$0xff] }
 0x49c   :  { %v1740_v42 = vpack.c.bf16 %v1628_v21, %v1628_v21  ;;  %v6027_v21 = vld [vmem:[#allocation13_spill] sm:$0xff] }
 0x49e   :  { %1773 = vmatprep.mubr.bf16.mxu0 %v1740_v42  ;;  %1814 = vmatprep.mubr.bf16.mxu1 %v1740_v42 }
 0x49f   :  { %1774 = vmatmul.mubr.bf16.vlgmr.msra.gmra.mrb[48].mxu0 %v4574_v34  ;;  %1815 = vmatmul.mubr.bf16.vlgmr.msra.gmra.mrb[48].mxu1 %v4574_v34 }
 0x4a0   :  { %1873 = vmatpush1.bf16.msra.mxu0 %v5940_v0  ;;  %1914 = vmatpush1.bf16.msra.mxu1 %v5941_v25  ;;  %v6021_v0 = vld [vmem:[#allocation19_spill] sm:$0xff] }
 0x4a1   :  { %1874 = vmatprep.subr.bf16.mxu0 %v5942_v58  ;;  %1915 = vmatprep.subr.bf16.mxu1 %v5943_v59  ;;  %v6022_v58 = vld [vmem:[#allocation20_spill] sm:$0xff] }
 0x4a2   :  { %1904 = vmatprep.mubr.bf16.mxu0 %v5944_v3  ;;  %1945 = vmatprep.mubr.bf16.mxu1 %v5944_v3 }
 0x4a4   :  { %1875 = vmatpush1.bf16.msra.mxu0 %v5945_v49  ;;  %1916 = vmatpush1.bf16.msra.mxu1 %v5946_v32 }
 0x4a5   :  { %1876 = vmatprep.subr.bf16.mxu0 %v5947_v51  ;;  %1917 = vmatprep.subr.bf16.mxu1 %v5948_v50  ;;  %v6023_v51 = vld [vmem:[#allocation21_spill] sm:$0xff] }
 0x4a8   :  { %1877 = vmatpush1.bf16.msra.mxu0 %v5949_v46  ;;  %1918 = vmatpush1.bf16.msra.mxu1 %v5950_v52  ;;  %v6024_v46 = vld [vmem:[#allocation22_spill] sm:$0xff] }
 0x4a9   :  { %1878 = vmatprep.subr.bf16.mxu0 %v5951_v53  ;;  %1919 = vmatprep.subr.bf16.mxu1 %v5952_v55 }
 0x4ac   :  { %1879 = vmatpush1.bf16.msra.mxu0 %v5953_v45  ;;  %1920 = vmatpush1.bf16.msra.mxu1 %v5954_v35 }
 0x4ad   :  { %1880 = vmatprep.subr.bf16.mxu0 %v5955_v14  ;;  %1921 = vmatprep.subr.bf16.mxu1 %v5956_v7 }
 0x4b0   :  { %1881 = vmatpush1.bf16.msra.mxu0 %v5957_v8  ;;  %1922 = vmatpush1.bf16.msra.mxu1 %v5958_v19 }
 0x4b1   :  { %1882 = vmatprep.subr.bf16.mxu0 %v5959_v20  ;;  %1923 = vmatprep.subr.bf16.mxu1 %v5960_v22 }
 0x4b4   :  { %1883 = vmatpush1.bf16.msra.mxu0 %v5961_v23  ;;  %1924 = vmatpush1.bf16.msra.mxu1 %v5962_v27 }
 0x4b5   :  { %1884 = vmatprep.subr.bf16.mxu0 %v5963_v28  ;;  %1925 = vmatprep.subr.bf16.mxu1 %v5964_v31 }
 0x4b8   :  { %1885 = vmatpush1.bf16.msra.mxu0 %v5965_v33  ;;  %1926 = vmatpush1.bf16.msra.mxu1 %v5966_v36 }
 0x4b9   :  { %1886 = vmatprep.subr.bf16.mxu0 %v5967_v37  ;;  %1927 = vmatprep.subr.bf16.mxu1 %v5968_v60 }
 0x4bc   :  { %1887 = vmatpush1.bf16.msra.mxu0 %v5969_v1  ;;  %1928 = vmatpush1.bf16.msra.mxu1 %v5970_v40 }
 0x4bd   :  { %1959 = vmatprep.subr.bf16.mxu0 %v4560_v9  ;;  %2000 = vmatprep.subr.bf16.mxu1 %v4563_v12 }
 0x52f   :  { %v1688_v43 = vpop.f32.mrb[44].mxu0  ;;  %v1729_v38 = vpop.f32.mrb[44].mxu1 }
 0x530   :  { %v1736_v25 = vadd.f32 %v1688_v43, %v6021_v0  ;;  %v1738_v59 = vadd.f32 %v1729_v38, %v6022_v58  ;;  %v1690_v49 = vpop.f32.mrb[45].mxu0  ;;  %v1731_v32 = vpop.f32.mrb[45].mxu1  ;;  %v6028_v43 = vld [vmem:[#allocation14_spill] sm:$0xff]  ;;  %v6029_v38 = vld [vmem:[#allocation53_spill] sm:$0xff]  ;;  %v6032_v58 = vld [vmem:[#allocation56_spill] sm:$0xff] }
 0x531   :  { %v1737_v50 = vadd.f32 %v1690_v49, %v6023_v51  ;;  %v1739_v52 = vadd.f32 %v1731_v32, %v6024_v46  ;;  %v1692_v53 = vpop.f32.mrb[46].mxu0  ;;  %v1733_v55 = vpop.f32.mrb[46].mxu1  ;;  %v6030_v0 = vld [vmem:[#allocation54_spill] sm:$0xff]  ;;  %v6033_v32 = vld [vmem:[#allocation57_spill] sm:$0xff]  ;;  %v6034_v51 = vld [vmem:[#allocation84_spill] sm:$0xff] }
 0x532   :  { %v2899_v45 = vmul.f32 -1.442695, %v1736_v25  ;;  %v1693_v35 = vpop.f32.mrb[47].mxu0  ;;  %v1734_v14 = vpop.f32.mrb[47].mxu1  ;;  %v2901_v8 = vmul.f32 -1.442695, %v1738_v59 }
 0x533   :  { %v2900_v7 = vmul.f32 -1.442695, %v1737_v50  ;;  %v6031_v25 = vld [vmem:[#allocation55_spill] sm:$0xff] }
 0x534   :  { %3243 = vpow2.f32 %v2899_v45 }
 0x535   :  { %3245 = vpow2.f32 %v2900_v7 }
 0x536   :  { %3247 = vtanh.f32 %v1739_v52 }
 0x537   :  { %3249 = vpow2.f32 %v2901_v8 }
 0x53e   :  { %v3244_v19 = vpop.eup %3243 }
 0x53f   :  { %v1856_v20 = vadd.f32 1.0, %v3244_v19  ;;  %v3246_v22 = vpop.eup %3245  ;;  %v6035_v19 = vld [vmem:[#allocation58_spill] sm:$0xff] }
 0x540   :  { %v1857_v23 = vadd.f32 1.0, %v3246_v22  ;;  %v3248_v27 = vpop.eup %3247  ;;  %v6037_v22 = vld [vmem:[#allocation60_spill] sm:$0xff] }
 0x541   :  { %3251 = vrcp.f32 %v1856_v20  ;;  %v3250_v28 = vpop.eup %3249  ;;  %v6036_v20 = vld [vmem:[#allocation59_spill] sm:$0xff] }
 0x542   :  { %3253 = vrcp.f32 %v1857_v23  ;;  %v1858_v37 = vadd.f32 1.0, %v3250_v28  ;;  %v6038_v23 = vld [vmem:[#allocation35_spill] sm:$0xff]  ;;  %v6039_v28 = vld [vmem:[#allocation61_spill] sm:$0xff] }
 0x544   :  { %3255 = vrcp.f32 %v1858_v37  ;;  %v6042_v37 = vld [vmem:[#allocation63_spill] sm:$0xff] }
 0x54b   :  { %v3252_v31 = vpop.eup %3251 }
 0x54c   :  { %v1867_v33 = vmul.f32 %v3252_v31, %v3248_v27  ;;  %v3254_v36 = vpop.eup %3253  ;;  %v6040_v31 = vld [vmem:[#allocation62_spill] sm:$0xff] }
 0x54d   :  { %v1866_v60 = vmul.f32 %v3254_v36, %v4571_v5  ;;  %v6025_v5 = vld [vmem:[#allocation11_spill] sm:$0xff] }
 0x54e   :  { %v3256_v40 = vpop.eup %3255 }
 0x54f   :  { %v4815_v1 = vadd.f32 %v1867_v33, %v1866_v60  ;;  %v6041_v33 = vld [vmem:[#allocation36_spill] sm:$0xff] }
 0x550   :  { %v6043_v60 = vld [vmem:[#allocation64_spill] sm:$0xff] }
 0x551   :  { %3257 = vtanh.f32 %v4815_v1 }
 0x55b   :  { %v3258_v34 = vpop.eup %3257 }
 0x55c   :  { %v1870_v29 = vmul.f32 %v3258_v34, %v3256_v40  ;;  %v6044_v34 = vld [vmem:[#allocation71_spill] sm:$0xff] }
 0x55e   :  { %v4818_v42 = vpack.c.bf16 %v1870_v29, %v1870_v29  ;;  %v6045_v29 = vld [vmem:[#allocation72_spill] sm:$0xff] }
 0x560   :  { %1905 = vmatmul.mubr.bf16.vlgmr.msra.gmra.mrb[52].mxu0 %v4818_v42  ;;  %1946 = vmatmul.mubr.bf16.vlgmr.msra.gmra.mrb[52].mxu1 %v4818_v42 }
 0x561   :  { %1960 = vmatpush1.bf16.msra.mxu0 %v4578_v6  ;;  %2001 = vmatpush1.bf16.msra.mxu1 %v4581_v44 }
 0x562   :  { %1961 = vmatprep.subr.bf16.mxu0 %v4584_v56  ;;  %2002 = vmatprep.subr.bf16.mxu1 %v4587_v57 }
 0x565   :  { %1962 = vmatpush1.bf16.msra.mxu0 %v4590_v10  ;;  %2003 = vmatpush1.bf16.msra.mxu1 %v4593_v47 }
 0x566   :  { %1963 = vmatprep.subr.bf16.mxu0 %v4596_v54  ;;  %2004 = vmatprep.subr.bf16.mxu1 %v4599_v61 }
 0x569   :  { %1964 = vmatpush1.bf16.msra.mxu0 %v6025_v5  ;;  %2005 = vmatpush1.bf16.msra.mxu1 %v6026_v26 }
 0x56a   :  { %1965 = vmatprep.subr.bf16.mxu0 %v6027_v21  ;;  %2006 = vmatprep.subr.bf16.mxu1 %v6028_v43 }
 0x56d   :  { %1966 = vmatpush1.bf16.msra.mxu0 %v6029_v38  ;;  %2007 = vmatpush1.bf16.msra.mxu1 %v6030_v0 }
 0x56e   :  { %1967 = vmatprep.subr.bf16.mxu0 %v6031_v25  ;;  %2008 = vmatprep.subr.bf16.mxu1 %v6032_v58 }
 0x571   :  { %1968 = vmatpush1.bf16.msra.mxu0 %v6033_v32  ;;  %2009 = vmatpush1.bf16.msra.mxu1 %v4630_v11 }
 0x572   :  { %v1775_v59 = vpop.f32.mrb[48].mxu0  ;;  %v1816_v49 = vpop.f32.mrb[48].mxu1  ;;  %1969 = vmatprep.subr.bf16.mxu0 %v4634_v63  ;;  %2010 = vmatprep.subr.bf16.mxu1 %v4637_v13 }
 0x573   :  { %v1776_v50 = vadd.f32 %v1775_v59, %v6034_v51  ;;  %v1777_v46 = vpop.f32.mrb[49].mxu0  ;;  %v1818_v52 = vpop.f32.mrb[49].mxu1  ;;  %v1817_v27 = vadd.f32 %v1816_v49, %v6038_v23  ;;  %v6047_v49 = vld [vmem:[#allocation74_spill] sm:$0xff] }
 0x574   :  { %v1778_v53 = vadd.f32 %v1777_v46, %v4273_v2  ;;  %v1779_v55 = vpop.f32.mrb[50].mxu0  ;;  %v1820_v45 = vpop.f32.mrb[50].mxu1  ;;  %v1819_v36 = vadd.f32 %v1818_v52, %v6041_v33  ;;  %v6046_v46 = vld [vmem:[#allocation73_spill] sm:$0xff]  ;;  %v6049_v52 = vld [vmem:[#allocation76_spill] sm:$0xff] }
 0x575   :  { %v2896_v35 = vmul.f32 -1.442695, %v1776_v50  ;;  %v1780_v14 = vpop.f32.mrb[51].mxu0  ;;  %v1821_v7 = vpop.f32.mrb[51].mxu1  ;;  %1970 = vmatpush1.bf16.msra.mxu0 %v4640_v48  ;;  %2011 = vmatpush1.bf16.msra.mxu1 %v4643_v41  ;;  %v2898_v40 = vmul.f32 -1.442695, %v1817_v27 }
 0x576   :  { %v2897_v8 = vmul.f32 -1.442695, %v1778_v53  ;;  %1971 = vmatprep.subr.bf16.mxu0 %v4646_v16  ;;  %2012 = vmatprep.subr.bf16.mxu1 %v6035_v19  ;;  %v6048_v55 = vld [vmem:[#allocation75_spill] sm:$0xff]  ;;  %v6051_v14 = vld [vmem:[#allocation78_spill] sm:$0xff]  ;;  %v6054_v27 = vld [vmem:[#allocation81_spill] sm:$0xff] }
 0x577   :  { %3259 = vpow2.f32 %v2896_v35  ;;  %v6050_v35 = vld [vmem:[#allocation77_spill] sm:$0xff]  ;;  %v6052_v7 = vld [vmem:[#allocation79_spill] sm:$0xff] }
 0x578   :  { %3261 = vpow2.f32 %v2897_v8  ;;  %v6053_v8 = vld [vmem:[#allocation80_spill] sm:$0xff] }
 0x579   :  { %1972 = vmatpush1.bf16.msra.mxu0 %v6036_v20  ;;  %2013 = vmatpush1.bf16.msra.mxu1 %v6037_v22  ;;  %3263 = vtanh.f32 %v1819_v36  ;;  %v6055_v36 = vld [vmem:[#allocation82_spill] sm:$0xff] }
 0x57a   :  { %1973 = vmatprep.subr.bf16.mxu0 %v6039_v28  ;;  %2014 = vmatprep.subr.bf16.mxu1 %v6040_v31  ;;  %3265 = vpow2.f32 %v2898_v40  ;;  %v6056_v40 = vld [vmem:[#allocation83_spill] sm:$0xff] }
 0x57d   :  { %1974 = vmatpush1.bf16.msra.mxu0 %v6042_v37  ;;  %2015 = vmatpush1.bf16.msra.mxu1 %v6043_v60 }
 0x57e   :  { %1975 = vmatprep.subr.bf16.mxu0 %v6044_v34  ;;  %2016 = vmatprep.subr.bf16.mxu1 %v6045_v29 }
 0x581   :  { %v3260_v59 = vpop.eup %3259  ;;  %1976 = vmatpush1.bf16.msra.mxu0 %v6046_v46  ;;  %2017 = vmatpush1.bf16.msra.mxu1 %v6047_v49 }
 0x582   :  { %v1832_v50 = vadd.f32 1.0, %v3260_v59  ;;  %v3262_v53 = vpop.eup %3261  ;;  %1977 = vmatprep.subr.bf16.mxu0 %v6048_v55  ;;  %2018 = vmatprep.subr.bf16.mxu1 %v6049_v52  ;;  %v6057_v59 = vld [vmem:[#allocation37_spill] sm:$0xff] }
 0x583   :  { %v1833_v45 = vadd.f32 1.0, %v3262_v53  ;;  %v3264_v52 = vpop.eup %3263 }
 0x584   :  { %3267 = vrcp.f32 %v1832_v50  ;;  %v3266_v50 = vpop.eup %3265 }
 0x585   :  { %3269 = vrcp.f32 %v1833_v45  ;;  %1978 = vmatpush1.bf16.msra.mxu0 %v6050_v35  ;;  %2019 = vmatpush1.bf16.msra.mxu1 %v6051_v14  ;;  %v6058_v45 = vld [vmem:[#allocation38_spill] sm:$0xff]  ;;  %v6059_v35 = vld [vmem:[#allocation39_spill] sm:$0xff] }
 0x586   :  { %1979 = vmatprep.subr.bf16.mxu0 %v6052_v7  ;;  %2020 = vmatprep.subr.bf16.mxu1 %v6053_v8  ;;  %v6062_v7 = vld [vmem:[#allocation42_spill] sm:$0xff] }
 0x589   :  { %1980 = vmatpush1.bf16.msra.mxu0 %v6054_v27  ;;  %2021 = vmatpush1.bf16.msra.mxu1 %v6055_v36  ;;  %v1834_v27 = vadd.f32 1.0, %v3266_v50  ;;  %v6066_v50 = vld [vmem:[#allocation46_spill] sm:$0xff] }
 0x58a   :  { %1981 = vmatprep.subr.bf16.mxu0 %v6056_v40  ;;  %2022 = vmatprep.subr.bf16.mxu1 %v6057_v59  ;;  %v6060_v40 = vld [vmem:[#allocation41_spill] sm:$0xff] }
 0x58b   :  { %3271 = vrcp.f32 %v1834_v27 }
 0x58d   :  { %1982 = vmatpush1.bf16.msra.mxu0 %v6058_v45  ;;  %2023 = vmatpush1.bf16.msra.mxu1 %v4717_v24  ;;  %v6063_v45 = vld [vmem:[#allocation43_spill] sm:$0xff] }
 0x58e   :  { %v3268_v53 = vpop.eup %3267  ;;  %1983 = vmatprep.subr.bf16.mxu0 %v6059_v35  ;;  %2024 = vmatprep.subr.bf16.mxu1 %v4723_v15 }
 0x58f   :  { %v1843_v14 = vmul.f32 %v3268_v53, %v3264_v52  ;;  %v3270_v8 = vpop.eup %3269  ;;  %v6064_v52 = vld [vmem:[#allocation44_spill] sm:$0xff]  ;;  %v6065_v53 = vld [vmem:[#allocation45_spill] sm:$0xff] }
 0x590   :  { %v1842_v36 = vmul.f32 %v3270_v8, %v4727_v18  ;;  %v6067_v18 = vld [vmem:[#allocation47_spill] sm:$0xff]  ;;  %v6068_v8 = vld [vmem:[#allocation48_spill] sm:$0xff] }
 0x591   :  { %1984 = vmatpush1.bf16.msra.mxu0 %v4729_v17  ;;  %2025 = vmatpush1.bf16.msra.mxu1 %v6060_v40 }
 0x592   :  { %v4877_v59 = vadd.f32 %v1843_v14, %v1842_v36  ;;  %1985 = vmatprep.subr.bf16.mxu0 %v6062_v7  ;;  %2026 = vmatprep.subr.bf16.mxu1 %v6063_v45  ;;  %v6069_v14 = vld [vmem:[#allocation50_spill] sm:$0xff] }
 0x594   :  { %6061 = vst [vmem:[#allocation66_spill] sm:$0xff] %v4877_v59  ;;  %3273 = vtanh.f32 %v4877_v59 }
 0x595   :  { %1986 = vmatpush1.bf16.msra.mxu0 %v6064_v52  ;;  %2027 = vmatpush1.bf16.msra.mxu1 %v6065_v53  ;;  %v3272_v36 = vpop.eup %3271  ;;  %v4892_v52 = vld [vmem:[#allocation2 + $0x4] ss:$16 sps:$4 sm:$0xff]  }
 0x596   :  { %1987 = vmatprep.subr.bf16.mxu0 %v6066_v50  ;;  %2028 = vmatprep.subr.bf16.mxu1 %v6067_v18  ;;  %6070 = vst [vmem:[#allocation67_spill] sm:$0xff] %v4892_v52  ;;  %v4895_v50 = vld [vmem:[#allocation2 + $0xc] ss:$16 sps:$4 sm:$0xff]   ;;  %v6105_v18 = vld [vmem:[#allocation26_spill] sm:$0xff] }
 0x597   :  { %6071 = vst [vmem:[#allocation68_spill] sm:$0xff] %v4895_v50 }
 0x599   :  { %1988 = vmatpush1.bf16.msra.mxu0 %v6068_v8  ;;  %2029 = vmatpush1.bf16.msra.mxu1 %v4757_v30 }
 0x59a   :  { %1989 = vmatprep.subr.bf16.mxu0 %v6069_v14  ;;  %2030 = vmatprep.subr.bf16.mxu1 %v4763_v4  ;;  %v6104_v4 = vld [vmem:[#allocation25_spill] sm:$0xff] }
 0x59d   :  { %1990 = vmatpush1.bf16.msra.mxu0 %v4766_v39  ;;  %2031 = vmatpush1.bf16.msra.mxu1 %v4769_v62  ;;  %v4900_v39 = vld [vmem:[#allocation2] ss:$16 sps:$4 sm:$0xff]   ;;  %v4903_v62 = vld [vmem:[#allocation2 + $0x8] ss:$16 sps:$4 sm:$0xff]  }
 0x59e   :  { %v3274_v27 = vpop.eup %3273  ;;  %2090 = vmatprep.subr.bf16.mxu0 %v4892_v52  ;;  %2131 = vmatprep.subr.bf16.mxu1 %v4895_v50  ;;  %6072 = vst [vmem:[#allocation69_spill] sm:$0xff] %v4900_v39  ;;  %6073 = vst [vmem:[#allocation70_spill] sm:$0xff] %v4903_v62  ;;  %v4906_v52 = vld [vmem:[#allocation2 + $0x24] ss:$16 sps:$4 sm:$0xff]  }
 0x59f   :  { %v1846_v8 = vmul.f32 %v3274_v27, %v3272_v36  ;;  %6074 = vst [vmem:[#allocation86_spill] sm:$0xff] %v4906_v52  ;;  %v4909_v36 = vld [vmem:[#allocation2 + $0x2c] ss:$16 sps:$4 sm:$0xff]  }
 0x5a0   :  { %6075 = vst [vmem:[#allocation87_spill] sm:$0xff] %v4909_v36  ;;  %v4923_v27 = vld [vmem:[#allocation2 + $0x4c] ss:$16 sps:$4 sm:$0xff]  }
 0x5a1   :  { %v1958_v30 = vpack.c.bf16 %v1846_v8, %v1846_v8  ;;  %v4920_v8 = vld [vmem:[#allocation2 + $0x44] ss:$16 sps:$4 sm:$0xff]   ;;  %6079 = vst [vmem:[#allocation91_spill] sm:$0xff] %v4923_v27 }
 0x5a2   :  { %6078 = vst [vmem:[#allocation90_spill] sm:$0xff] %v4920_v8 }
 0x5a3   :  { %1991 = vmatprep.mubr.bf16.mxu0 %v1958_v30  ;;  %2032 = vmatprep.mubr.bf16.mxu1 %v1958_v30  ;;  %v4914_v30 = vld [vmem:[#allocation2 + $0x20] ss:$16 sps:$4 sm:$0xff]  }
 0x5a4   :  { %1992 = vmatmul.mubr.bf16.vlgmr.msra.gmra.mrb[56].mxu0 %v4818_v42  ;;  %2033 = vmatmul.mubr.bf16.vlgmr.msra.gmra.mrb[56].mxu1 %v4818_v42  ;;  %6076 = vst [vmem:[#allocation88_spill] sm:$0xff] %v4914_v30  ;;  %v4917_v42 = vld [vmem:[#allocation2 + $0x28] ss:$16 sps:$4 sm:$0xff]  }
 0x5a5   :  { %2091 = vmatpush1.bf16.msra.mxu0 %v4900_v39  ;;  %2132 = vmatpush1.bf16.msra.mxu1 %v4903_v62  ;;  %6077 = vst [vmem:[#allocation89_spill] sm:$0xff] %v4917_v42  ;;  %v6103_v62 = vld [vmem:[#allocation24_spill] sm:$0xff] }
 0x5a6   :  { %2092 = vmatprep.subr.bf16.mxu0 %v4906_v52  ;;  %2133 = vmatprep.subr.bf16.mxu1 %v4909_v36  ;;  %v4926_v36 = vld [vmem:[#allocation2 + $0x40] ss:$16 sps:$4 sm:$0xff]   ;;  %v6102_v52 = vld [vmem:[#allocation23_spill] sm:$0xff] }
 0x5a7   :  { %2122 = vmatprep.mubr.bf16.mxu0 %v5944_v3  ;;  %2163 = vmatprep.mubr.bf16.mxu1 %v5944_v3  ;;  %6080 = vst [vmem:[#allocation92_spill] sm:$0xff] %v4926_v36  ;;  %v4929_v3 = vld [vmem:[#allocation2 + $0x48] ss:$16 sps:$4 sm:$0xff]  }
 0x5a8   :  { %6081 = vst [vmem:[#allocation93_spill] sm:$0xff] %v4929_v3 }
 0x5a9   :  { %2093 = vmatpush1.bf16.msra.mxu0 %v4914_v30  ;;  %2134 = vmatpush1.bf16.msra.mxu1 %v4917_v42  ;;  %v4932_v30 = vld [vmem:[#allocation2 + $0x64] ss:$16 sps:$4 sm:$0xff]   ;;  %v4935_v42 = vld [vmem:[#allocation2 + $0x6c] ss:$16 sps:$4 sm:$0xff]  }
 0x5aa   :  { %2094 = vmatprep.subr.bf16.mxu0 %v4920_v8  ;;  %2135 = vmatprep.subr.bf16.mxu1 %v4923_v27  ;;  %6082 = vst [vmem:[#allocation94_spill] sm:$0xff] %v4932_v30  ;;  %6083 = vst [vmem:[#allocation95_spill] sm:$0xff] %v4935_v42  ;;  %v4938_v8 = vld [vmem:[#allocation2 + $0x60] ss:$16 sps:$4 sm:$0xff]   ;;  %v4941_v27 = vld [vmem:[#allocation2 + $0x68] ss:$16 sps:$4 sm:$0xff]  }
 0x5ab   :  { %6084 = vst [vmem:[#allocation15_spill] sm:$0xff] %v4938_v8  ;;  %6085 = vst [vmem:[#allocation16_spill] sm:$0xff] %v4941_v27 }
 0x5ad   :  { %2095 = vmatpush1.bf16.msra.mxu0 %v4926_v36  ;;  %2136 = vmatpush1.bf16.msra.mxu1 %v4929_v3  ;;  %v4944_v36 = vld [vmem:[#allocation2 + $0x84] ss:$16 sps:$4 sm:$0xff]   ;;  %v4947_v3 = vld [vmem:[#allocation2 + $0x8c] ss:$16 sps:$4 sm:$0xff]  }
 0x5ae   :  { %2096 = vmatprep.subr.bf16.mxu0 %v4932_v30  ;;  %2137 = vmatprep.subr.bf16.mxu1 %v4935_v42  ;;  %6086 = vst [vmem:[#allocation17_spill] sm:$0xff] %v4944_v36  ;;  %6087 = vst [vmem:[#allocation18_spill] sm:$0xff] %v4947_v3  ;;  %v4950_v30 = vld [vmem:[#allocation2 + $0x80] ss:$16 sps:$4 sm:$0xff]   ;;  %v4953_v42 = vld [vmem:[#allocation2 + $0x88] ss:$16 sps:$4 sm:$0xff]  }
 0x5af   :  { %6088 = vst [vmem:[#allocation19_spill] sm:$0xff] %v4950_v30  ;;  %6089 = vst [vmem:[#allocation20_spill] sm:$0xff] %v4953_v42 }
 0x5b1   :  { %2097 = vmatpush1.bf16.msra.mxu0 %v4938_v8  ;;  %2138 = vmatpush1.bf16.msra.mxu1 %v4941_v27  ;;  %v4956_v8 = vld [vmem:[#allocation2 + $0xa4] ss:$16 sps:$4 sm:$0xff]   ;;  %v4959_v27 = vld [vmem:[#allocation2 + $0xac] ss:$16 sps:$4 sm:$0xff]  }
 0x5b2   :  { %2098 = vmatprep.subr.bf16.mxu0 %v4944_v36  ;;  %2139 = vmatprep.subr.bf16.mxu1 %v4947_v3  ;;  %6090 = vst [vmem:[#allocation21_spill] sm:$0xff] %v4956_v8  ;;  %6091 = vst [vmem:[#allocation22_spill] sm:$0xff] %v4959_v27  ;;  %v4962_v36 = vld [vmem:[#allocation2 + $0xa0] ss:$16 sps:$4 sm:$0xff]   ;;  %v4965_v3 = vld [vmem:[#allocation2 + $0xa8] ss:$16 sps:$4 sm:$0xff]  }
 0x5b3   :  { %6092 = vst [vmem:[#allocation11_spill] sm:$0xff] %v4962_v36  ;;  %6093 = vst [vmem:[#allocation12_spill] sm:$0xff] %v4965_v3 }
 0x5b5   :  { %2099 = vmatpush1.bf16.msra.mxu0 %v4950_v30  ;;  %2140 = vmatpush1.bf16.msra.mxu1 %v4953_v42  ;;  %v4968_v30 = vld [vmem:[#allocation2 + $0xc4] ss:$16 sps:$4 sm:$0xff]   ;;  %v4971_v42 = vld [vmem:[#allocation2 + $0xcc] ss:$16 sps:$4 sm:$0xff]  }
 0x5b6   :  { %2100 = vmatprep.subr.bf16.mxu0 %v4956_v8  ;;  %2141 = vmatprep.subr.bf16.mxu1 %v4959_v27  ;;  %6094 = vst [vmem:[#allocation13_spill] sm:$0xff] %v4968_v30  ;;  %6095 = vst [vmem:[#allocation14_spill] sm:$0xff] %v4971_v42  ;;  %v4974_v8 = vld [vmem:[#allocation2 + $0xc0] ss:$16 sps:$4 sm:$0xff]   ;;  %v4977_v27 = vld [vmem:[#allocation2 + $0xc8] ss:$16 sps:$4 sm:$0xff]  }
 0x5b7   :  { %6096 = vst [vmem:[#allocation53_spill] sm:$0xff] %v4974_v8  ;;  %6097 = vst [vmem:[#allocation54_spill] sm:$0xff] %v4977_v27 }
 0x5b9   :  { %2101 = vmatpush1.bf16.msra.mxu0 %v4962_v36  ;;  %2142 = vmatpush1.bf16.msra.mxu1 %v4965_v3  ;;  %v4980_v36 = vld [vmem:[#allocation2 + $0xe4] ss:$16 sps:$4 sm:$0xff]   ;;  %v4983_v3 = vld [vmem:[#allocation2 + $0xec] ss:$16 sps:$4 sm:$0xff]  }
 0x5ba   :  { %2102 = vmatprep.subr.bf16.mxu0 %v4968_v30  ;;  %2143 = vmatprep.subr.bf16.mxu1 %v4971_v42  ;;  %6098 = vst [vmem:[#allocation55_spill] sm:$0xff] %v4980_v36  ;;  %6099 = vst [vmem:[#allocation56_spill] sm:$0xff] %v4983_v3  ;;  %v4986_v30 = vld [vmem:[#allocation2 + $0xe0] ss:$16 sps:$4 sm:$0xff]   ;;  %v4989_v42 = vld [vmem:[#allocation2 + $0xe8] ss:$16 sps:$4 sm:$0xff]  }
 0x5bb   :  { %6100 = vst [vmem:[#allocation57_spill] sm:$0xff] %v4986_v30  ;;  %6101 = vst [vmem:[#allocation58_spill] sm:$0xff] %v4989_v42 }
 0x5bd   :  { %2103 = vmatpush1.bf16.msra.mxu0 %v4974_v8  ;;  %2144 = vmatpush1.bf16.msra.mxu1 %v4977_v27 }
 0x5be   :  { %2104 = vmatprep.subr.bf16.mxu0 %v4980_v36  ;;  %2145 = vmatprep.subr.bf16.mxu1 %v4983_v3 }
 0x5c1   :  { %2105 = vmatpush1.bf16.msra.mxu0 %v4986_v30  ;;  %2146 = vmatpush1.bf16.msra.mxu1 %v4989_v42 }
 0x5c2   :  { %2177 = vmatprep.subr.bf16.mxu0 %v4560_v9  ;;  %2218 = vmatprep.subr.bf16.mxu1 %v4563_v12 }
 0x633   :  { %v1906_v27 = vpop.f32.mrb[52].mxu0  ;;  %v1947_v8 = vpop.f32.mrb[52].mxu1 }
 0x634   :  { %v1954_v36 = vadd.f32 %v1906_v27, %v6102_v52  ;;  %v1956_v39 = vadd.f32 %v1947_v8, %v6103_v62  ;;  %v1908_v50 = vpop.f32.mrb[53].mxu0  ;;  %v1949_v3 = vpop.f32.mrb[53].mxu1  ;;  %v6119_v8 = vld [vmem:[#allocation42_spill] sm:$0xff]  ;;  %v6120_v27 = vld [vmem:[#allocation43_spill] sm:$0xff] }
 0x635   :  { %v1955_v14 = vadd.f32 %v1908_v50, %v6104_v4  ;;  %v1957_v30 = vadd.f32 %v1949_v3, %v6105_v18  ;;  %v1910_v53 = vpop.f32.mrb[54].mxu0  ;;  %v1951_v45 = vpop.f32.mrb[54].mxu1 }
 0x636   :  { %v2905_v7 = vmul.f32 -1.442695, %v1954_v36  ;;  %v1911_v42 = vpop.f32.mrb[55].mxu0  ;;  %v1952_v40 = vpop.f32.mrb[55].mxu1  ;;  %v2907_v12 = vmul.f32 -1.442695, %v1956_v39 }
 0x637   :  { %v2906_v9 = vmul.f32 -1.442695, %v1955_v14  ;;  %v6118_v42 = vld [vmem:[#allocation41_spill] sm:$0xff] }
 0x638   :  { %3275 = vpow2.f32 %v2905_v7 }
 0x639   :  { %3277 = vpow2.f32 %v2906_v9 }
 0x63a   :  { %3279 = vtanh.f32 %v1957_v30  ;;  %v6117_v30 = vld [vmem:[#allocation40_spill] sm:$0xff] }
 0x63b   :  { %3281 = vpow2.f32 %v2907_v12  ;;  %v6124_v12 = vld [vmem:[#allocation47_spill] sm:$0xff] }
 0x642   :  { %v3276_v17 = vpop.eup %3275 }
 0x643   :  { %v2074_v59 = vadd.f32 1.0, %v3276_v17  ;;  %v3278_v52 = vpop.eup %3277 }
 0x644   :  { %v2075_v62 = vadd.f32 1.0, %v3278_v52  ;;  %v3280_v4 = vpop.eup %3279  ;;  %v6125_v52 = vld [vmem:[#allocation48_spill] sm:$0xff] }
 0x645   :  { %3283 = vrcp.f32 %v2074_v59  ;;  %v3282_v50 = vpop.eup %3281 }
 0x646   :  { %3285 = vrcp.f32 %v2075_v62  ;;  %v2076_v18 = vadd.f32 1.0, %v3282_v50  ;;  %v6126_v62 = vld [vmem:[#allocation49_spill] sm:$0xff]  ;;  %v6128_v50 = vld [vmem:[#allocation51_spill] sm:$0xff] }
 0x648   :  { %3287 = vrcp.f32 %v2076_v18  ;;  %v6131_v18 = vld [vmem:[#allocation67_spill] sm:$0xff] }
 0x64f   :  { %v3284_v3 = vpop.eup %3283 }
 0x650   :  { %v2085_v53 = vmul.f32 %v3284_v3, %v3280_v4  ;;  %v3286_v45 = vpop.eup %3285  ;;  %v6127_v4 = vld [vmem:[#allocation50_spill] sm:$0xff]  ;;  %v6129_v3 = vld [vmem:[#allocation52_spill] sm:$0xff] }
 0x651   :  { %v2084_v40 = vmul.f32 %v3286_v45, %v4815_v1 }
 0x652   :  { %v3288_v39 = vpop.eup %3287 }
 0x653   :  { %v4999_v14 = vadd.f32 %v2085_v53, %v2084_v40  ;;  %v6130_v53 = vld [vmem:[#allocation65_spill] sm:$0xff]  ;;  %v6132_v40 = vld [vmem:[#allocation68_spill] sm:$0xff] }
 0x655   :  { %3289 = vtanh.f32 %v4999_v14 }
 0x65f   :  { %v3290_v17 = vpop.eup %3289 }
 0x660   :  { %v2088_v7 = vmul.f32 %v3290_v17, %v3288_v39 }
 0x662   :  { %v5002_v36 = vpack.c.bf16 %v2088_v7, %v2088_v7 }
 0x664   :  { %2123 = vmatmul.mubr.bf16.vlgmr.msra.gmra.mrb[60].mxu0 %v5002_v36  ;;  %2164 = vmatmul.mubr.bf16.vlgmr.msra.gmra.mrb[60].mxu1 %v5002_v36 }
 0x665   :  { %2178 = vmatpush1.bf16.msra.mxu0 %v4578_v6  ;;  %2219 = vmatpush1.bf16.msra.mxu1 %v4581_v44 }
 0x666   :  { %2179 = vmatprep.subr.bf16.mxu0 %v4584_v56  ;;  %2220 = vmatprep.subr.bf16.mxu1 %v4587_v57 }
 0x669   :  { %2180 = vmatpush1.bf16.msra.mxu0 %v4590_v10  ;;  %2221 = vmatpush1.bf16.msra.mxu1 %v4593_v47 }
 0x66a   :  { %2181 = vmatprep.subr.bf16.mxu0 %v4596_v54  ;;  %2222 = vmatprep.subr.bf16.mxu1 %v4599_v61 }
 0x66d   :  { %2182 = vmatpush1.bf16.msra.mxu0 %v6025_v5  ;;  %2223 = vmatpush1.bf16.msra.mxu1 %v6026_v26 }
 0x66e   :  { %2183 = vmatprep.subr.bf16.mxu0 %v6027_v21  ;;  %2224 = vmatprep.subr.bf16.mxu1 %v6028_v43  ;;  %v6106_v21 = vld [vmem:[#allocation76_spill] sm:$0xff] }
 0x671   :  { %2184 = vmatpush1.bf16.msra.mxu0 %v6029_v38  ;;  %2225 = vmatpush1.bf16.msra.mxu1 %v6030_v0  ;;  %v6107_v0 = vld [vmem:[#allocation77_spill] sm:$0xff] }
 0x672   :  { %2185 = vmatprep.subr.bf16.mxu0 %v6031_v25  ;;  %2226 = vmatprep.subr.bf16.mxu1 %v6032_v58  ;;  %v6108_v25 = vld [vmem:[#allocation78_spill] sm:$0xff]  ;;  %v6109_v58 = vld [vmem:[#allocation79_spill] sm:$0xff] }
 0x675   :  { %2186 = vmatpush1.bf16.msra.mxu0 %v6033_v32  ;;  %2227 = vmatpush1.bf16.msra.mxu1 %v4630_v11  ;;  %v6110_v32 = vld [vmem:[#allocation80_spill] sm:$0xff] }
 0x676   :  { %2187 = vmatprep.subr.bf16.mxu0 %v4634_v63  ;;  %2228 = vmatprep.subr.bf16.mxu1 %v4637_v13 }
 0x677   :  { %v1993_v6 = vpop.f32.mrb[56].mxu0  ;;  %v2034_v44 = vpop.f32.mrb[56].mxu1 }
 0x678   :  { %v1994_v56 = vadd.f32 %v1993_v6, %v6034_v51  ;;  %v1995_v57 = vpop.f32.mrb[57].mxu0  ;;  %v2036_v10 = vpop.f32.mrb[57].mxu1  ;;  %v2035_v63 = vadd.f32 %v2034_v44, %v6038_v23  ;;  %v6133_v6 = vld [vmem:[#allocation69_spill] sm:$0xff]  ;;  %v6134_v44 = vld [vmem:[#allocation70_spill] sm:$0xff] }
 0x679   :  { %v1996_v47 = vadd.f32 %v1995_v57, %v4273_v2  ;;  %v1997_v54 = vpop.f32.mrb[58].mxu0  ;;  %v2038_v61 = vpop.f32.mrb[58].mxu1  ;;  %2188 = vmatpush1.bf16.msra.mxu0 %v4640_v48  ;;  %2229 = vmatpush1.bf16.msra.mxu1 %v4643_v41  ;;  %v2037_v48 = vadd.f32 %v2036_v10, %v6041_v33  ;;  %v6136_v57 = vld [vmem:[#allocation87_spill] sm:$0xff]  ;;  %v6137_v10 = vmov 0  }
 0x67a   :  { %v2902_v1 = vmul.f32 -1.442695, %v1994_v56  ;;  %v1998_v5 = vpop.f32.mrb[59].mxu0  ;;  %v2039_v26 = vpop.f32.mrb[59].mxu1  ;;  %2189 = vmatprep.subr.bf16.mxu0 %v4646_v16  ;;  %2230 = vmatprep.subr.bf16.mxu1 %v6035_v19  ;;  %v2904_v13 = vmul.f32 -1.442695, %v2035_v63 }
 0x67b   :  { %v2903_v11 = vmul.f32 -1.442695, %v1996_v47  ;;  %v6111_v19 = vld [vmem:[#allocation81_spill] sm:$0xff]  ;;  %v6135_v56 = vld [vmem:[#allocation86_spill] sm:$0xff]  ;;  %v6138_v47 = vld [vmem:[#allocation88_spill] sm:$0xff] }
 0x67c   :  { %3291 = vpow2.f32 %v2902_v1  ;;  %v6139_v54 = vld [vmem:[#allocation89_spill] sm:$0xff]  ;;  %v6140_v61 = vld [vmem:[#allocation90_spill] sm:$0xff]  ;;  %v6141_v1 = vld [vmem:[#allocation91_spill] sm:$0xff] }
 0x67d   :  { %3293 = vpow2.f32 %v2903_v11  ;;  %2190 = vmatpush1.bf16.msra.mxu0 %v6036_v20  ;;  %2231 = vmatpush1.bf16.msra.mxu1 %v6037_v22  ;;  %v6112_v20 = vld [vmem:[#allocation82_spill] sm:$0xff]  ;;  %v6113_v22 = vld [vmem:[#allocation83_spill] sm:$0xff]  ;;  %v6143_v5 = vld [vmem:[#allocation93_spill] sm:$0xff] }
 0x67e   :  { %2191 = vmatprep.subr.bf16.mxu0 %v6039_v28  ;;  %2232 = vmatprep.subr.bf16.mxu1 %v6040_v31  ;;  %3295 = vtanh.f32 %v2037_v48  ;;  %v6114_v28 = vld [vmem:[#allocation37_spill] sm:$0xff]  ;;  %v6144_v26 = vld [vmem:[#allocation94_spill] sm:$0xff]  ;;  %v6145_v11 = vld [vmem:[#allocation95_spill] sm:$0xff] }
 0x67f   :  { %3297 = vpow2.f32 %v2904_v13  ;;  %v6146_v63 = vld [vmem:[#allocation15_spill] sm:$0xff]  ;;  %v6147_v48 = vld [vmem:[#allocation16_spill] sm:$0xff]  ;;  %v6148_v13 = vld [vmem:[#allocation17_spill] sm:$0xff] }
 0x681   :  { %2192 = vmatpush1.bf16.msra.mxu0 %v6042_v37  ;;  %2233 = vmatpush1.bf16.msra.mxu1 %v6043_v60  ;;  %v6115_v60 = vld [vmem:[#allocation38_spill] sm:$0xff] }
 0x682   :  { %2193 = vmatprep.subr.bf16.mxu0 %v6044_v34  ;;  %2234 = vmatprep.subr.bf16.mxu1 %v6045_v29 }
 0x685   :  { %2194 = vmatpush1.bf16.msra.mxu0 %v6046_v46  ;;  %2235 = vmatpush1.bf16.msra.mxu1 %v6047_v49 }
 0x686   :  { %v3292_v41 = vpop.eup %3291  ;;  %2195 = vmatprep.subr.bf16.mxu0 %v6048_v55  ;;  %2236 = vmatprep.subr.bf16.mxu1 %v6106_v21  ;;  %v6116_v55 = vld [vmem:[#allocation66_spill] sm:$0xff]  ;;  %v6151_v21 = vld [vmem:[#allocation20_spill] sm:$0xff] }
 0x687   :  { %v2050_v16 = vadd.f32 1.0, %v3292_v41  ;;  %v3294_v43 = vpop.eup %3293  ;;  %v6149_v41 = vld [vmem:[#allocation18_spill] sm:$0xff] }
 0x688   :  { %v2051_v38 = vadd.f32 1.0, %v3294_v43  ;;  %v3296_v31 = vpop.eup %3295  ;;  %v6152_v43 = vld [vmem:[#allocation21_spill] sm:$0xff] }
 0x689   :  { %3299 = vrcp.f32 %v2050_v16  ;;  %2196 = vmatpush1.bf16.msra.mxu0 %v6107_v0  ;;  %2237 = vmatpush1.bf16.msra.mxu1 %v6108_v25  ;;  %v3298_v37 = vpop.eup %3297  ;;  %v6150_v16 = vld [vmem:[#allocation19_spill] sm:$0xff]  ;;  %v6155_v25 = vld [vmem:[#allocation12_spill] sm:$0xff] }
 0x68a   :  { %3301 = vrcp.f32 %v2051_v38  ;;  %2197 = vmatprep.subr.bf16.mxu0 %v6109_v58  ;;  %2238 = vmatprep.subr.bf16.mxu1 %v6110_v32  ;;  %v2052_v49 = vadd.f32 1.0, %v3298_v37  ;;  %v6153_v38 = vld [vmem:[#allocation22_spill] sm:$0xff]  ;;  %v6154_v0 = vld [vmem:[#allocation11_spill] sm:$0xff]  ;;  %v6156_v58 = vld [vmem:[#allocation13_spill] sm:$0xff] }
 0x68b   :  { %v6157_v32 = vld [vmem:[#allocation14_spill] sm:$0xff] }
 0x68c   :  { %3303 = vrcp.f32 %v2052_v49  ;;  %v6163_v37 = vld [vmem:[#allocation58_spill] sm:$0xff]  ;;  %v6164_v49 = vld [vmem:[#allocation27_spill] sm:$0xff] }
 0x68d   :  { %2198 = vmatpush1.bf16.msra.mxu0 %v6111_v19  ;;  %2239 = vmatpush1.bf16.msra.mxu1 %v6112_v20  ;;  %v6158_v19 = vld [vmem:[#allocation53_spill] sm:$0xff]  ;;  %v6159_v20 = vld [vmem:[#allocation54_spill] sm:$0xff] }
 0x68e   :  { %2199 = vmatprep.subr.bf16.mxu0 %v6113_v22  ;;  %2240 = vmatprep.subr.bf16.mxu1 %v6114_v28  ;;  %v6160_v22 = vld [vmem:[#allocation55_spill] sm:$0xff]  ;;  %v6161_v28 = vld [vmem:[#allocation56_spill] sm:$0xff] }
 0x691   :  { %2200 = vmatpush1.bf16.msra.mxu0 %v6115_v60  ;;  %2241 = vmatpush1.bf16.msra.mxu1 %v4717_v24  ;;  %v6121_v24 = vld [vmem:[#allocation44_spill] sm:$0xff] }
 0x692   :  { %2201 = vmatprep.subr.bf16.mxu0 %v6059_v35  ;;  %2242 = vmatprep.subr.bf16.mxu1 %v4723_v15  ;;  %v6122_v35 = vld [vmem:[#allocation45_spill] sm:$0xff]  ;;  %v6123_v15 = vld [vmem:[#allocation46_spill] sm:$0xff] }
 0x693   :  { %v3300_v34 = vpop.eup %3299  ;;  %v5112_v60 = vld [vmem:[#allocation5 + $0x4] ss:$16 sps:$4 sm:$0xff]  }
 0x694   :  { %v2061_v29 = vmul.f32 %v3300_v34, %v3296_v31  ;;  %v3302_v46 = vpop.eup %3301  ;;  %v6162_v31 = vld [vmem:[#allocation57_spill] sm:$0xff] }
 0x695   :  { %v2060_v59 = vmul.f32 %v3302_v46, %v6116_v55  ;;  %2202 = vmatpush1.bf16.msra.mxu0 %v6117_v30  ;;  %2243 = vmatpush1.bf16.msra.mxu1 %v6118_v42  ;;  %v5115_v34 = vld [vmem:[#allocation5 + $0xc] ss:$16 sps:$4 sm:$0xff]  }
 0x696   :  { %2203 = vmatprep.subr.bf16.mxu0 %v6119_v8  ;;  %2244 = vmatprep.subr.bf16.mxu1 %v6120_v27  ;;  %v3304_v45 = vpop.eup %3303  ;;  %v6166_v27 = vld [vmem:[#allocation29_spill] sm:$0xff] }
 0x697   :  { %v5063_v9 = vadd.f32 %v2061_v29, %v2060_v59  ;;  %v6165_v59 = vld [vmem:[#allocation28_spill] sm:$0xff] }
 0x699   :  { %2204 = vmatpush1.bf16.msra.mxu0 %v6121_v24  ;;  %2245 = vmatpush1.bf16.msra.mxu1 %v6122_v35  ;;  %3305 = vtanh.f32 %v5063_v9  ;;  %v6167_v35 = vld [vmem:[#allocation30_spill] sm:$0xff] }
 0x69a   :  { %2205 = vmatprep.subr.bf16.mxu0 %v6123_v15  ;;  %2246 = vmatprep.subr.bf16.mxu1 %v6124_v12 }
 0x69d   :  { %2206 = vmatpush1.bf16.msra.mxu0 %v6125_v52  ;;  %2247 = vmatpush1.bf16.msra.mxu1 %v6126_v62 }
 0x69e   :  { %2207 = vmatprep.subr.bf16.mxu0 %v6127_v4  ;;  %2248 = vmatprep.subr.bf16.mxu1 %v6128_v50 }
 0x6a1   :  { %2208 = vmatpush1.bf16.msra.mxu0 %v6129_v3  ;;  %2249 = vmatpush1.bf16.msra.mxu1 %v6130_v53 }
 0x6a2   :  { %2308 = vmatprep.subr.bf16.mxu0 %v6131_v18  ;;  %2349 = vmatprep.subr.bf16.mxu1 %v6132_v40 }
 0x6a3   :  { %v3306_v39 = vpop.eup %3305 }
 0x6a4   :  { %v2064_v17 = vmul.f32 %v3306_v39, %v3304_v45 }
 0x6a6   :  { %v2176_v7 = vpack.c.bf16 %v2064_v17, %v2064_v17 }
 0x6a8   :  { %2209 = vmatprep.mubr.bf16.mxu0 %v2176_v7  ;;  %2250 = vmatprep.mubr.bf16.mxu1 %v2176_v7 }
 0x6a9   :  { %2210 = vmatmul.mubr.bf16.vlgmr.msra.gmra.mrb[64].mxu0 %v5002_v36  ;;  %2251 = vmatmul.mubr.bf16.vlgmr.msra.gmra.mrb[64].mxu1 %v5002_v36  ;;  %v6142_v36 = vld [vmem:[#allocation92_spill] sm:$0xff] }
 0x6aa   :  { %2309 = vmatpush1.bf16.msra.mxu0 %v6133_v6  ;;  %2350 = vmatpush1.bf16.msra.mxu1 %v6134_v44 }
 0x6ab   :  { %2310 = vmatprep.subr.bf16.mxu0 %v6135_v56  ;;  %2351 = vmatprep.subr.bf16.mxu1 %v6136_v57 }
 0x6ac   :  { %2340 = vmatprep.mubr.bf16.mxu0 %v6137_v10  ;;  %2381 = vmatprep.mubr.bf16.mxu1 %v6137_v10 }
 0x6ae   :  { %2311 = vmatpush1.bf16.msra.mxu0 %v6138_v47  ;;  %2352 = vmatpush1.bf16.msra.mxu1 %v6139_v54 }
 0x6af   :  { %2312 = vmatprep.subr.bf16.mxu0 %v6140_v61  ;;  %2353 = vmatprep.subr.bf16.mxu1 %v6141_v1 }
 0x6b2   :  { %2313 = vmatpush1.bf16.msra.mxu0 %v6142_v36  ;;  %2354 = vmatpush1.bf16.msra.mxu1 %v6143_v5  ;;  %v5130_v5 = vld [vmem:[#allocation5] ss:$16 sps:$4 sm:$0xff]  }
 0x6b3   :  { %2314 = vmatprep.subr.bf16.mxu0 %v6144_v26  ;;  %2355 = vmatprep.subr.bf16.mxu1 %v6145_v11  ;;  %v5133_v26 = vld [vmem:[#allocation5 + $0x8] ss:$16 sps:$4 sm:$0xff]   ;;  %v5139_v11 = vld [vmem:[#allocation5 + $0x2c] ss:$16 sps:$4 sm:$0xff]  }
 0x6b6   :  { %2315 = vmatpush1.bf16.msra.mxu0 %v6146_v63  ;;  %2356 = vmatpush1.bf16.msra.mxu1 %v6147_v48  ;;  %v5142_v63 = vld [vmem:[#allocation5 + $0x20] ss:$16 sps:$4 sm:$0xff]   ;;  %v5145_v48 = vld [vmem:[#allocation5 + $0x28] ss:$16 sps:$4 sm:$0xff]  }
 0x6b7   :  { %2316 = vmatprep.subr.bf16.mxu0 %v6148_v13  ;;  %2357 = vmatprep.subr.bf16.mxu1 %v6149_v41  ;;  %v5148_v13 = vld [vmem:[#allocation5 + $0x44] ss:$16 sps:$4 sm:$0xff]   ;;  %v5151_v41 = vld [vmem:[#allocation5 + $0x4c] ss:$16 sps:$4 sm:$0xff]  }
 0x6ba   :  { %2317 = vmatpush1.bf16.msra.mxu0 %v6150_v16  ;;  %2358 = vmatpush1.bf16.msra.mxu1 %v6151_v21  ;;  %v5154_v16 = vld [vmem:[#allocation5 + $0x40] ss:$16 sps:$4 sm:$0xff]   ;;  %v5157_v21 = vld [vmem:[#allocation5 + $0x48] ss:$16 sps:$4 sm:$0xff]  }
 0x6bb   :  { %2318 = vmatprep.subr.bf16.mxu0 %v6152_v43  ;;  %2359 = vmatprep.subr.bf16.mxu1 %v6153_v38  ;;  %v5160_v43 = vld [vmem:[#allocation5 + $0x64] ss:$16 sps:$4 sm:$0xff]   ;;  %v5163_v38 = vld [vmem:[#allocation5 + $0x6c] ss:$16 sps:$4 sm:$0xff]  }
 0x6be   :  { %2319 = vmatpush1.bf16.msra.mxu0 %v6154_v0  ;;  %2360 = vmatpush1.bf16.msra.mxu1 %v6155_v25  ;;  %v5166_v0 = vld [vmem:[#allocation5 + $0x60] ss:$16 sps:$4 sm:$0xff]   ;;  %v5169_v25 = vld [vmem:[#allocation5 + $0x68] ss:$16 sps:$4 sm:$0xff]  }
 0x6bf   :  { %2320 = vmatprep.subr.bf16.mxu0 %v6156_v58  ;;  %2361 = vmatprep.subr.bf16.mxu1 %v6157_v32  ;;  %v5172_v58 = vld [vmem:[#allocation5 + $0x84] ss:$16 sps:$4 sm:$0xff]   ;;  %v5175_v32 = vld [vmem:[#allocation5 + $0x8c] ss:$16 sps:$4 sm:$0xff]  }
 0x6c2   :  { %2321 = vmatpush1.bf16.msra.mxu0 %v6158_v19  ;;  %2362 = vmatpush1.bf16.msra.mxu1 %v6159_v20  ;;  %v5178_v19 = vld [vmem:[#allocation5 + $0x80] ss:$16 sps:$4 sm:$0xff]   ;;  %v5181_v20 = vld [vmem:[#allocation5 + $0x88] ss:$16 sps:$4 sm:$0xff]  }
 0x6c3   :  { %2322 = vmatprep.subr.bf16.mxu0 %v6160_v22  ;;  %2363 = vmatprep.subr.bf16.mxu1 %v6161_v28  ;;  %v5184_v22 = vld [vmem:[#allocation5 + $0xa4] ss:$16 sps:$4 sm:$0xff]   ;;  %v5187_v28 = vld [vmem:[#allocation5 + $0xac] ss:$16 sps:$4 sm:$0xff]  }
 0x6c6   :  { %2323 = vmatpush1.bf16.msra.mxu0 %v6162_v31  ;;  %2364 = vmatpush1.bf16.msra.mxu1 %v6163_v37 }
 0x6c7   :  { %2395 = vmatprep.subr.bf16.mxu0 %v5112_v60  ;;  %2436 = vmatprep.subr.bf16.mxu1 %v5115_v34 }
 0x737   :  { %v2124_v29 = vpop.f32.mrb[60].mxu0  ;;  %v2165_v46 = vpop.f32.mrb[60].mxu1 }
 0x738   :  { %v2172_v55 = vadd.f32 %v2124_v29, %v6164_v49  ;;  %v2174_v30 = vadd.f32 %v2165_v46, %v6165_v59  ;;  %v2126_v42 = vpop.f32.mrb[61].mxu0  ;;  %v2167_v8 = vpop.f32.mrb[61].mxu1 }
 0x739   :  { %v2173_v24 = vadd.f32 %v2126_v42, %v6166_v27  ;;  %v2175_v15 = vadd.f32 %v2167_v8, %v6167_v35  ;;  %v2128_v12 = vpop.f32.mrb[62].mxu0  ;;  %v2169_v52 = vpop.f32.mrb[62].mxu1  ;;  %v5192_v42 = vld [vmem:[#allocation5 + $0xa0] ss:$16 sps:$4 sm:$0xff]   ;;  %v5195_v8 = vld [vmem:[#allocation5 + $0xa8] ss:$16 sps:$4 sm:$0xff]  }
 0x73a   :  { %v2911_v62 = vmul.f32 -1.442695, %v2172_v55  ;;  %v2129_v4 = vpop.f32.mrb[63].mxu0  ;;  %v2170_v50 = vpop.f32.mrb[63].mxu1  ;;  %v2913_v53 = vmul.f32 -1.442695, %v2174_v30 }
 0x73b   :  { %v2912_v3 = vmul.f32 -1.442695, %v2173_v24  ;;  %v5201_v12 = vld [vmem:[#allocation5 + $0xcc] ss:$16 sps:$4 sm:$0xff]   ;;  %v5207_v4 = vld [vmem:[#allocation5 + $0xc8] ss:$16 sps:$4 sm:$0xff]  }
 0x73c   :  { %3307 = vpow2.f32 %v2911_v62  ;;  %v5204_v62 = vld [vmem:[#allocation5 + $0xc0] ss:$16 sps:$4 sm:$0xff]   ;;  %v5210_v50 = vld [vmem:[#allocation5 + $0xe4] ss:$16 sps:$4 sm:$0xff]  }
 0x73d   :  { %3309 = vpow2.f32 %v2912_v3  ;;  %v5213_v3 = vld [vmem:[#allocation5 + $0xec] ss:$16 sps:$4 sm:$0xff]  }
 0x73e   :  { %3311 = vtanh.f32 %v2175_v15  ;;  %v5198_v15 = vld [vmem:[#allocation5 + $0xc4] ss:$16 sps:$4 sm:$0xff]  }
 0x73f   :  { %3313 = vpow2.f32 %v2913_v53 }
 0x746   :  { %v3308_v45 = vpop.eup %3307 }
 0x747   :  { %v2292_v18 = vadd.f32 1.0, %v3308_v45  ;;  %v3310_v40 = vpop.eup %3309  ;;  %v5217_v45 = vld [vmem:[#allocation5 + $0xe0] ss:$16 sps:$4 sm:$0xff]  }
 0x748   :  { %v2293_v39 = vadd.f32 1.0, %v3310_v40  ;;  %v3312_v17 = vpop.eup %3311  ;;  %v5223_v40 = vld [vmem:[#allocation5 + $0x104] ss:$16 sps:$4 sm:$0xff]  }
 0x749   :  { %3315 = vrcp.f32 %v2292_v18  ;;  %v3314_v7 = vpop.eup %3313  ;;  %v5220_v18 = vld [vmem:[#allocation5 + $0xe8] ss:$16 sps:$4 sm:$0xff]  }
 0x74a   :  { %3317 = vrcp.f32 %v2293_v39  ;;  %v2294_v57 = vadd.f32 1.0, %v3314_v7  ;;  %v5226_v39 = vld [vmem:[#allocation5 + $0x10c] ss:$16 sps:$4 sm:$0xff]  }
 0x74c   :  { %3319 = vrcp.f32 %v2294_v57  ;;  %v5236_v57 = vld [vmem:[#allocation5 + $0x124] ss:$16 sps:$4 sm:$0xff]  }
 0x753   :  { %v3316_v6 = vpop.eup %3315 }
 0x754   :  { %v2303_v44 = vmul.f32 %v3316_v6, %v3312_v17  ;;  %v3318_v56 = vpop.eup %3317  ;;  %v5230_v6 = vld [vmem:[#allocation5 + $0x100] ss:$16 sps:$4 sm:$0xff]  }
 0x755   :  { %v2302_v10 = vmul.f32 %v3318_v56, %v4999_v14  ;;  %v5136_v14 = vld [vmem:[#allocation5 + $0x24] ss:$16 sps:$4 sm:$0xff]  }
 0x756   :  { %v3320_v54 = vpop.eup %3319 }
 0x757   :  { %v5123_v47 = vadd.f32 %v2303_v44, %v2302_v10  ;;  %v5233_v44 = vld [vmem:[#allocation5 + $0x108] ss:$16 sps:$4 sm:$0xff]   ;;  %v5239_v10 = vld [vmem:[#allocation5 + $0x12c] ss:$16 sps:$4 sm:$0xff]  }
 0x759   :  { %6168 = vst [vmem:[#allocation59_spill] sm:$0xff] %v5123_v47  ;;  %3321 = vtanh.f32 %v5123_v47  ;;  %v5315_v47 = vld [vmem:[#allocation5 + $0x1ec] ss:$16 sps:$4 sm:$0xff]  }
 0x763   :  { %v3322_v61 = vpop.eup %3321 }
 0x764   :  { %v2306_v1 = vmul.f32 %v3322_v61, %v3320_v54 }
 0x766   :  { %v5126_v36 = vpack.c.bf16 %v2306_v1, %v2306_v1 }
 0x768   :  { %2341 = vmatmul.mubr.bf16.vlgmr.msra.gmra.mrb[68].mxu0 %v5126_v36  ;;  %2382 = vmatmul.mubr.bf16.vlgmr.msra.gmra.mrb[68].mxu1 %v5126_v36 }
 0x769   :  { %2396 = vmatpush1.bf16.msra.mxu0 %v5130_v5  ;;  %2437 = vmatpush1.bf16.msra.mxu1 %v5133_v26 }
 0x76a   :  { %2397 = vmatprep.subr.bf16.mxu0 %v5136_v14  ;;  %2438 = vmatprep.subr.bf16.mxu1 %v5139_v11 }
 0x76d   :  { %2398 = vmatpush1.bf16.msra.mxu0 %v5142_v63  ;;  %2439 = vmatpush1.bf16.msra.mxu1 %v5145_v48 }
 0x76e   :  { %2399 = vmatprep.subr.bf16.mxu0 %v5148_v13  ;;  %2440 = vmatprep.subr.bf16.mxu1 %v5151_v41 }
 0x771   :  { %2400 = vmatpush1.bf16.msra.mxu0 %v5154_v16  ;;  %2441 = vmatpush1.bf16.msra.mxu1 %v5157_v21 }
 0x772   :  { %2401 = vmatprep.subr.bf16.mxu0 %v5160_v43  ;;  %2442 = vmatprep.subr.bf16.mxu1 %v5163_v38 }
 0x775   :  { %2402 = vmatpush1.bf16.msra.mxu0 %v5166_v0  ;;  %2443 = vmatpush1.bf16.msra.mxu1 %v5169_v25 }
 0x776   :  { %2403 = vmatprep.subr.bf16.mxu0 %v5172_v58  ;;  %2444 = vmatprep.subr.bf16.mxu1 %v5175_v32 }
 0x779   :  { %2404 = vmatpush1.bf16.msra.mxu0 %v5178_v19  ;;  %2445 = vmatpush1.bf16.msra.mxu1 %v5181_v20 }
 0x77a   :  { %2405 = vmatprep.subr.bf16.mxu0 %v5184_v22  ;;  %2446 = vmatprep.subr.bf16.mxu1 %v5187_v28 }
 0x77c   :  { %v2211_v31 = vpop.f32.mrb[64].mxu0  ;;  %v2252_v37 = vpop.f32.mrb[64].mxu1 }
 0x77d   :  { %v2212_v29 = vadd.f32 %v2211_v31, %v6034_v51  ;;  %v2213_v46 = vpop.f32.mrb[65].mxu0  ;;  %v2254_v49 = vpop.f32.mrb[65].mxu1  ;;  %2406 = vmatpush1.bf16.msra.mxu0 %v5192_v42  ;;  %2447 = vmatpush1.bf16.msra.mxu1 %v5195_v8  ;;  %v2253_v53 = vadd.f32 %v2252_v37, %v6038_v23  ;;  %v5242_v31 = vld [vmem:[#allocation5 + $0x120] ss:$16 sps:$4 sm:$0xff]   ;;  %v5245_v37 = vld [vmem:[#allocation5 + $0x128] ss:$16 sps:$4 sm:$0xff]  }
 0x77e   :  { %v2214_v55 = vadd.f32 %v2213_v46, %v4273_v2  ;;  %v2215_v59 = vpop.f32.mrb[66].mxu0  ;;  %v2256_v30 = vpop.f32.mrb[66].mxu1  ;;  %2407 = vmatprep.subr.bf16.mxu0 %v5198_v15  ;;  %2448 = vmatprep.subr.bf16.mxu1 %v5201_v12  ;;  %v2255_v17 = vadd.f32 %v2254_v49, %v6041_v33  ;;  %v5251_v46 = vld [vmem:[#allocation5 + $0x14c] ss:$16 sps:$4 sm:$0xff]   ;;  %v5254_v49 = vld [vmem:[#allocation5 + $0x140] ss:$16 sps:$4 sm:$0xff]  }
 0x77f   :  { %v2908_v27 = vmul.f32 -1.442695, %v2212_v29  ;;  %v2216_v24 = vpop.f32.mrb[67].mxu0  ;;  %v2257_v35 = vpop.f32.mrb[67].mxu1  ;;  %v2910_v7 = vmul.f32 -1.442695, %v2253_v53 }
 0x780   :  { %v2909_v52 = vmul.f32 -1.442695, %v2214_v55  ;;  %v5248_v29 = vld [vmem:[#allocation5 + $0x144] ss:$16 sps:$4 sm:$0xff]   ;;  %v5257_v55 = vld [vmem:[#allocation5 + $0x148] ss:$16 sps:$4 sm:$0xff]  }
 0x781   :  { %3323 = vpow2.f32 %v2908_v27  ;;  %2408 = vmatpush1.bf16.msra.mxu0 %v5204_v62  ;;  %2449 = vmatpush1.bf16.msra.mxu1 %v5207_v4  ;;  %v5260_v59 = vld [vmem:[#allocation5 + $0x164] ss:$16 sps:$4 sm:$0xff]   ;;  %v5263_v30 = vld [vmem:[#allocation5 + $0x16c] ss:$16 sps:$4 sm:$0xff]   ;;  %v5266_v24 = vld [vmem:[#allocation5 + $0x160] ss:$16 sps:$4 sm:$0xff]  }
 0x782   :  { %3325 = vpow2.f32 %v2909_v52  ;;  %2409 = vmatprep.subr.bf16.mxu0 %v5210_v50  ;;  %2450 = vmatprep.subr.bf16.mxu1 %v5213_v3  ;;  %v5269_v35 = vld [vmem:[#allocation5 + $0x168] ss:$16 sps:$4 sm:$0xff]   ;;  %v5272_v53 = vld [vmem:[#allocation5 + $0x184] ss:$16 sps:$4 sm:$0xff]   ;;  %v5288_v51 = vld [vmem:[#allocation5 + $0x1ac] ss:$16 sps:$4 sm:$0xff]  }
 0x783   :  { %3327 = vtanh.f32 %v2255_v17  ;;  %v5275_v17 = vld [vmem:[#allocation5 + $0x18c] ss:$16 sps:$4 sm:$0xff]   ;;  %v5281_v33 = vld [vmem:[#allocation5 + $0x188] ss:$16 sps:$4 sm:$0xff]   ;;  %v5285_v2 = vld [vmem:[#allocation5 + $0x1a4] ss:$16 sps:$4 sm:$0xff]  }
 0x784   :  { %3329 = vpow2.f32 %v2910_v7 }
 0x785   :  { %2410 = vmatpush1.bf16.msra.mxu0 %v5217_v45  ;;  %2451 = vmatpush1.bf16.msra.mxu1 %v5220_v18 }
 0x786   :  { %2411 = vmatprep.subr.bf16.mxu0 %v5223_v40  ;;  %2452 = vmatprep.subr.bf16.mxu1 %v5226_v39 }
 0x789   :  { %2412 = vmatpush1.bf16.msra.mxu0 %v5230_v6  ;;  %2453 = vmatpush1.bf16.msra.mxu1 %v5233_v44 }
 0x78a   :  { %2413 = vmatprep.subr.bf16.mxu0 %v5236_v57  ;;  %2454 = vmatprep.subr.bf16.mxu1 %v5239_v10 }
 0x78b   :  { %v3324_v56 = vpop.eup %3323 }
 0x78c   :  { %v2268_v54 = vadd.f32 1.0, %v3324_v56  ;;  %v3326_v61 = vpop.eup %3325 }
 0x78d   :  { %v2269_v1 = vadd.f32 1.0, %v3326_v61  ;;  %2414 = vmatpush1.bf16.msra.mxu0 %v5242_v31  ;;  %2455 = vmatpush1.bf16.msra.mxu1 %v5245_v37  ;;  %v3328_v27 = vpop.eup %3327 }
 0x78e   :  { %3331 = vrcp.f32 %v2268_v54  ;;  %2415 = vmatprep.subr.bf16.mxu0 %v5248_v29  ;;  %2456 = vmatprep.subr.bf16.mxu1 %v5251_v46  ;;  %v3330_v52 = vpop.eup %3329 }
 0x78f   :  { %3333 = vrcp.f32 %v2269_v1  ;;  %v2270_v61 = vadd.f32 1.0, %v3330_v52  ;;  %v5278_v1 = vld [vmem:[#allocation5 + $0x180] ss:$16 sps:$4 sm:$0xff]  }
 0x790   :  { %v5293_v52 = vld [vmem:[#allocation5 + $0x1a0] ss:$16 sps:$4 sm:$0xff]  }
 0x791   :  { %2416 = vmatpush1.bf16.msra.mxu0 %v5254_v49  ;;  %2457 = vmatpush1.bf16.msra.mxu1 %v5257_v55  ;;  %3335 = vrcp.f32 %v2270_v61  ;;  %v5312_v61 = vld [vmem:[#allocation5 + $0x1e4] ss:$16 sps:$4 sm:$0xff]  }
 0x792   :  { %2417 = vmatprep.subr.bf16.mxu0 %v5260_v59  ;;  %2458 = vmatprep.subr.bf16.mxu1 %v5263_v30  ;;  %6174 = vst [vmem:[#allocation71_spill] sm:$0xff] %v5312_v61 }
 0x795   :  { %2418 = vmatpush1.bf16.msra.mxu0 %v5266_v24  ;;  %2459 = vmatpush1.bf16.msra.mxu1 %v5269_v35 }
 0x796   :  { %2419 = vmatprep.subr.bf16.mxu0 %v5272_v53  ;;  %2460 = vmatprep.subr.bf16.mxu1 %v5275_v17 }
 0x798   :  { %v3332_v7 = vpop.eup %3331 }
 0x799   :  { %v2279_v56 = vmul.f32 %v3332_v7, %v3328_v27  ;;  %v3334_v54 = vpop.eup %3333  ;;  %2420 = vmatpush1.bf16.msra.mxu0 %v5278_v1  ;;  %2461 = vmatpush1.bf16.msra.mxu1 %v5281_v33  ;;  %v5296_v7 = vld [vmem:[#allocation5 + $0x1a8] ss:$16 sps:$4 sm:$0xff]  }
 0x79a   :  { %v2278_v23 = vmul.f32 %v3334_v54, %v5063_v9  ;;  %2421 = vmatprep.subr.bf16.mxu0 %v5285_v2  ;;  %2462 = vmatprep.subr.bf16.mxu1 %v5288_v51  ;;  %v5299_v9 = vld [vmem:[#allocation5 + $0x1c4] ss:$16 sps:$4 sm:$0xff]   ;;  %v5302_v54 = vld [vmem:[#allocation5 + $0x1cc] ss:$16 sps:$4 sm:$0xff]  }
 0x79b   :  { %6170 = vst [vmem:[#allocation61_spill] sm:$0xff] %v5299_v9  ;;  %6171 = vst [vmem:[#allocation62_spill] sm:$0xff] %v5302_v54 }
 0x79c   :  { %v5291_v27 = vadd.f32 %v2279_v56, %v2278_v23  ;;  %v5306_v23 = vld [vmem:[#allocation5 + $0x1c0] ss:$16 sps:$4 sm:$0xff]   ;;  %v5309_v56 = vld [vmem:[#allocation5 + $0x1c8] ss:$16 sps:$4 sm:$0xff]  }
 0x79d   :  { %2422 = vmatpush1.bf16.msra.mxu0 %v5293_v52  ;;  %2463 = vmatpush1.bf16.msra.mxu1 %v5296_v7  ;;  %6172 = vst [vmem:[#allocation63_spill] sm:$0xff] %v5306_v23  ;;  %6173 = vst [vmem:[#allocation64_spill] sm:$0xff] %v5309_v56 }
 0x79e   :  { %6169 = vst [vmem:[#allocation60_spill] sm:$0xff] %v5291_v27  ;;  %2423 = vmatprep.subr.bf16.mxu0 %v5299_v9  ;;  %2464 = vmatprep.subr.bf16.mxu1 %v5302_v54  ;;  %3337 = vtanh.f32 %v5291_v27  ;;  %v5318_v9 = vld [vmem:[#allocation5 + $0x1e0] ss:$16 sps:$4 sm:$0xff]   ;;  %v5321_v27 = vld [vmem:[#allocation5 + $0x1e8] ss:$16 sps:$4 sm:$0xff]  }
 0x7a1   :  { %2424 = vmatpush1.bf16.msra.mxu0 %v5306_v23  ;;  %2465 = vmatpush1.bf16.msra.mxu1 %v5309_v56  ;;  %v3336_v56 = vpop.eup %3335 }
 0x7a2   :  { %2425 = vmatprep.subr.bf16.mxu0 %v5312_v61  ;;  %2466 = vmatprep.subr.bf16.mxu1 %v5315_v47 }
 0x7a5   :  { %2426 = vmatpush1.bf16.msra.mxu0 %v5318_v9  ;;  %2467 = vmatpush1.bf16.msra.mxu1 %v5321_v27 }
 0x7a6   :  { %2527 = vmatprep.subr.bf16.mxu0 %v5112_v60  ;;  %2568 = vmatprep.subr.bf16.mxu1 %v5115_v34  ;;  %v6175_v60 = vld [vmem:[#allocation61_spill] sm:$0xff]  ;;  %v6176_v34 = vld [vmem:[#allocation62_spill] sm:$0xff] }
 0x7a8   :  { %v3338_v23 = vpop.eup %3337 }
 0x7a9   :  { %v2282_v54 = vmul.f32 %v3338_v23, %v3336_v56 }
 0x7ab   :  { %v2394_v61 = vpack.c.bf16 %v2282_v54, %v2282_v54 }
 0x7ad   :  { %2427 = vmatprep.mubr.bf16.mxu0 %v2394_v61  ;;  %2468 = vmatprep.mubr.bf16.mxu1 %v2394_v61 }
 0x7ae   :  { %2428 = vmatmul.mubr.bf16.vlgmr.msra.gmra.mrb[72].mxu0 %v5126_v36  ;;  %2469 = vmatmul.mubr.bf16.vlgmr.msra.gmra.mrb[72].mxu1 %v5126_v36  ;;  %v6177_v36 = vld [vmem:[#allocation63_spill] sm:$0xff] }
 0x7af   :  { %2528 = vmatpush1.bf16.msra.mxu0 %v5130_v5  ;;  %2569 = vmatpush1.bf16.msra.mxu1 %v5133_v26  ;;  %v6178_v5 = vld [vmem:[#allocation64_spill] sm:$0xff]  ;;  %v6179_v26 = vld [vmem:[#allocation71_spill] sm:$0xff] }
 0x7b0   :  { %2529 = vmatprep.subr.bf16.mxu0 %v5136_v14  ;;  %2570 = vmatprep.subr.bf16.mxu1 %v5139_v11  ;;  %v6181_v11 = vld [vmem:[#allocation32_spill] sm:$0xff] }
 0x7b3   :  { %2530 = vmatpush1.bf16.msra.mxu0 %v5142_v63  ;;  %2571 = vmatpush1.bf16.msra.mxu1 %v5145_v48 }
 0x7b4   :  { %2531 = vmatprep.subr.bf16.mxu0 %v5148_v13  ;;  %2572 = vmatprep.subr.bf16.mxu1 %v5151_v41  ;;  %v6182_v41 = vld [vmem:[#allocation33_spill] sm:$0xff] }
 0x7b7   :  { %2532 = vmatpush1.bf16.msra.mxu0 %v5154_v16  ;;  %2573 = vmatpush1.bf16.msra.mxu1 %v5157_v21  ;;  %v6183_v21 = vld [vmem:[#allocation34_spill] sm:$0xff] }
 0x7b8   :  { %2533 = vmatprep.subr.bf16.mxu0 %v5160_v43  ;;  %2574 = vmatprep.subr.bf16.mxu1 %v5163_v38 }
 0x7bb   :  { %2534 = vmatpush1.bf16.msra.mxu0 %v5166_v0  ;;  %2575 = vmatpush1.bf16.msra.mxu1 %v5169_v25 }
 0x7bc   :  { %2535 = vmatprep.subr.bf16.mxu0 %v5172_v58  ;;  %2576 = vmatprep.subr.bf16.mxu1 %v5175_v32 }
 0x7bf   :  { %2536 = vmatpush1.bf16.msra.mxu0 %v5178_v19  ;;  %2577 = vmatpush1.bf16.msra.mxu1 %v5181_v20 }
 0x7c0   :  { %2537 = vmatprep.subr.bf16.mxu0 %v5184_v22  ;;  %2578 = vmatprep.subr.bf16.mxu1 %v5187_v28 }
 0x7c3   :  { %2538 = vmatpush1.bf16.msra.mxu0 %v5192_v42  ;;  %2579 = vmatpush1.bf16.msra.mxu1 %v5195_v8 }
 0x7c4   :  { %2539 = vmatprep.subr.bf16.mxu0 %v5198_v15  ;;  %2580 = vmatprep.subr.bf16.mxu1 %v5201_v12 }
 0x7c7   :  { %2540 = vmatpush1.bf16.msra.mxu0 %v5204_v62  ;;  %2581 = vmatpush1.bf16.msra.mxu1 %v5207_v4 }
 0x7c8   :  { %2541 = vmatprep.subr.bf16.mxu0 %v5210_v50  ;;  %2582 = vmatprep.subr.bf16.mxu1 %v5213_v3  ;;  %v6184_v3 = vld [vmem:[#allocation59_spill] sm:$0xff] }
 0x7cb   :  { %2542 = vmatpush1.bf16.msra.mxu0 %v5217_v45  ;;  %2583 = vmatpush1.bf16.msra.mxu1 %v5220_v18 }
 0x7cc   :  { %2543 = vmatprep.subr.bf16.mxu0 %v5223_v40  ;;  %2584 = vmatprep.subr.bf16.mxu1 %v5226_v39 }
 0x7cf   :  { %2544 = vmatpush1.bf16.msra.mxu0 %v5230_v6  ;;  %2585 = vmatpush1.bf16.msra.mxu1 %v5233_v44 }
 0x7d0   :  { %2545 = vmatprep.subr.bf16.mxu0 %v5236_v57  ;;  %2586 = vmatprep.subr.bf16.mxu1 %v5239_v10  ;;  %v6185_v10 = vld [vmem:[#allocation84_spill] sm:$0xff] }
 0x7d3   :  { %2546 = vmatpush1.bf16.msra.mxu0 %v5242_v31  ;;  %2587 = vmatpush1.bf16.msra.mxu1 %v5245_v37 }
 0x7d4   :  { %2547 = vmatprep.subr.bf16.mxu0 %v5248_v29  ;;  %2588 = vmatprep.subr.bf16.mxu1 %v5251_v46  ;;  %v6186_v46 = vld [vmem:[#allocation85_spill] sm:$0xff] }
 0x7d7   :  { %2548 = vmatpush1.bf16.msra.mxu0 %v5254_v49  ;;  %2589 = vmatpush1.bf16.msra.mxu1 %v5257_v55 }
 0x7d8   :  { %2549 = vmatprep.subr.bf16.mxu0 %v5260_v59  ;;  %2590 = vmatprep.subr.bf16.mxu1 %v5263_v30 }
 0x7db   :  { %2550 = vmatpush1.bf16.msra.mxu0 %v5266_v24  ;;  %2591 = vmatpush1.bf16.msra.mxu1 %v5269_v35 }
 0x7dc   :  { %2551 = vmatprep.subr.bf16.mxu0 %v5272_v53  ;;  %2592 = vmatprep.subr.bf16.mxu1 %v5275_v17  ;;  %v6187_v17 = vld [vmem:[#allocation35_spill] sm:$0xff] }
 0x7df   :  { %2552 = vmatpush1.bf16.msra.mxu0 %v5278_v1  ;;  %2593 = vmatpush1.bf16.msra.mxu1 %v5281_v33  ;;  %v6180_v33 = vld [vmem:[#allocation31_spill] sm:$0xff] }
 0x7e0   :  { %2553 = vmatprep.subr.bf16.mxu0 %v5285_v2  ;;  %2594 = vmatprep.subr.bf16.mxu1 %v5288_v51 }
 0x7e3   :  { %2554 = vmatpush1.bf16.msra.mxu0 %v5293_v52  ;;  %2595 = vmatpush1.bf16.msra.mxu1 %v5296_v7 }
 0x7e4   :  { %2555 = vmatprep.subr.bf16.mxu0 %v6175_v60  ;;  %2596 = vmatprep.subr.bf16.mxu1 %v6176_v34 }
 0x7e7   :  { %2556 = vmatpush1.bf16.msra.mxu0 %v6177_v36  ;;  %2597 = vmatpush1.bf16.msra.mxu1 %v6178_v5 }
 0x7e8   :  { %2557 = vmatprep.subr.bf16.mxu0 %v6179_v26  ;;  %2598 = vmatprep.subr.bf16.mxu1 %v5315_v47 }
 0x7eb   :  { %2558 = vmatpush1.bf16.msra.mxu0 %v5318_v9  ;;  %2599 = vmatpush1.bf16.msra.mxu1 %v5321_v27  ;;  %v6188_v27 = vld [vmem:[#allocation36_spill] sm:$0xff] }
 0x83b   :  { %v2342_v2 = vpop.f32.mrb[68].mxu0  ;;  %v2383_v51 = vpop.f32.mrb[68].mxu1 }
 0x83c   :  { %v2390_v14 = vadd.f32 %v2342_v2, %v6180_v33  ;;  %v2392_v63 = vadd.f32 %v2383_v51, %v6181_v11  ;;  %v2344_v48 = vpop.f32.mrb[69].mxu0  ;;  %v2385_v13 = vpop.f32.mrb[69].mxu1  ;;  %v6189_v2 = vld [vmem:[#allocation60_spill] sm:$0xff] }
 0x83d   :  { %v2391_v16 = vadd.f32 %v2344_v48, %v6182_v41  ;;  %v2393_v43 = vadd.f32 %v2385_v13, %v6183_v21  ;;  %v2346_v38 = vpop.f32.mrb[70].mxu0  ;;  %v2387_v0 = vpop.f32.mrb[70].mxu1  ;;  %v3123_v41 = vld [vmem:[%s5453_s6] sm:$0xff]   ;;  %v3124_v21 = vld [vmem:[%s5453_s6 + $0x8] sm:$0xff]  }
 0x83e   :  { %v2917_v25 = vmul.f32 -1.442695, %v2390_v14  ;;  %v2347_v47 = vpop.f32.mrb[71].mxu0  ;;  %v2388_v58 = vpop.f32.mrb[71].mxu1  ;;  %v2919_v19 = vmul.f32 -1.442695, %v2392_v63 }
 0x83f   :  { %v2918_v32 = vmul.f32 -1.442695, %v2391_v16  ;;  %v3656_v16 = vmov 0.0   ;;  %v3126_v38 = vld [vmem:[%s5453_s6 + $0x18] sm:$0xff]   ;;  %v3127_v0 = vld [vmem:[%s5453_s6 + $0x20] sm:$0xff]   ;;  %v3129_v47 = vld [vmem:[%s5453_s6 + $0x30] sm:$0xff]  }
 0x840   :  { %3339 = vpow2.f32 %v2917_v25  ;;  %2941 = vmatprep.subr.bf16.mxu0 %v3656_v16  ;;  %v3128_v25 = vld [vmem:[%s5453_s6 + $0x28] sm:$0xff]   ;;  %v3130_v58 = vld [vmem:[%s5453_s6 + $0x38] sm:$0xff]  }
 0x841   :  { %3341 = vpow2.f32 %v2918_v32 }
 0x842   :  { %3343 = vtanh.f32 %v2393_v43  ;;  %v3125_v43 = vld [vmem:[%s5453_s6 + $0x10] sm:$0xff]  }
 0x843   :  { %3345 = vpow2.f32 %v2919_v19 }
 0x84a   :  { %v3340_v20 = vpop.eup %3339 }
 0x84b   :  { %v2510_v22 = vadd.f32 1.0, %v3340_v20  ;;  %v3342_v28 = vpop.eup %3341 }
 0x84c   :  { %v2511_v42 = vadd.f32 1.0, %v3342_v28  ;;  %v3344_v8 = vpop.eup %3343 }
 0x84d   :  { %3347 = vrcp.f32 %v2510_v22  ;;  %v3346_v15 = vpop.eup %3345 }
 0x84e   :  { %3349 = vrcp.f32 %v2511_v42  ;;  %v2512_v50 = vadd.f32 1.0, %v3346_v15 }
 0x850   :  { %3351 = vrcp.f32 %v2512_v50 }
 0x857   :  { %v3348_v12 = vpop.eup %3347 }
 0x858   :  { %v2521_v62 = vmul.f32 %v3348_v12, %v3344_v8  ;;  %v3350_v4 = vpop.eup %3349 }
 0x859   :  { %v2520_v45 = vmul.f32 %v3350_v4, %v6184_v3 }
 0x85a   :  { %v3352_v40 = vpop.eup %3351 }
 0x85b   :  { %v2522_v18 = vadd.f32 %v2521_v62, %v2520_v45 }
 0x85d   :  { %3353 = vtanh.f32 %v2522_v18 }
 0x867   :  { %v3354_v39 = vpop.eup %3353 }
 0x868   :  { %v2524_v6 = vmul.f32 %v3354_v39, %v3352_v40 }
 0x86a   :  { %v2525_v13 = vpack.c.bf16 %v2524_v6, %v2524_v6 }
 0x881   :  { %v2429_v44 = vpop.f32.mrb[72].mxu0  ;;  %v2470_v57 = vpop.f32.mrb[72].mxu1 }
 0x882   :  { %v2430_v31 = vadd.f32 %v2429_v44, %v6185_v10  ;;  %v2431_v37 = vpop.f32.mrb[73].mxu0  ;;  %v2472_v29 = vpop.f32.mrb[73].mxu1  ;;  %v2471_v1 = vadd.f32 %v2470_v57, %v6187_v17 }
 0x883   :  { %v2432_v49 = vadd.f32 %v2431_v37, %v6186_v46  ;;  %v2433_v55 = vpop.f32.mrb[74].mxu0  ;;  %v2474_v59 = vpop.f32.mrb[74].mxu1  ;;  %v2473_v52 = vadd.f32 %v2472_v29, %v6188_v27 }
 0x884   :  { %v2914_v30 = vmul.f32 -1.442695, %v2430_v31  ;;  %v2434_v24 = vpop.f32.mrb[75].mxu0  ;;  %v2475_v35 = vpop.f32.mrb[75].mxu1  ;;  %v2916_v7 = vmul.f32 -1.442695, %v2471_v1 }
 0x885   :  { %v2915_v53 = vmul.f32 -1.442695, %v2432_v49 }
 0x886   :  { %3355 = vpow2.f32 %v2914_v30 }
 0x887   :  { %3357 = vpow2.f32 %v2915_v53  ;;  %v2923_v53 = vld [vmem:[%s5454_s7] ss:$0 sm:$0xff] }
 0x888   :  { %3359 = vtanh.f32 %v2473_v52 }
 0x889   :  { %3361 = vpow2.f32 %v2916_v7 }
 0x890   :  { %v3356_v9 = vpop.eup %3355 }
 0x891   :  { %v2486_v54 = vadd.f32 1.0, %v3356_v9  ;;  %v3358_v23 = vpop.eup %3357 }
 0x892   :  { %v2487_v56 = vadd.f32 1.0, %v3358_v23  ;;  %v3360_v61 = vpop.eup %3359 }
 0x893   :  { %3363 = vrcp.f32 %v2486_v54  ;;  %v3362_v60 = vpop.eup %3361 }
 0x894   :  { %3365 = vrcp.f32 %v2487_v56  ;;  %v2488_v26 = vadd.f32 1.0, %v3362_v60 }
 0x896   :  { %3367 = vrcp.f32 %v2488_v26 }
 0x89d   :  { %v3364_v34 = vpop.eup %3363 }
 0x89e   :  { %v2497_v36 = vmul.f32 %v3364_v34, %v3360_v61  ;;  %v3366_v5 = vpop.eup %3365 }
 0x89f   :  { %v2496_v51 = vmul.f32 %v3366_v5, %v6189_v2 }
 0x8a0   :  { %v3368_v14 = vpop.eup %3367 }
 0x8a1   :  { %v5400_v33 = vadd.f32 %v2497_v36, %v2496_v51 }
 0x8a3   :  { %3369 = vtanh.f32 %v5400_v33 }
 0x8ad   :  { %v3370_v11 = vpop.eup %3369 }
 0x8ae   :  { %v2500_v63 = vmul.f32 %v3370_v11, %v3368_v14 }
 0x8b0   :  { %v2526_v48 = vpack.c.bf16 %v2500_v63, %v2500_v63 }
 0x8b2   :  { %2559 = vmatprep.mubr.bf16.mxu0 %v2526_v48  ;;  %2600 = vmatprep.mubr.bf16.mxu1 %v2526_v48 }
 0x8b3   :  { %2560 = vmatmul.mubr.bf16.vlgmr.msra.gmra.mrb[76].mxu0 %v2525_v13  ;;  %2601 = vmatmul.mubr.bf16.vlgmr.msra.gmra.mrb[76].mxu1 %v2525_v13 }
 0x8b4   :  { %2942 = vmatpush3.bf16.msra.mxu0 %v3123_v41  ;;  %2957 = vmatprep.mubr.msk.bf16.mxu0 %vm3657_vm1, %v3656_v16 }
 0x8b5   :  { %2943 = vmatprep.subr.bf16.mxu0 %v3656_v16 }
 0x8b8   :  { %2944 = vmatpush3.bf16.msra.mxu0 %v3124_v21 }
 0x8b9   :  { %2945 = vmatprep.subr.bf16.mxu0 %v3656_v16 }
 0x8bc   :  { %2946 = vmatpush3.bf16.msra.mxu0 %v3125_v43 }
 0x8bd   :  { %2947 = vmatprep.subr.bf16.mxu0 %v3656_v16 }
 0x8c0   :  { %2948 = vmatpush3.bf16.msra.mxu0 %v3126_v38 }
 0x8c1   :  { %2949 = vmatprep.subr.bf16.mxu0 %v3656_v16 }
 0x8c4   :  { %2950 = vmatpush3.bf16.msra.mxu0 %v3127_v0 }
 0x8c5   :  { %2951 = vmatprep.subr.bf16.mxu0 %v3656_v16 }
 0x8c8   :  { %2952 = vmatpush3.bf16.msra.mxu0 %v3128_v25 }
 0x8c9   :  { %2953 = vmatprep.subr.bf16.mxu0 %v3656_v16 }
 0x8cc   :  { %2954 = vmatpush3.bf16.msra.mxu0 %v3129_v47 }
 0x8cd   :  { %2955 = vmatprep.subr.bf16.mxu0 %v3656_v16 }
 0x8d0   :  { %2956 = vmatpush3.bf16.msra.mxu0 %v3130_v58 }
 0x986   :  { %v2561_v32 = vpop.f32.mrb[76].mxu0  ;;  %v2602_v19 = vpop.f32.mrb[76].mxu1 }
 0x987   :  { %v2562_v20 = vadd.f32 %v2561_v32, %v6185_v10  ;;  %v2563_v22 = vpop.f32.mrb[77].mxu0  ;;  %v2604_v28 = vpop.f32.mrb[77].mxu1  ;;  %v2603_v3 = vadd.f32 %v2602_v19, %v6187_v17 }
 0x988   :  { %v2564_v42 = vadd.f32 %v2563_v22, %v6186_v46  ;;  %v2565_v8 = vpop.f32.mrb[78].mxu0  ;;  %v2606_v15 = vpop.f32.mrb[78].mxu1  ;;  %v2605_v45 = vadd.f32 %v2604_v28, %v6188_v27 }
 0x989   :  { %v2920_v12 = vmul.f32 -1.442695, %v2562_v20  ;;  %v2566_v62 = vpop.f32.mrb[79].mxu0  ;;  %v2607_v4 = vpop.f32.mrb[79].mxu1  ;;  %v2922_v18 = vmul.f32 -1.442695, %v2603_v3 }
 0x98a   :  { %v2921_v50 = vmul.f32 -1.442695, %v2564_v42 }
 0x98b   :  { %3371 = vpow2.f32 %v2920_v12 }
 0x98c   :  { %3373 = vpow2.f32 %v2921_v50 }
 0x98d   :  { %3375 = vtanh.f32 %v2605_v45 }
 0x98e   :  { %3377 = vpow2.f32 %v2922_v18 }
 0x995   :  { %v3372_v40 = vpop.eup %3371 }
 0x996   :  { %v2618_v39 = vadd.f32 1.0, %v3372_v40  ;;  %v3374_v6 = vpop.eup %3373 }
 0x997   :  { %v2619_v44 = vadd.f32 1.0, %v3374_v6  ;;  %v3376_v57 = vpop.eup %3375 }
 0x998   :  { %3379 = vrcp.f32 %v2618_v39  ;;  %v3378_v10 = vpop.eup %3377 }
 0x999   :  { %3381 = vrcp.f32 %v2619_v44  ;;  %v2620_v46 = vadd.f32 1.0, %v3378_v10 }
 0x99b   :  { %3383 = vrcp.f32 %v2620_v46 }
 0x9a2   :  { %v3380_v31 = vpop.eup %3379 }
 0x9a3   :  { %v2629_v37 = vmul.f32 %v3380_v31, %v3376_v57  ;;  %v3382_v29 = vpop.eup %3381 }
 0x9a4   :  { %v2628_v49 = vmul.f32 %v3382_v29, %v5400_v33 }
 0x9a5   :  { %v3384_v59 = vpop.eup %3383 }
 0x9a6   :  { %v2630_v55 = vadd.f32 %v2629_v37, %v2628_v49 }
 0x9a8   :  { %3385 = vtanh.f32 %v2630_v55 }
 0x9b2   :  { %v3386_v30 = vpop.eup %3385 }
 0x9b3   :  { %v2632_v24 = vmul.f32 %v3386_v30, %v3384_v59 }
 0x9b5   :  { %v2633_v35 = vpack.c.bf16 %v2632_v24, %v2632_v24 }
 0x9b7   :  { %2958 = vmatmul.mubr.bf16.vlgmr.msra.gmra.mrb[80].mxu0 %v2633_v35 }
 0xa8a   :  { %v2739_v17 = vpop.f32.mrb[80].mxu0 }
 0xa8b   :  { %v2740_v1 = vadd.f32 %v2923_v53, %v2739_v17  ;;  %v2959_v27 = vpop.f32.mrb[81].mxu0 }
 0xa8c   :  { %v2742_v52 = vpop.f32.mrb[82].mxu0 }
 0xa8d   :  { %v2960_v7 = vpop.f32.mrb[83].mxu0  ;;  %2746 = vst.msk [vmem:[#allocation7] sm:$0xff] %vm2745_vm2, %v2740_v1 }
 0xa8e   :  { %3634 = shalt.err (!%p3631_p6)
}
 0xa8f   :  { %s3635_s7 = scalar_lea.hbm %s5455_s8, 128 }
 0xa90   :  { %p3636_p7 = scmp.ne.s32.totalorder %s5455_s8, %s3635_s7  ;;  %p3639_p8 = scmp.lt.u32.totalorder %s3635_s7, %s5455_s8 }
 0xa92   :  { %p3641_p9 = pnand %p3639_p8, %p3636_p7 }
 0xa94   :  { %3644 = shalt.err (!%p3641_p9)
}
 0xa95   :  { %2756 = dma.vmem_to_hbm [thread:$0]  %s2754_s1, 128, %s5455_s8, [#allocation4]  }
 0xa96   :  { %3649 = dma.done.wait [#allocation4], 128  }
 0xa97   :  { %3650 = vsyncadd [#allocation4], 4294967168 }
 0xa98   :  { %2760 = vsyncpa [#allocation3], 1 }
 0xa99   :  { %2761 = vsyncpa [#allocation6], 1 }
 0xa9a   :  { %2762 = vsyncpa [#allocation4], 1 }

</bundles_post_ra>
